<compile_context>
chip_gen: v5e
topology: v5e:2x2
jax: 0.10.0
libtpu: 0.0.40
codegen_flags: <defaults>
</compile_context>

<pallas_src>
import functools

import jax
import jax.numpy as jnp
from jax import lax
from jax.experimental import pallas as pl
from jax.experimental.pallas import tpu as pltpu

EPS_NORM = 1e-12   # F.normalize eps (clamps the norm)
EPS_BN = 1e-5      # nn.BatchNorm1d eps

OUT_DIM = 128      # synthetic encoder out_dim (128-aligned -> lane-dense stores)
PROJ_SIZE = 128    # projection_size (256 in original, shrunk; lane-aligned)
HIDDEN = 256       # projection_hidden_size (4096 in original, shrunk)


# ----------------------------- in-kernel helpers ----------------------------

def _l2_normalize(x):
    # F.normalize(p=2): x / max(||x||, eps)  ==  x * rsqrt(max(||x||^2, eps^2))
    # rsqrt goes to the EUP slot (free alongside VALU work).
    ss = jnp.sum(x * x, axis=-1, keepdims=True)
    return x * lax.rsqrt(jnp.maximum(ss, EPS_NORM * EPS_NORM))


def _mlp(x, w1, b1, g, bt, w2, b2):
    # Linear -> BatchNorm1d (training-mode stats over THIS view's rows) -> ReLU -> Linear
    h = jnp.dot(x, w1, preferred_element_type=jnp.float32) + b1
    mean = jnp.mean(h, axis=0, keepdims=True)
    var = jnp.mean((h - mean) ** 2, axis=0, keepdims=True)   # biased var (BN fwd)
    h = (h - mean) * lax.rsqrt(var + EPS_BN) * g + bt
    h = jnp.maximum(h, 0.0)
    return jnp.dot(h, w2, preferred_element_type=jnp.float32) + b2


# ------------------------------ Pallas kernels ------------------------------

def fused_byol_kernel(img1_ref, img2_ref,
                      ew_ref, eb_ref, tew_ref, teb_ref,
                      pw1, pb1, pg, pbt, pw2, pb2,      # online projector
                      qw1, qb1, qg, qbt, qw2, qb2,      # online predictor
                      tw1, tb1, tg, tbt, tw2, tb2,      # target projector
                      feat1_ref, feat2_ref, loss_ref,
                      *, n_shot):
    # Encoder: GAP folded into a single pre-scaled (C*H*W, D) matmul -> lane-dense,
    # K = C*H*W instead of a K=3 MXU contraction.
    img1 = img1_ref[...]
    img2 = img2_ref[...]
    ew, eb = ew_ref[...], eb_ref[...]
    feat1 = jnp.dot(img1, ew, preferred_element_type=jnp.float32) + eb
    feat2 = jnp.dot(img2, ew, preferred_element_type=jnp.float32) + eb
    feat1_ref[...] = feat1          # online_feat_one_all (shots + queries)
    feat2_ref[...] = feat2          # online_feat_two_all

    # online_feat_one/two are exact prefixes of the "all" features -> slice, no recompute.
    shot1 = feat1[:n_shot, :]
    shot2 = feat2[:n_shot, :]

    # Online projector + predictor (BatchNorm stats per view, matching the reference).
    proj1 = _mlp(shot1, pw1[...], pb1[...], pg[...], pbt[...], pw2[...], pb2[...])
    proj2 = _mlp(shot2, pw1[...], pb1[...], pg[...], pbt[...], pw2[...], pb2[...])
    pred1 = _mlp(proj1, qw1[...], qb1[...], qg[...], qbt[...], qw2[...], qb2[...])
    pred2 = _mlp(proj2, qw1[...], qb1[...], qg[...], qbt[...], qw2[...], qb2[...])

    # Target encoder + target projector (no-grad branch in the reference; this
    # fused kernel is forward-only, so values are identical).
    tew, teb = tew_ref[...], teb_ref[...]
    tfeat1 = jnp.dot(img1[:n_shot, :], tew, preferred_element_type=jnp.float32) + teb
    tfeat2 = jnp.dot(img2[:n_shot, :], tew, preferred_element_type=jnp.float32) + teb
    tproj1 = _mlp(tfeat1, tw1[...], tb1[...], tg[...], tbt[...], tw2[...], tb2[...])
    tproj2 = _mlp(tfeat2, tw1[...], tb1[...], tg[...], tbt[...], tw2[...], tb2[...])

    # BYOL loss fused in the epilogue: loss_one + loss_two per shot row.
    p1, z2 = _l2_normalize(pred1), _l2_normalize(tproj2)
    p2, z1 = _l2_normalize(pred2), _l2_normalize(tproj1)
    l1 = 2.0 - 2.0 * jnp.sum(p1 * z2, axis=-1, keepdims=True)
    l2 = 2.0 - 2.0 * jnp.sum(p2 * z1, axis=-1, keepdims=True)
    loss_ref[...] = l1 + l2         # (n_shot, 1) -- tiny, reshaped outside


def logits_kernel(q_ref, s_ref, temp_ref, o_ref):
    # q: (B, 2Q, D); s: (B, Way, 2*Shot, D); temp: scalar in SMEM.
    # method == 'cos': mean over shots, L2-normalize, batched dot, scale by temp.
    s = jnp.mean(s_ref[...], axis=2)
    s = _l2_normalize(s)
    q = _l2_normalize(q_ref[...])
    logits = jnp.einsum('bqd,bwd->bqw', q, s, preferred_element_type=jnp.float32)
    o_ref[...] = logits * temp_ref[0]


# ------------------------------ wrappers -------------------------------------

def fused_byol_forward(image_one, image_two, params, n_shot):
    """One pallas_call: encoders + projector + predictor + target branch + BYOL loss."""
    N_all, C, H, W = image_one.shape
    HW = H * W
    D = params['enc']['w'].shape[1]

    def expand_enc_w(w):
        # Fold the global-average-pool into the linear: (C, D) -> (C*H*W, D) / (H*W).
        return jnp.broadcast_to(w[:, None, :] / HW, (C, HW, D)).reshape(C * HW, D)

    img1 = image_one.reshape(N_all, C * HW)
    img2 = image_two.reshape(N_all, C * HW)
    ew = expand_enc_w(params['enc']['w'])
    tew = expand_enc_w(params['target_enc']['w'])

    proj, pred, tproj = params['proj'], params['pred'], params['target_proj']
    kernel = functools.partial(fused_byol_kernel, n_shot=n_shot)
    feat1, feat2, loss = pl.pallas_call(
        kernel,
        out_shape=(jax.ShapeDtypeStruct((N_all, D), jnp.float32),
                   jax.ShapeDtypeStruct((N_all, D), jnp.float32),
                   jax.ShapeDtypeStruct((n_shot, 1), jnp.float32)),
    )(img1, img2,
      ew, params['enc']['b'], tew, params['target_enc']['b'],
      proj['w1'], proj['b1'], proj['gamma'], proj['beta'], proj['w2'], proj['b2'],
      pred['w1'], pred['b1'], pred['gamma'], pred['beta'], pred['w2'], pred['b2'],
      tproj['w1'], tproj['b1'], tproj['gamma'], tproj['beta'], tproj['w2'], tproj['b2'])
    return feat1, feat2, loss.reshape(n_shot)


def compute_logits(x_query, x_shot, temp):
    B, Q2, D = x_query.shape
    way = x_shot.shape[1]
    return pl.pallas_call(
        logits_kernel,
        out_shape=jax.ShapeDtypeStruct((B, Q2, way), jnp.float32),
        in_specs=[pl.BlockSpec(memory_space=pltpu.MemorySpace.VMEM),
                  pl.BlockSpec(memory_space=pltpu.MemorySpace.VMEM),
                  pl.BlockSpec(memory_space=pltpu.MemorySpace.SMEM)],
        out_specs=pl.BlockSpec(memory_space=pltpu.MemorySpace.VMEM),
    )(x_query, x_shot, temp)


# ------------------------------ forward --------------------------------------

def meta_byol_forward(params, x_shot_one, x_query_one, x_shot_two, x_query_two):
    shot_shape = x_shot_one.shape[:-3]
    query_shape = x_query_one.shape[:-3]
    img_shape = x_shot_one.shape[-3:]

    xs1 = x_shot_one.reshape((-1,) + img_shape)
    xq1 = x_query_one.reshape((-1,) + img_shape)
    xs2 = x_shot_two.reshape((-1,) + img_shape)
    xq2 = x_query_two.reshape((-1,) + img_shape)
    n_shot, n_query = xs1.shape[0], xq1.shape[0]

    image_one = jnp.concatenate([xs1, xq1], axis=0)
    image_two = jnp.concatenate([xs2, xq2], axis=0)

    # Single fused kernel: encoders, MLPs and BYOL loss (intermediates stay in VMEM).
    # TODO(synk): the target branch is no-grad in the reference; apply a
    # custom_vjp / split call if gradients of this fused kernel are ever needed.
    feat1_all, feat2_all, loss_byol = fused_byol_forward(
        image_one, image_two, params, n_shot)

    # Episode reshape / concat plumbing (tiny) stays in plain XLA.
    xs1f = feat1_all[:n_shot].reshape(shot_shape + (-1,))
    xq1f = feat1_all[-n_query:].reshape(query_shape + (-1,))
    xs2f = feat2_all[:n_shot].reshape(shot_shape + (-1,))
    xq2f = feat2_all[-n_query:].reshape(query_shape + (-1,))

    x_shot = jnp.concatenate([xs1f, xs2f], axis=2)       # (B, Way, 2*Shot, D)
    x_query = jnp.concatenate([xq1f, xq2f], axis=1)      # (B, 2*Query, D)

    logits = compute_logits(x_query, x_shot, params['temp'])  # (B, 2*Query, Way)
    return loss_byol, logits


# ------------------------------ params ----------------------------------------

def make_mlp_params(key, din, hidden, dout):
    k1, k2 = jax.random.split(key)
    return dict(
        w1=0.05 * jax.random.normal(k1, (din, hidden), jnp.float32),
        b1=jnp.zeros((1, hidden), jnp.float32),
        gamma=jnp.ones((1, hidden), jnp.float32),
        beta=jnp.zeros((1, hidden), jnp.float32),
        w2=0.05 * jax.random.normal(k2, (hidden, dout), jnp.float32),
        b2=jnp.zeros((1, dout), jnp.float32),
    )


if __name__ == "__main__":
    B, WAY, SHOT, QUERY = 1, 4, 1, 8
    C, H, Wd = 3, 16, 16

    kparams = jax.random.PRNGKey(1)
    ke, kpj, kpd = jax.random.split(kparams, 3)
    enc = dict(w=0.1 * jax.random.normal(ke, (C, OUT_DIM), jnp.float32),
               b=jnp.zeros((1, OUT_DIM), jnp.float32))
    proj = make_mlp_params(kpj, OUT_DIM, HIDDEN, PROJ_SIZE)
    pred = make_mlp_params(kpd, PROJ_SIZE, HIDDEN, PROJ_SIZE)
    params = dict(
        enc=enc, proj=proj, pred=pred,
        # deepcopy of online encoder+projector (identical weights at init)
        target_enc={k: v for k, v in enc.items()},
        target_proj={k: v for k, v in proj.items()},
        temp=jnp.full((1,), 10.0, jnp.float32),   # learnable temp=10.0
    )

    kx = jax.random.PRNGKey(0)
    k1, k2, k3, k4 = jax.random.split(kx, 4)
    x_shot_one = jax.random.normal(k1, (B, WAY, SHOT, C, H, Wd), jnp.float32)
    x_query_one = jax.random.normal(k2, (B, QUERY, C, H, Wd), jnp.float32)
    x_shot_two = jax.random.normal(k3, (B, WAY, SHOT, C, H, Wd), jnp.float32)
    x_query_two = jax.random.normal(k4, (B, QUERY, C, H, Wd), jnp.float32)

    loss_byol, logits = jax.jit(meta_byol_forward)(
        params, x_shot_one, x_query_one, x_shot_two, x_query_two)
    jax.block_until_ready((loss_byol, logits))

    assert loss_byol.shape == (B * WAY * SHOT,)
    assert logits.shape == (B, 2 * QUERY, WAY)
    assert bool(jnp.all(jnp.isfinite(loss_byol))) and bool(jnp.all(jnp.isfinite(logits)))
    print("KERNEL_OK")
</pallas_src>

<mosaic_0001>
module attributes {stable_mosaic.version = 11 : i64} {
  func.func @logits_kernel(%arg0: memref<1x16x128xf32, #tpu.memory_space<vmem>>, %arg1: memref<1x4x2x128xf32, #tpu.memory_space<vmem>>, %arg2: memref<1xf32, #tpu.memory_space<smem>>, %arg3: memref<1x16x4xf32, #tpu.memory_space<vmem>>) attributes {dimension_semantics = [], scalar_prefetch = 0 : i64, scratch_operands = 0 : i64, tpu.core_type = #tpu.core_type<tc>} {
    %c0 = arith.constant 0 : index
    %c0_0 = arith.constant 0 : index
    %c0_1 = arith.constant 0 : index
    %c0_2 = arith.constant 0 : index
    %0 = vector.load %arg1[%c0, %c0_0, %c0_1, %c0_2] : memref<1x4x2x128xf32, #tpu.memory_space<vmem>>, vector<1x4x2x128xf32>
    %cst = arith.constant dense<0.000000e+00> : vector<1x4x128xf32>
    %1 = vector.multi_reduction <add>, %0, %cst [2] : vector<1x4x2x128xf32> to vector<1x4x128xf32>
    %cst_3 = arith.constant 2.000000e+00 : f32
    %2 = vector.broadcast %cst_3 : f32 to vector<1x4x128xf32>
    %3 = arith.divf %1, %2 : vector<1x4x128xf32>
    %4 = arith.mulf %3, %3 : vector<1x4x128xf32>
    %cst_4 = arith.constant dense<0.000000e+00> : vector<1x4xf32>
    %5 = vector.multi_reduction <add>, %4, %cst_4 [2] : vector<1x4x128xf32> to vector<1x4xf32>
    %6 = vector.shape_cast %5 : vector<1x4xf32> to vector<1x4x1xf32>
    %cst_5 = arith.constant 1.000000e-24 : f32
    %7 = vector.broadcast %cst_5 : f32 to vector<1x4x1xf32>
    %8 = arith.maximumf %6, %7 : vector<1x4x1xf32>
    %9 = math.rsqrt %8 : vector<1x4x1xf32>
    %10 = vector.broadcast %9 : vector<1x4x1xf32> to vector<1x4x128xf32>
    %11 = arith.mulf %3, %10 : vector<1x4x128xf32>
    %c0_6 = arith.constant 0 : index
    %c0_7 = arith.constant 0 : index
    %c0_8 = arith.constant 0 : index
    %12 = vector.load %arg0[%c0_6, %c0_7, %c0_8] : memref<1x16x128xf32, #tpu.memory_space<vmem>>, vector<1x16x128xf32>
    %13 = arith.mulf %12, %12 : vector<1x16x128xf32>
    %cst_9 = arith.constant dense<0.000000e+00> : vector<1x16xf32>
    %14 = vector.multi_reduction <add>, %13, %cst_9 [2] : vector<1x16x128xf32> to vector<1x16xf32>
    %15 = vector.shape_cast %14 : vector<1x16xf32> to vector<1x16x1xf32>
    %cst_10 = arith.constant 1.000000e-24 : f32
    %16 = vector.broadcast %cst_10 : f32 to vector<1x16x1xf32>
    %17 = arith.maximumf %15, %16 : vector<1x16x1xf32>
    %18 = math.rsqrt %17 : vector<1x16x1xf32>
    %19 = vector.broadcast %18 : vector<1x16x1xf32> to vector<1x16x128xf32>
    %20 = arith.mulf %12, %19 : vector<1x16x128xf32>
    "tpu.trace_start"() <{level = 10 : i32, message = "bqd,bwd->bqw"}> : () -> ()
    %cst_11 = arith.constant dense<0.000000e+00> : vector<1x16x4xf32>
    %21 = tpu.matmul %20, %11, %cst_11 {dimension_numbers = #tpu.dot_dimension_numbers<[2], [2], [1], [1], [0, 0, 0, 1, 1, 1], [0], [0]>} : vector<1x16x128xf32>, vector<1x4x128xf32>, vector<1x16x4xf32> -> vector<1x16x4xf32>
    "tpu.trace_stop"() : () -> ()
    %c0_12 = arith.constant 0 : index
    %22 = memref.load %arg2[%c0_12] : memref<1xf32, #tpu.memory_space<smem>>
    %23 = vector.broadcast %22 : f32 to vector<1x16x4xf32>
    %24 = arith.mulf %21, %23 : vector<1x16x4xf32>
    %c0_13 = arith.constant 0 : index
    %c0_14 = arith.constant 0 : index
    %c0_15 = arith.constant 0 : index
    %25 = vector.load %arg3[%c0_13, %c0_14, %c0_15] : memref<1x16x4xf32, #tpu.memory_space<vmem>>, vector<1x16x4xf32>
    tpu.vector_store %arg3[%c0_13, %c0_14, %c0_15], %24 {strides = array<i32>} : memref<1x16x4xf32, #tpu.memory_space<vmem>>, vector<1x16x4xf32>,
    return
  }
}

module attributes {stable_mosaic.version = 11 : i64} {
  func.func @fused_byol_kernel(%arg0: memref<12x768xf32, #tpu.memory_space<vmem>>, %arg1: memref<12x768xf32, #tpu.memory_space<vmem>>, %arg2: memref<768x128xf32, #tpu.memory_space<vmem>>, %arg3: memref<1x128xf32, #tpu.memory_space<vmem>>, %arg4: memref<768x128xf32, #tpu.memory_space<vmem>>, %arg5: memref<1x128xf32, #tpu.memory_space<vmem>>, %arg6: memref<128x256xf32, #tpu.memory_space<vmem>>, %arg7: memref<1x256xf32, #tpu.memory_space<vmem>>, %arg8: memref<1x256xf32, #tpu.memory_space<vmem>>, %arg9: memref<1x256xf32, #tpu.memory_space<vmem>>, %arg10: memref<256x128xf32, #tpu.memory_space<vmem>>, %arg11: memref<1x128xf32, #tpu.memory_space<vmem>>, %arg12: memref<128x256xf32, #tpu.memory_space<vmem>>, %arg13: memref<1x256xf32, #tpu.memory_space<vmem>>, %arg14: memref<1x256xf32, #tpu.memory_space<vmem>>, %arg15: memref<1x256xf32, #tpu.memory_space<vmem>>, %arg16: memref<256x128xf32, #tpu.memory_space<vmem>>, %arg17: memref<1x128xf32, #tpu.memory_space<vmem>>, %arg18: memref<128x256xf32, #tpu.memory_space<vmem>>, %arg19: memref<1x256xf32, #tpu.memory_space<vmem>>, %arg20: memref<1x256xf32, #tpu.memory_space<vmem>>, %arg21: memref<1x256xf32, #tpu.memory_space<vmem>>, %arg22: memref<256x128xf32, #tpu.memory_space<vmem>>, %arg23: memref<1x128xf32, #tpu.memory_space<vmem>>, %arg24: memref<12x128xf32, #tpu.memory_space<vmem>>, %arg25: memref<12x128xf32, #tpu.memory_space<vmem>>, %arg26: memref<4x1xf32, #tpu.memory_space<vmem>>) attributes {dimension_semantics = [], scalar_prefetch = 0 : i64, scratch_operands = 0 : i64, tpu.core_type = #tpu.core_type<tc>} {
    %c0 = arith.constant 0 : index
    %c0_0 = arith.constant 0 : index
    %0 = vector.load %arg0[%c0, %c0_0] : memref<12x768xf32, #tpu.memory_space<vmem>>, vector<12x768xf32>
    %c0_1 = arith.constant 0 : index
    %c0_2 = arith.constant 0 : index
    %1 = vector.load %arg1[%c0_1, %c0_2] : memref<12x768xf32, #tpu.memory_space<vmem>>, vector<12x768xf32>
    %c0_3 = arith.constant 0 : index
    %c0_4 = arith.constant 0 : index
    %2 = vector.load %arg2[%c0_3, %c0_4] : memref<768x128xf32, #tpu.memory_space<vmem>>, vector<768x128xf32>
    %c0_5 = arith.constant 0 : index
    %c0_6 = arith.constant 0 : index
    %3 = vector.load %arg3[%c0_5, %c0_6] : memref<1x128xf32, #tpu.memory_space<vmem>>, vector<1x128xf32>
    %cst = arith.constant dense<0.000000e+00> : vector<12x128xf32>
    %4 = tpu.matmul %0, %2, %cst {dimension_numbers = #tpu.dot_dimension_numbers<[1], [0], [0], [1], [0, 0, 1, 1], [], []>} : vector<12x768xf32>, vector<768x128xf32>, vector<12x128xf32> -> vector<12x128xf32>
    %5 = vector.broadcast %3 : vector<1x128xf32> to vector<12x128xf32>
    %6 = arith.addf %4, %5 : vector<12x128xf32>
    %cst_7 = arith.constant dense<0.000000e+00> : vector<12x128xf32>
    %7 = tpu.matmul %1, %2, %cst_7 {dimension_numbers = #tpu.dot_dimension_numbers<[1], [0], [0], [1], [0, 0, 1, 1], [], []>} : vector<12x768xf32>, vector<768x128xf32>, vector<12x128xf32> -> vector<12x128xf32>
    %8 = vector.broadcast %3 : vector<1x128xf32> to vector<12x128xf32>
    %9 = arith.addf %7, %8 : vector<12x128xf32>
    %c0_8 = arith.constant 0 : index
    %c0_9 = arith.constant 0 : index
    %10 = vector.load %arg24[%c0_8, %c0_9] : memref<12x128xf32, #tpu.memory_space<vmem>>, vector<12x128xf32>
    tpu.vector_store %arg24[%c0_8, %c0_9], %6 {strides = array<i32>} : memref<12x128xf32, #tpu.memory_space<vmem>>, vector<12x128xf32>,
    %c0_10 = arith.constant 0 : index
    %c0_11 = arith.constant 0 : index
    %11 = vector.load %arg25[%c0_10, %c0_11] : memref<12x128xf32, #tpu.memory_space<vmem>>, vector<12x128xf32>
    tpu.vector_store %arg25[%c0_10, %c0_11], %9 {strides = array<i32>} : memref<12x128xf32, #tpu.memory_space<vmem>>, vector<12x128xf32>,
    %12 = vector.extract_strided_slice %6 {offsets = [0, 0], sizes = [4, 128], strides = [1, 1]} : vector<12x128xf32> to vector<4x128xf32>
    %13 = vector.extract_strided_slice %9 {offsets = [0, 0], sizes = [4, 128], strides = [1, 1]} : vector<12x128xf32> to vector<4x128xf32>
    %c0_12 = arith.constant 0 : index
    %c0_13 = arith.constant 0 : index
    %14 = vector.load %arg6[%c0_12, %c0_13] : memref<128x256xf32, #tpu.memory_space<vmem>>, vector<128x256xf32>
    %c0_14 = arith.constant 0 : index
    %c0_15 = arith.constant 0 : index
    %15 = vector.load %arg7[%c0_14, %c0_15] : memref<1x256xf32, #tpu.memory_space<vmem>>, vector<1x256xf32>
    %c0_16 = arith.constant 0 : index
    %c0_17 = arith.constant 0 : index
    %16 = vector.load %arg8[%c0_16, %c0_17] : memref<1x256xf32, #tpu.memory_space<vmem>>, vector<1x256xf32>
    %c0_18 = arith.constant 0 : index
    %c0_19 = arith.constant 0 : index
    %17 = vector.load %arg9[%c0_18, %c0_19] : memref<1x256xf32, #tpu.memory_space<vmem>>, vector<1x256xf32>
    %c0_20 = arith.constant 0 : index
    %c0_21 = arith.constant 0 : index
    %18 = vector.load %arg10[%c0_20, %c0_21] : memref<256x128xf32, #tpu.memory_space<vmem>>, vector<256x128xf32>
    %c0_22 = arith.constant 0 : index
    %c0_23 = arith.constant 0 : index
    %19 = vector.load %arg11[%c0_22, %c0_23] : memref<1x128xf32, #tpu.memory_space<vmem>>, vector<1x128xf32>
    %cst_24 = arith.constant dense<0.000000e+00> : vector<4x256xf32>
    %20 = tpu.matmul %12, %14, %cst_24 {dimension_numbers = #tpu.dot_dimension_numbers<[1], [0], [0], [1], [0, 0, 1, 1], [], []>} : vector<4x128xf32>, vector<128x256xf32>, vector<4x256xf32> -> vector<4x256xf32>
    %21 = vector.broadcast %15 : vector<1x256xf32> to vector<4x256xf32>
    %22 = arith.addf %20, %21 : vector<4x256xf32>
    %cst_25 = arith.constant dense<0.000000e+00> : vector<256xf32>
    %23 = vector.multi_reduction <add>, %22, %cst_25 [0] : vector<4x256xf32> to vector<256xf32>
    %24 = vector.shape_cast %23 : vector<256xf32> to vector<1x256xf32>
    %cst_26 = arith.constant 4.000000e+00 : f32
    %25 = vector.broadcast %cst_26 : f32 to vector<1x256xf32>
    %26 = arith.divf %24, %25 : vector<1x256xf32>
    %27 = vector.broadcast %26 : vector<1x256xf32> to vector<4x256xf32>
    %28 = arith.subf %22, %27 : vector<4x256xf32>
    %29 = arith.mulf %28, %28 : vector<4x256xf32>
    %cst_27 = arith.constant dense<0.000000e+00> : vector<256xf32>
    %30 = vector.multi_reduction <add>, %29, %cst_27 [0] : vector<4x256xf32> to vector<256xf32>
    %31 = vector.shape_cast %30 : vector<256xf32> to vector<1x256xf32>
    %cst_28 = arith.constant 4.000000e+00 : f32
    %32 = vector.broadcast %cst_28 : f32 to vector<1x256xf32>
    %33 = arith.divf %31, %32 : vector<1x256xf32>
    %34 = vector.broadcast %26 : vector<1x256xf32> to vector<4x256xf32>
    %35 = arith.subf %22, %34 : vector<4x256xf32>
    %cst_29 = arith.constant 9.99999974E-6 : f32
    %36 = vector.broadcast %cst_29 : f32 to vector<1x256xf32>
    %37 = arith.addf %33, %36 : vector<1x256xf32>
    %38 = math.rsqrt %37 : vector<1x256xf32>
    %39 = vector.broadcast %38 : vector<1x256xf32> to vector<4x256xf32>
    %40 = arith.mulf %35, %39 : vector<4x256xf32>
    %41 = vector.broadcast %16 : vector<1x256xf32> to vector<4x256xf32>
    %42 = arith.mulf %40, %41 : vector<4x256xf32>
    %43 = vector.broadcast %17 : vector<1x256xf32> to vector<4x256xf32>
    %44 = arith.addf %42, %43 : vector<4x256xf32>
    %cst_30 = arith.constant 0.000000e+00 : f32
    %45 = vector.broadcast %cst_30 : f32 to vector<4x256xf32>
    %46 = arith.maximumf %44, %45 : vector<4x256xf32>
    %cst_31 = arith.constant dense<0.000000e+00> : vector<4x128xf32>
    %47 = tpu.matmul %46, %18, %cst_31 {dimension_numbers = #tpu.dot_dimension_numbers<[1], [0], [0], [1], [0, 0, 1, 1], [], []>} : vector<4x256xf32>, vector<256x128xf32>, vector<4x128xf32> -> vector<4x128xf32>
    %48 = vector.broadcast %19 : vector<1x128xf32> to vector<4x128xf32>
    %49 = arith.addf %47, %48 : vector<4x128xf32>
    %c0_32 = arith.constant 0 : index
    %c0_33 = arith.constant 0 : index
    %50 = vector.load %arg6[%c0_32, %c0_33] : memref<128x256xf32, #tpu.memory_space<vmem>>, vector<128x256xf32>
    %c0_34 = arith.constant 0 : index
    %c0_35 = arith.constant 0 : index
    %51 = vector.load %arg7[%c0_34, %c0_35] : memref<1x256xf32, #tpu.memory_space<vmem>>, vector<1x256xf32>
    %c0_36 = arith.constant 0 : index
    %c0_37 = arith.constant 0 : index
    %52 = vector.load %arg8[%c0_36, %c0_37] : memref<1x256xf32, #tpu.memory_space<vmem>>, vector<1x256xf32>
    %c0_38 = arith.constant 0 : index
    %c0_39 = arith.constant 0 : index
    %53 = vector.load %arg9[%c0_38, %c0_39] : memref<1x256xf32, #tpu.memory_space<vmem>>, vector<1x256xf32>
    %c0_40 = arith.constant 0 : index
    %c0_41 = arith.constant 0 : index
    %54 = vector.load %arg10[%c0_40, %c0_41] : memref<256x128xf32, #tpu.memory_space<vmem>>, vector<256x128xf32>
    %c0_42 = arith.constant 0 : index
    %c0_43 = arith.constant 0 : index
    %55 = vector.load %arg11[%c0_42, %c0_43] : memref<1x128xf32, #tpu.memory_space<vmem>>, vector<1x128xf32>
    %cst_44 = arith.constant dense<0.000000e+00> : vector<4x256xf32>
    %56 = tpu.matmul %13, %50, %cst_44 {dimension_numbers = #tpu.dot_dimension_numbers<[1], [0], [0], [1], [0, 0, 1, 1], [], []>} : vector<4x128xf32>, vector<128x256xf32>, vector<4x256xf32> -> vector<4x256xf32>
    %57 = vector.broadcast %51 : vector<1x256xf32> to vector<4x256xf32>
    %58 = arith.addf %56, %57 : vector<4x256xf32>
    %cst_45 = arith.constant dense<0.000000e+00> : vector<256xf32>
    %59 = vector.multi_reduction <add>, %58, %cst_45 [0] : vector<4x256xf32> to vector<256xf32>
    %60 = vector.shape_cast %59 : vector<256xf32> to vector<1x256xf32>
    %cst_46 = arith.constant 4.000000e+00 : f32
    %61 = vector.broadcast %cst_46 : f32 to vector<1x256xf32>
    %62 = arith.divf %60, %61 : vector<1x256xf32>
    %63 = vector.broadcast %62 : vector<1x256xf32> to vector<4x256xf32>
    %64 = arith.subf %58, %63 : vector<4x256xf32>
    %65 = arith.mulf %64, %64 : vector<4x256xf32>
    %cst_47 = arith.constant dense<0.000000e+00> : vector<256xf32>
    %66 = vector.multi_reduction <add>, %65, %cst_47 [0] : vector<4x256xf32> to vector<256xf32>
    %67 = vector.shape_cast %66 : vector<256xf32> to vector<1x256xf32>
    %cst_48 = arith.constant 4.000000e+00 : f32
    %68 = vector.broadcast %cst_48 : f32 to vector<1x256xf32>
    %69 = arith.divf %67, %68 : vector<1x256xf32>
    %70 = vector.broadcast %62 : vector<1x256xf32> to vector<4x256xf32>
    %71 = arith.subf %58, %70 : vector<4x256xf32>
    %cst_49 = arith.constant 9.99999974E-6 : f32
    %72 = vector.broadcast %cst_49 : f32 to vector<1x256xf32>
    %73 = arith.addf %69, %72 : vector<1x256xf32>
    %74 = math.rsqrt %73 : vector<1x256xf32>
    %75 = vector.broadcast %74 : vector<1x256xf32> to vector<4x256xf32>
    %76 = arith.mulf %71, %75 : vector<4x256xf32>
    %77 = vector.broadcast %52 : vector<1x256xf32> to vector<4x256xf32>
    %78 = arith.mulf %76, %77 : vector<4x256xf32>
    %79 = vector.broadcast %53 : vector<1x256xf32> to vector<4x256xf32>
    %80 = arith.addf %78, %79 : vector<4x256xf32>
    %cst_50 = arith.constant 0.000000e+00 : f32
    %81 = vector.broadcast %cst_50 : f32 to vector<4x256xf32>
    %82 = arith.maximumf %80, %81 : vector<4x256xf32>
    %cst_51 = arith.constant dense<0.000000e+00> : vector<4x128xf32>
    %83 = tpu.matmul %82, %54, %cst_51 {dimension_numbers = #tpu.dot_dimension_numbers<[1], [0], [0], [1], [0, 0, 1, 1], [], []>} : vector<4x256xf32>, vector<256x128xf32>, vector<4x128xf32> -> vector<4x128xf32>
    %84 = vector.broadcast %55 : vector<1x128xf32> to vector<4x128xf32>
    %85 = arith.addf %83, %84 : vector<4x128xf32>
    %c0_52 = arith.constant 0 : index
    %c0_53 = arith.constant 0 : index
    %86 = vector.load %arg12[%c0_52, %c0_53] : memref<128x256xf32, #tpu.memory_space<vmem>>, vector<128x256xf32>
    %c0_54 = arith.constant 0 : index
    %c0_55 = arith.constant 0 : index
    %87 = vector.load %arg13[%c0_54, %c0_55] : memref<1x256xf32, #tpu.memory_space<vmem>>, vector<1x256xf32>
    %c0_56 = arith.constant 0 : index
    %c0_57 = arith.constant 0 : index
    %88 = vector.load %arg14[%c0_56, %c0_57] : memref<1x256xf32, #tpu.memory_space<vmem>>, vector<1x256xf32>
    %c0_58 = arith.constant 0 : index
    %c0_59 = arith.constant 0 : index
    %89 = vector.load %arg15[%c0_58, %c0_59] : memref<1x256xf32, #tpu.memory_space<vmem>>, vector<1x256xf32>
    %c0_60 = arith.constant 0 : index
    %c0_61 = arith.constant 0 : index
    %90 = vector.load %arg16[%c0_60, %c0_61] : memref<256x128xf32, #tpu.memory_space<vmem>>, vector<256x128xf32>
    %c0_62 = arith.constant 0 : index
    %c0_63 = arith.constant 0 : index
    %91 = vector.load %arg17[%c0_62, %c0_63] : memref<1x128xf32, #tpu.memory_space<vmem>>, vector<1x128xf32>
    %cst_64 = arith.constant dense<0.000000e+00> : vector<4x256xf32>
    %92 = tpu.matmul %49, %86, %cst_64 {dimension_numbers = #tpu.dot_dimension_numbers<[1], [0], [0], [1], [0, 0, 1, 1], [], []>} : vector<4x128xf32>, vector<128x256xf32>, vector<4x256xf32> -> vector<4x256xf32>
    %93 = vector.broadcast %87 : vector<1x256xf32> to vector<4x256xf32>
    %94 = arith.addf %92, %93 : vector<4x256xf32>
    %cst_65 = arith.constant dense<0.000000e+00> : vector<256xf32>
    %95 = vector.multi_reduction <add>, %94, %cst_65 [0] : vector<4x256xf32> to vector<256xf32>
    %96 = vector.shape_cast %95 : vector<256xf32> to vector<1x256xf32>
    %cst_66 = arith.constant 4.000000e+00 : f32
    %97 = vector.broadcast %cst_66 : f32 to vector<1x256xf32>
    %98 = arith.divf %96, %97 : vector<1x256xf32>
    %99 = vector.broadcast %98 : vector<1x256xf32> to vector<4x256xf32>
    %100 = arith.subf %94, %99 : vector<4x256xf32>
    %101 = arith.mulf %100, %100 : vector<4x256xf32>
    %cst_67 = arith.constant dense<0.000000e+00> : vector<256xf32>
    %102 = vector.multi_reduction <add>, %101, %cst_67 [0] : vector<4x256xf32> to vector<256xf32>
    %103 = vector.shape_cast %102 : vector<256xf32> to vector<1x256xf32>
    %cst_68 = arith.constant 4.000000e+00 : f32
    %104 = vector.broadcast %cst_68 : f32 to vector<1x256xf32>
    %105 = arith.divf %103, %104 : vector<1x256xf32>
    %106 = vector.broadcast %98 : vector<1x256xf32> to vector<4x256xf32>
    %107 = arith.subf %94, %106 : vector<4x256xf32>
    %cst_69 = arith.constant 9.99999974E-6 : f32
    %108 = vector.broadcast %cst_69 : f32 to vector<1x256xf32>
    %109 = arith.addf %105, %108 : vector<1x256xf32>
    %110 = math.rsqrt %109 : vector<1x256xf32>
    %111 = vector.broadcast %110 : vector<1x256xf32> to vector<4x256xf32>
    %112 = arith.mulf %107, %111 : vector<4x256xf32>
    %113 = vector.broadcast %88 : vector<1x256xf32> to vector<4x256xf32>
    %114 = arith.mulf %112, %113 : vector<4x256xf32>
    %115 = vector.broadcast %89 : vector<1x256xf32> to vector<4x256xf32>
    %116 = arith.addf %114, %115 : vector<4x256xf32>
    %cst_70 = arith.constant 0.000000e+00 : f32
    %117 = vector.broadcast %cst_70 : f32 to vector<4x256xf32>
    %118 = arith.maximumf %116, %117 : vector<4x256xf32>
    %cst_71 = arith.constant dense<0.000000e+00> : vector<4x128xf32>
    %119 = tpu.matmul %118, %90, %cst_71 {dimension_numbers = #tpu.dot_dimension_numbers<[1], [0], [0], [1], [0, 0, 1, 1], [], []>} : vector<4x256xf32>, vector<256x128xf32>, vector<4x128xf32> -> vector<4x128xf32>
    %120 = vector.broadcast %91 : vector<1x128xf32> to vector<4x128xf32>
    %121 = arith.addf %119, %120 : vector<4x128xf32>
    %c0_72 = arith.constant 0 : index
    %c0_73 = arith.constant 0 : index
    %122 = vector.load %arg12[%c0_72, %c0_73] : memref<128x256xf32, #tpu.memory_space<vmem>>, vector<128x256xf32>
    %c0_74 = arith.constant 0 : index
    %c0_75 = arith.constant 0 : index
    %123 = vector.load %arg13[%c0_74, %c0_75] : memref<1x256xf32, #tpu.memory_space<vmem>>, vector<1x256xf32>
    %c0_76 = arith.constant 0 : index
    %c0_77 = arith.constant 0 : index
    %124 = vector.load %arg14[%c0_76, %c0_77] : memref<1x256xf32, #tpu.memory_space<vmem>>, vector<1x256xf32>
    %c0_78 = arith.constant 0 : index
    %c0_79 = arith.constant 0 : index
    %125 = vector.load %arg15[%c0_78, %c0_79] : memref<1x256xf32, #tpu.memory_space<vmem>>, vector<1x256xf32>
    %c0_80 = arith.constant 0 : index
    %c0_81 = arith.constant 0 : index
    %126 = vector.load %arg16[%c0_80, %c0_81] : memref<256x128xf32, #tpu.memory_space<vmem>>, vector<256x128xf32>
    %c0_82 = arith.constant 0 : index
    %c0_83 = arith.constant 0 : index
    %127 = vector.load %arg17[%c0_82, %c0_83] : memref<1x128xf32, #tpu.memory_space<vmem>>, vector<1x128xf32>
    %cst_84 = arith.constant dense<0.000000e+00> : vector<4x256xf32>
    %128 = tpu.matmul %85, %122, %cst_84 {dimension_numbers = #tpu.dot_dimension_numbers<[1], [0], [0], [1], [0, 0, 1, 1], [], []>} : vector<4x128xf32>, vector<128x256xf32>, vector<4x256xf32> -> vector<4x256xf32>
    %129 = vector.broadcast %123 : vector<1x256xf32> to vector<4x256xf32>
    %130 = arith.addf %128, %129 : vector<4x256xf32>
    %cst_85 = arith.constant dense<0.000000e+00> : vector<256xf32>
    %131 = vector.multi_reduction <add>, %130, %cst_85 [0] : vector<4x256xf32> to vector<256xf32>
    %132 = vector.shape_cast %131 : vector<256xf32> to vector<1x256xf32>
    %cst_86 = arith.constant 4.000000e+00 : f32
    %133 = vector.broadcast %cst_86 : f32 to vector<1x256xf32>
    %134 = arith.divf %132, %133 : vector<1x256xf32>
    %135 = vector.broadcast %134 : vector<1x256xf32> to vector<4x256xf32>
    %136 = arith.subf %130, %135 : vector<4x256xf32>
    %137 = arith.mulf %136, %136 : vector<4x256xf32>
    %cst_87 = arith.constant dense<0.000000e+00> : vector<256xf32>
    %138 = vector.multi_reduction <add>, %137, %cst_87 [0] : vector<4x256xf32> to vector<256xf32>
    %139 = vector.shape_cast %138 : vector<256xf32> to vector<1x256xf32>
    %cst_88 = arith.constant 4.000000e+00 : f32
    %140 = vector.broadcast %cst_88 : f32 to vector<1x256xf32>
    %141 = arith.divf %139, %140 : vector<1x256xf32>
    %142 = vector.broadcast %134 : vector<1x256xf32> to vector<4x256xf32>
    %143 = arith.subf %130, %142 : vector<4x256xf32>
    %cst_89 = arith.constant 9.99999974E-6 : f32
    %144 = vector.broadcast %cst_89 : f32 to vector<1x256xf32>
    %145 = arith.addf %141, %144 : vector<1x256xf32>
    %146 = math.rsqrt %145 : vector<1x256xf32>
    %147 = vector.broadcast %146 : vector<1x256xf32> to vector<4x256xf32>
    %148 = arith.mulf %143, %147 : vector<4x256xf32>
    %149 = vector.broadcast %124 : vector<1x256xf32> to vector<4x256xf32>
    %150 = arith.mulf %148, %149 : vector<4x256xf32>
    %151 = vector.broadcast %125 : vector<1x256xf32> to vector<4x256xf32>
    %152 = arith.addf %150, %151 : vector<4x256xf32>
    %cst_90 = arith.constant 0.000000e+00 : f32
    %153 = vector.broadcast %cst_90 : f32 to vector<4x256xf32>
    %154 = arith.maximumf %152, %153 : vector<4x256xf32>
    %cst_91 = arith.constant dense<0.000000e+00> : vector<4x128xf32>
    %155 = tpu.matmul %154, %126, %cst_91 {dimension_numbers = #tpu.dot_dimension_numbers<[1], [0], [0], [1], [0, 0, 1, 1], [], []>} : vector<4x256xf32>, vector<256x128xf32>, vector<4x128xf32> -> vector<4x128xf32>
    %156 = vector.broadcast %127 : vector<1x128xf32> to vector<4x128xf32>
    %157 = arith.addf %155, %156 : vector<4x128xf32>
    %c0_92 = arith.constant 0 : index
    %c0_93 = arith.constant 0 : index
    %158 = vector.load %arg4[%c0_92, %c0_93] : memref<768x128xf32, #tpu.memory_space<vmem>>, vector<768x128xf32>
    %c0_94 = arith.constant 0 : index
    %c0_95 = arith.constant 0 : index
    %159 = vector.load %arg5[%c0_94, %c0_95] : memref<1x128xf32, #tpu.memory_space<vmem>>, vector<1x128xf32>
    %160 = vector.extract_strided_slice %0 {offsets = [0, 0], sizes = [4, 768], strides = [1, 1]} : vector<12x768xf32> to vector<4x768xf32>
    %cst_96 = arith.constant dense<0.000000e+00> : vector<4x128xf32>
    %161 = tpu.matmul %160, %158, %cst_96 {dimension_numbers = #tpu.dot_dimension_numbers<[1], [0], [0], [1], [0, 0, 1, 1], [], []>} : vector<4x768xf32>, vector<768x128xf32>, vector<4x128xf32> -> vector<4x128xf32>
    %162 = vector.broadcast %159 : vector<1x128xf32> to vector<4x128xf32>
    %163 = arith.addf %161, %162 : vector<4x128xf32>
    %164 = vector.extract_strided_slice %1 {offsets = [0, 0], sizes = [4, 768], strides = [1, 1]} : vector<12x768xf32> to vector<4x768xf32>
    %cst_97 = arith.constant dense<0.000000e+00> : vector<4x128xf32>
    %165 = tpu.matmul %164, %158, %cst_97 {dimension_numbers = #tpu.dot_dimension_numbers<[1], [0], [0], [1], [0, 0, 1, 1], [], []>} : vector<4x768xf32>, vector<768x128xf32>, vector<4x128xf32> -> vector<4x128xf32>
    %166 = vector.broadcast %159 : vector<1x128xf32> to vector<4x128xf32>
    %167 = arith.addf %165, %166 : vector<4x128xf32>
    %c0_98 = arith.constant 0 : index
    %c0_99 = arith.constant 0 : index
    %168 = vector.load %arg18[%c0_98, %c0_99] : memref<128x256xf32, #tpu.memory_space<vmem>>, vector<128x256xf32>
    %c0_100 = arith.constant 0 : index
    %c0_101 = arith.constant 0 : index
    %169 = vector.load %arg19[%c0_100, %c0_101] : memref<1x256xf32, #tpu.memory_space<vmem>>, vector<1x256xf32>
    %c0_102 = arith.constant 0 : index
    %c0_103 = arith.constant 0 : index
    %170 = vector.load %arg20[%c0_102, %c0_103] : memref<1x256xf32, #tpu.memory_space<vmem>>, vector<1x256xf32>
    %c0_104 = arith.constant 0 : index
    %c0_105 = arith.constant 0 : index
    %171 = vector.load %arg21[%c0_104, %c0_105] : memref<1x256xf32, #tpu.memory_space<vmem>>, vector<1x256xf32>
    %c0_106 = arith.constant 0 : index
    %c0_107 = arith.constant 0 : index
    %172 = vector.load %arg22[%c0_106, %c0_107] : memref<256x128xf32, #tpu.memory_space<vmem>>, vector<256x128xf32>
    %c0_108 = arith.constant 0 : index
    %c0_109 = arith.constant 0 : index
    %173 = vector.load %arg23[%c0_108, %c0_109] : memref<1x128xf32, #tpu.memory_space<vmem>>, vector<1x128xf32>
    %cst_110 = arith.constant dense<0.000000e+00> : vector<4x256xf32>
    %174 = tpu.matmul %163, %168, %cst_110 {dimension_numbers = #tpu.dot_dimension_numbers<[1], [0], [0], [1], [0, 0, 1, 1], [], []>} : vector<4x128xf32>, vector<128x256xf32>, vector<4x256xf32> -> vector<4x256xf32>
    %175 = vector.broadcast %169 : vector<1x256xf32> to vector<4x256xf32>
    %176 = arith.addf %174, %175 : vector<4x256xf32>
    %cst_111 = arith.constant dense<0.000000e+00> : vector<256xf32>
    %177 = vector.multi_reduction <add>, %176, %cst_111 [0] : vector<4x256xf32> to vector<256xf32>
    %178 = vector.shape_cast %177 : vector<256xf32> to vector<1x256xf32>
    %cst_112 = arith.constant 4.000000e+00 : f32
    %179 = vector.broadcast %cst_112 : f32 to vector<1x256xf32>
    %180 = arith.divf %178, %179 : vector<1x256xf32>
    %181 = vector.broadcast %180 : vector<1x256xf32> to vector<4x256xf32>
    %182 = arith.subf %176, %181 : vector<4x256xf32>
    %183 = arith.mulf %182, %182 : vector<4x256xf32>
    %cst_113 = arith.constant dense<0.000000e+00> : vector<256xf32>
    %184 = vector.multi_reduction <add>, %183, %cst_113 [0] : vector<4x256xf32> to vector<256xf32>
    %185 = vector.shape_cast %184 : vector<256xf32> to vector<1x256xf32>
    %cst_114 = arith.constant 4.000000e+00 : f32
    %186 = vector.broadcast %cst_114 : f32 to vector<1x256xf32>
    %187 = arith.divf %185, %186 : vector<1x256xf32>
    %188 = vector.broadcast %180 : vector<1x256xf32> to vector<4x256xf32>
    %189 = arith.subf %176, %188 : vector<4x256xf32>
    %cst_115 = arith.constant 9.99999974E-6 : f32
    %190 = vector.broadcast %cst_115 : f32 to vector<1x256xf32>
    %191 = arith.addf %187, %190 : vector<1x256xf32>
    %192 = math.rsqrt %191 : vector<1x256xf32>
    %193 = vector.broadcast %192 : vector<1x256xf32> to vector<4x256xf32>
    %194 = arith.mulf %189, %193 : vector<4x256xf32>
    %195 = vector.broadcast %170 : vector<1x256xf32> to vector<4x256xf32>
    %196 = arith.mulf %194, %195 : vector<4x256xf32>
    %197 = vector.broadcast %171 : vector<1x256xf32> to vector<4x256xf32>
    %198 = arith.addf %196, %197 : vector<4x256xf32>
    %cst_116 = arith.constant 0.000000e+00 : f32
    %199 = vector.broadcast %cst_116 : f32 to vector<4x256xf32>
    %200 = arith.maximumf %198, %199 : vector<4x256xf32>
    %cst_117 = arith.constant dense<0.000000e+00> : vector<4x128xf32>
    %201 = tpu.matmul %200, %172, %cst_117 {dimension_numbers = #tpu.dot_dimension_numbers<[1], [0], [0], [1], [0, 0, 1, 1], [], []>} : vector<4x256xf32>, vector<256x128xf32>, vector<4x128xf32> -> vector<4x128xf32>
    %202 = vector.broadcast %173 : vector<1x128xf32> to vector<4x128xf32>
    %203 = arith.addf %201, %202 : vector<4x128xf32>
    %c0_118 = arith.constant 0 : index
    %c0_119 = arith.constant 0 : index
    %204 = vector.load %arg18[%c0_118, %c0_119] : memref<128x256xf32, #tpu.memory_space<vmem>>, vector<128x256xf32>
    %c0_120 = arith.constant 0 : index
    %c0_121 = arith.constant 0 : index
    %205 = vector.load %arg19[%c0_120, %c0_121] : memref<1x256xf32, #tpu.memory_space<vmem>>, vector<1x256xf32>
    %c0_122 = arith.constant 0 : index
    %c0_123 = arith.constant 0 : index
    %206 = vector.load %arg20[%c0_122, %c0_123] : memref<1x256xf32, #tpu.memory_space<vmem>>, vector<1x256xf32>
    %c0_124 = arith.constant 0 : index
    %c0_125 = arith.constant 0 : index
    %207 = vector.load %arg21[%c0_124, %c0_125] : memref<1x256xf32, #tpu.memory_space<vmem>>, vector<1x256xf32>
    %c0_126 = arith.constant 0 : index
    %c0_127 = arith.constant 0 : index
    %208 = vector.load %arg22[%c0_126, %c0_127] : memref<256x128xf32, #tpu.memory_space<vmem>>, vector<256x128xf32>
    %c0_128 = arith.constant 0 : index
    %c0_129 = arith.constant 0 : index
    %209 = vector.load %arg23[%c0_128, %c0_129] : memref<1x128xf32, #tpu.memory_space<vmem>>, vector<1x128xf32>
    %cst_130 = arith.constant dense<0.000000e+00> : vector<4x256xf32>
    %210 = tpu.matmul %167, %204, %cst_130 {dimension_numbers = #tpu.dot_dimension_numbers<[1], [0], [0], [1], [0, 0, 1, 1], [], []>} : vector<4x128xf32>, vector<128x256xf32>, vector<4x256xf32> -> vector<4x256xf32>
    %211 = vector.broadcast %205 : vector<1x256xf32> to vector<4x256xf32>
    %212 = arith.addf %210, %211 : vector<4x256xf32>
    %cst_131 = arith.constant dense<0.000000e+00> : vector<256xf32>
    %213 = vector.multi_reduction <add>, %212, %cst_131 [0] : vector<4x256xf32> to vector<256xf32>
    %214 = vector.shape_cast %213 : vector<256xf32> to vector<1x256xf32>
    %cst_132 = arith.constant 4.000000e+00 : f32
    %215 = vector.broadcast %cst_132 : f32 to vector<1x256xf32>
    %216 = arith.divf %214, %215 : vector<1x256xf32>
    %217 = vector.broadcast %216 : vector<1x256xf32> to vector<4x256xf32>
    %218 = arith.subf %212, %217 : vector<4x256xf32>
    %219 = arith.mulf %218, %218 : vector<4x256xf32>
    %cst_133 = arith.constant dense<0.000000e+00> : vector<256xf32>
    %220 = vector.multi_reduction <add>, %219, %cst_133 [0] : vector<4x256xf32> to vector<256xf32>
    %221 = vector.shape_cast %220 : vector<256xf32> to vector<1x256xf32>
    %cst_134 = arith.constant 4.000000e+00 : f32
    %222 = vector.broadcast %cst_134 : f32 to vector<1x256xf32>
    %223 = arith.divf %221, %222 : vector<1x256xf32>
    %224 = vector.broadcast %216 : vector<1x256xf32> to vector<4x256xf32>
    %225 = arith.subf %212, %224 : vector<4x256xf32>
    %cst_135 = arith.constant 9.99999974E-6 : f32
    %226 = vector.broadcast %cst_135 : f32 to vector<1x256xf32>
    %227 = arith.addf %223, %226 : vector<1x256xf32>
    %228 = math.rsqrt %227 : vector<1x256xf32>
    %229 = vector.broadcast %228 : vector<1x256xf32> to vector<4x256xf32>
    %230 = arith.mulf %225, %229 : vector<4x256xf32>
    %231 = vector.broadcast %206 : vector<1x256xf32> to vector<4x256xf32>
    %232 = arith.mulf %230, %231 : vector<4x256xf32>
    %233 = vector.broadcast %207 : vector<1x256xf32> to vector<4x256xf32>
    %234 = arith.addf %232, %233 : vector<4x256xf32>
    %cst_136 = arith.constant 0.000000e+00 : f32
    %235 = vector.broadcast %cst_136 : f32 to vector<4x256xf32>
    %236 = arith.maximumf %234, %235 : vector<4x256xf32>
    %cst_137 = arith.constant dense<0.000000e+00> : vector<4x128xf32>
    %237 = tpu.matmul %236, %208, %cst_137 {dimension_numbers = #tpu.dot_dimension_numbers<[1], [0], [0], [1], [0, 0, 1, 1], [], []>} : vector<4x256xf32>, vector<256x128xf32>, vector<4x128xf32> -> vector<4x128xf32>
    %238 = vector.broadcast %209 : vector<1x128xf32> to vector<4x128xf32>
    %239 = arith.addf %237, %238 : vector<4x128xf32>
    %240 = arith.mulf %121, %121 : vector<4x128xf32>
    %cst_138 = arith.constant dense<0.000000e+00> : vector<4xf32>
    %241 = vector.multi_reduction <add>, %240, %cst_138 [1] : vector<4x128xf32> to vector<4xf32>
    %242 = vector.shape_cast %241 : vector<4xf32> to vector<4x1xf32>
    %cst_139 = arith.constant 1.000000e-24 : f32
    %243 = vector.broadcast %cst_139 : f32 to vector<4x1xf32>
    %244 = arith.maximumf %242, %243 : vector<4x1xf32>
    %245 = math.rsqrt %244 : vector<4x1xf32>
    %246 = vector.broadcast %245 : vector<4x1xf32> to vector<4x128xf32>
    %247 = arith.mulf %121, %246 : vector<4x128xf32>
    %248 = arith.mulf %239, %239 : vector<4x128xf32>
    %cst_140 = arith.constant dense<0.000000e+00> : vector<4xf32>
    %249 = vector.multi_reduction <add>, %248, %cst_140 [1] : vector<4x128xf32> to vector<4xf32>
    %250 = vector.shape_cast %249 : vector<4xf32> to vector<4x1xf32>
    %cst_141 = arith.constant 1.000000e-24 : f32
    %251 = vector.broadcast %cst_141 : f32 to vector<4x1xf32>
    %252 = arith.maximumf %250, %251 : vector<4x1xf32>
    %253 = math.rsqrt %252 : vector<4x1xf32>
    %254 = vector.broadcast %253 : vector<4x1xf32> to vector<4x128xf32>
    %255 = arith.mulf %239, %254 : vector<4x128xf32>
    %256 = arith.mulf %157, %157 : vector<4x128xf32>
    %cst_142 = arith.constant dense<0.000000e+00> : vector<4xf32>
    %257 = vector.multi_reduction <add>, %256, %cst_142 [1] : vector<4x128xf32> to vector<4xf32>
    %258 = vector.shape_cast %257 : vector<4xf32> to vector<4x1xf32>
    %cst_143 = arith.constant 1.000000e-24 : f32
    %259 = vector.broadcast %cst_143 : f32 to vector<4x1xf32>
    %260 = arith.maximumf %258, %259 : vector<4x1xf32>
    %261 = math.rsqrt %260 : vector<4x1xf32>
    %262 = vector.broadcast %261 : vector<4x1xf32> to vector<4x128xf32>
    %263 = arith.mulf %157, %262 : vector<4x128xf32>
    %264 = arith.mulf %203, %203 : vector<4x128xf32>
    %cst_144 = arith.constant dense<0.000000e+00> : vector<4xf32>
    %265 = vector.multi_reduction <add>, %264, %cst_144 [1] : vector<4x128xf32> to vector<4xf32>
    %266 = vector.shape_cast %265 : vector<4xf32> to vector<4x1xf32>
    %cst_145 = arith.constant 1.000000e-24 : f32
    %267 = vector.broadcast %cst_145 : f32 to vector<4x1xf32>
    %268 = arith.maximumf %266, %267 : vector<4x1xf32>
    %269 = math.rsqrt %268 : vector<4x1xf32>
    %270 = vector.broadcast %269 : vector<4x1xf32> to vector<4x128xf32>
    %271 = arith.mulf %203, %270 : vector<4x128xf32>
    %272 = arith.mulf %247, %255 : vector<4x128xf32>
    %cst_146 = arith.constant dense<0.000000e+00> : vector<4xf32>
    %273 = vector.multi_reduction <add>, %272, %cst_146 [1] : vector<4x128xf32> to vector<4xf32>
    %274 = vector.shape_cast %273 : vector<4xf32> to vector<4x1xf32>
    %cst_147 = arith.constant 2.000000e+00 : f32
    %275 = vector.broadcast %cst_147 : f32 to vector<4x1xf32>
    %276 = arith.mulf %275, %274 : vector<4x1xf32>
    %cst_148 = arith.constant 2.000000e+00 : f32
    %277 = vector.broadcast %cst_148 : f32 to vector<4x1xf32>
    %278 = arith.subf %277, %276 : vector<4x1xf32>
    %279 = arith.mulf %263, %271 : vector<4x128xf32>
    %cst_149 = arith.constant dense<0.000000e+00> : vector<4xf32>
    %280 = vector.multi_reduction <add>, %279, %cst_149 [1] : vector<4x128xf32> to vector<4xf32>
    %281 = vector.shape_cast %280 : vector<4xf32> to vector<4x1xf32>
    %cst_150 = arith.constant 2.000000e+00 : f32
    %282 = vector.broadcast %cst_150 : f32 to vector<4x1xf32>
    %283 = arith.mulf %282, %281 : vector<4x1xf32>
    %cst_151 = arith.constant 2.000000e+00 : f32
    %284 = vector.broadcast %cst_151 : f32 to vector<4x1xf32>
    %285 = arith.subf %284, %283 : vector<4x1xf32>
    %286 = arith.addf %278, %285 : vector<4x1xf32>
    %c0_152 = arith.constant 0 : index
    %c0_153 = arith.constant 0 : index
    %287 = vector.load %arg26[%c0_152, %c0_153] : memref<4x1xf32, #tpu.memory_space<vmem>>, vector<4x1xf32>
    tpu.vector_store %arg26[%c0_152, %c0_153], %286 {strides = array<i32>} : memref<4x1xf32, #tpu.memory_space<vmem>>, vector<4x1xf32>,
    return
  }
}

</mosaic_0001>

<bundles_post_ra>
// kernel: meta_byol_forward.3
= control target key start
LH: loop header
LB: loop body
LE: loop exit
PB: predicated region body
PF: predicated region fallthrough
CT: control target
= control target key end

     0   :  { %vm19_vm0 = vcmask 1041408   ;;  %v188_v3 = vmov 2.0   ;;  %vm67_vm2 = vcmask 1041409   ;;  %vm69_vm3 = vcmask 1042434   ;;  %s247_s0 = inlined_call_operand.vmem [shape: f32[1,16,128], index: 0, kind: input, shape index: {}]   ;;  %s248_s1 = inlined_call_operand.vmem [shape: f32[1,4,2,128], index: 1, kind: input, shape index: {}]   ;;  %s249_s2 = inlined_call_operand.<no memory space> [shape: f32[1], index: 2, kind: input, shape index: {}]   ;;  %s250_s3 = inlined_call_operand.vmem [shape: f32[1,16,4], index: 3, kind: output, shape index: {}]  }
   0x1   :  { %v212_v0 = vld [vmem:[%s247_s0 + $0x8] sm:$0xff]  ;;  %v15_v1 = vld [vmem:[%s248_s1] sm:$0x3]  ;;  %v16_v2 = vld [vmem:[%s248_s1 + $0x2] sm:$0x3]  ;;  %180 = vrcp.f32 %v188_v3  ;;  %vm71_vm4 = vcmask 1043459  }
   0x2   :  { %v104_v4 = vmul.f32 %v212_v0, %v212_v0  ;;  %v17_v5 = vld [vmem:[%s248_s1 + $0x4] sm:$0x3]  ;;  %v18_v6 = vld [vmem:[%s248_s1 + $0x6] sm:$0x3]  ;;  %v20_v7 = vsel %vm19_vm0, %v15_v1, 0.0  ;;  %v27_v8 = vsel %vm19_vm0, %v16_v2, 0.0 }
   0x3   :  { %v21_v9 = vrot.slane %v20_v7, 4  ;;  %v28_v10 = vrot.slane %v27_v8, 4  ;;  %v34_v11 = vsel %vm19_vm0, %v17_v5, 0.0  ;;  %v41_v12 = vsel %vm19_vm0, %v18_v6, 0.0  ;;  %v101_v53 = vld [vmem:[%s247_s0] sm:$0xff] }
   0x4   :  { %107 = vadd.xlane.f32.xlu1 %v104_v4  ;;  %v35_v13 = vrot.slane %v34_v11, 4  ;;  %v42_v14 = vrot.slane %v41_v12, 4  ;;  %vm74_vm5 = vcmask 1043456   ;;  %v103_v54 = vmul.f32 %v101_v53, %v101_v53 }
   0x5   :  { %v22_v15 = vadd.f32 %v21_v9, %v20_v7  ;;  %v29_v16 = vadd.f32 %v28_v10, %v27_v8  ;;  %vm171_vm15 = vcmask 31744  }
   0x6   :  { %v36_v17 = vadd.f32 %v35_v13, %v34_v11  ;;  %v43_v18 = vadd.f32 %v42_v14, %v41_v12 }
   0x7   :  { %v181_v19 = vpop.eup %180  ;;  %v23_v20 = vrot.slane %v22_v15, 2  ;;  %v30_v21 = vrot.slane %v29_v16, 2 }
   0x8   :  { %v37_v22 = vrot.slane %v36_v17, 2  ;;  %v44_v23 = vrot.slane %v43_v18, 2  ;;  %v49_v24 = vmul.f32 2.0, %v181_v19  ;;  %vm53_vm1 = vweird.f32 %v181_v19 }
   0x9   :  { %v24_v25 = vadd.f32 %v23_v20, %v22_v15  ;;  %v31_v26 = vadd.f32 %v30_v21, %v29_v16 }
   0xa   :  { %v38_v27 = vadd.f32 %v37_v22, %v36_v17  ;;  %v45_v28 = vadd.f32 %v44_v23, %v43_v18  ;;  %v50_v29 = vsub.f32 1.0, %v49_v24 }
   0xb   :  { %v25_v30 = vrot.slane %v24_v25, 1  ;;  %v32_v31 = vrot.slane %v31_v26, 1 }
   0xc   :  { %v39_v32 = vrot.slane %v38_v27, 1  ;;  %v46_v33 = vrot.slane %v45_v28, 1  ;;  %v51_v34 = vmul.f32 %v181_v19, %v50_v29 }
   0xd   :  { %v26_v35 = vadd.f32 %v25_v30, %v24_v25  ;;  %v33_v36 = vadd.f32 %v32_v31, %v31_v26 }
   0xe   :  { %v40_v37 = vadd.f32 %v39_v32, %v38_v27  ;;  %v47_v38 = vadd.f32 %v46_v33, %v45_v28  ;;  %v52_v39 = vadd.f32 %v181_v19, %v51_v34  ;;  %v168_v34 = vstv %s249_s2 }
  0x10   :  { %v54_v40 = vsel %vm53_vm1, %v181_v19, %v52_v39 }
  0x11   :  { %v55_v41 = vmul.f32 %v54_v40, %v26_v35  ;;  %v56_v42 = vmul.f32 %v54_v40, %v33_v36  ;;  %v57_v43 = vmul.f32 %v54_v40, %v40_v37  ;;  %v58_v44 = vmul.f32 %v54_v40, %v47_v38 }
  0x13   :  { %v59_v45 = vmul.f32 %v55_v41, %v55_v41  ;;  %v60_v46 = vmul.f32 %v56_v42, %v56_v42  ;;  %v61_v47 = vmul.f32 %v57_v43, %v57_v43  ;;  %v62_v48 = vmul.f32 %v58_v44, %v58_v44 }
  0x15   :  { %v68_v49 = vsel %vm67_vm2, %v60_v46, %v59_v45 }
  0x16   :  { %v70_v50 = vsel %vm69_vm3, %v61_v47, %v68_v49 }
  0x17   :  { %v72_v51 = vsel %vm71_vm4, %v62_v48, %v70_v50 }
  0x18   :  { %v75_v52 = vsel %vm74_vm5, %v72_v51, 0.0 }
  0x19   :  { %76 = vadd.xlane.f32.xlu0 %v75_v52 }
  0x21   :  { %105 = vadd.xlane.f32.xlu0 %v103_v54 }
  0x77   :  { %v108_v55 = vpop.xlane.xlu1 %107 }
  0x78   :  { %v110_v56 = vmax.f32 %v108_v55, 1e-24 }
  0x7a   :  { %182 = vrsqrt.f32 %v110_v56  ;;  %vm127_vm9 = vweird.f32 %v110_v56 }
  0x80   :  { %v183_v59 = vpop.eup %182 }
  0x81   :  { %v122_v60 = vmul.f32 %v183_v59, %v110_v56  ;;  %vm128_vm10 = vweird.f32 %v183_v59 }
  0x82   :  { %vm129_vm12 = vmor %vm127_vm9, %vm128_vm10 }
  0x83   :  { %v123_v2 = vmul.f32 %v183_v59, %v122_v60 }
  0x85   :  { %v124_v5 = vmul.f32 0.5, %v123_v2 }
  0x87   :  { %v125_v10 = vsub.f32 1.5, %v124_v5 }
  0x89   :  { %v126_v21 = vmul.f32 %v183_v59, %v125_v10 }
  0x8b   :  { %v130_v30 = vsel %vm129_vm12, %v183_v59, %v126_v21 }
  0x8c   :  { %v77_v57 = vpop.xlane.xlu0 %76  ;;  %v132_v33 = vmul.f32 %v130_v30, %v212_v0 }
  0x8d   :  { %v78_v58 = vmax.f32 %v77_v57, 1e-24 }
  0x8f   :  { %184 = vrsqrt.f32 %v78_v58  ;;  %vm85_vm7 = vweird.f32 %v78_v58 }
  0x94   :  { %v106_v61 = vpop.xlane.xlu0 %105 }
  0x95   :  { %v185_v62 = vpop.eup %184  ;;  %v109_v63 = vmax.f32 %v106_v61, 1e-24 }
  0x96   :  { %v80_v1 = vmul.f32 %v185_v62, %v78_v58  ;;  %vm86_vm6 = vweird.f32 %v185_v62 }
  0x97   :  { %186 = vrsqrt.f32 %v109_v63  ;;  %vm87_vm8 = vmor %vm85_vm7, %vm86_vm6  ;;  %vm117_vm13 = vweird.f32 %v109_v63 }
  0x98   :  { %v81_v3 = vmul.f32 %v185_v62, %v80_v1 }
  0x9a   :  { %v82_v4 = vmul.f32 0.5, %v81_v3 }
  0x9c   :  { %v83_v6 = vsub.f32 1.5, %v82_v4 }
  0x9d   :  { %v187_v7 = vpop.eup %186 }
  0x9e   :  { %v84_v8 = vmul.f32 %v185_v62, %v83_v6  ;;  %v112_v9 = vmul.f32 %v187_v7, %v109_v63  ;;  %vm118_vm11 = vweird.f32 %v187_v7 }
  0x9f   :  { %vm119_vm14 = vmor %vm117_vm13, %vm118_vm11 }
  0xa0   :  { %v88_v11 = vsel %vm87_vm8, %v185_v62, %v84_v8  ;;  %v113_v12 = vmul.f32 %v187_v7, %v112_v9 }
  0xa1   :  { %v90_v13 = vrot.slane %v88_v11, 1  ;;  %v91_v14 = vrot.slane %v88_v11, 2  ;;  %v92_v15 = vrot.slane %v88_v11, 3  ;;  %v97_v22 = vmul.f32 %v88_v11, %v55_v41 }
  0xa2   :  { %v114_v16 = vmul.f32 0.5, %v113_v12 }
  0xa3   :  { %v98_v17 = vmul.f32 %v90_v13, %v56_v42  ;;  %v99_v18 = vmul.f32 %v91_v14, %v57_v43  ;;  %v100_v19 = vmul.f32 %v92_v15, %v58_v44 }
  0xa4   :  { %v115_v20 = vsub.f32 1.5, %v114_v16 }
  0xa5   :  { %v137_v23 = vrot.slane %v98_v17, 7  ;;  %v139_v24 = vrot.slane %v99_v18, 6  ;;  %v141_v27 = vrot.slane %v100_v19, 5 }
  0xa6   :  { %v116_v25 = vmul.f32 %v187_v7, %v115_v20 }
  0xa7   :  { %v138_v26 = vsel %vm67_vm2, %v137_v23, %v97_v22 }
  0xa8   :  { %v140_v28 = vsel %vm69_vm3, %v139_v24, %v138_v26  ;;  %v120_v29 = vsel %vm119_vm14, %v187_v7, %v116_v25 }
  0xa9   :  { %v142_v31 = vsel %vm71_vm4, %v141_v27, %v140_v28  ;;  %v131_v32 = vmul.f32 %v120_v29, %v101_v53 }
  0xaa   :  { %159 = vmatpush.xpose.msra.mxu0 %v142_v31  ;;  %178 = vmatpush.xpose.msra.mxu1 %v142_v31 }
  0xad   :  { %160 = vmatmul.f32.vlgmr.msra.gmra.mxu0 %v131_v32  ;;  %163 = vmatmul.f32.vlgmr.msra.gmra.mxu1 %v132_v33 }
 0x12a   :  { %v161_v35 = vpop.f32.mrf.mxu0  ;;  %v164_v36 = vpop.f32.mrf.mxu1 }
 0x12b   :  { %v169_v37 = vmul.f32 %v168_v34, %v161_v35  ;;  %v170_v38 = vmul.f32 %v168_v34, %v164_v36 }
 0x12d   :  { %172 = vst.msk [vmem:[%s250_s3] sm:$0xff] %vm171_vm15, %v169_v37 }
 0x12e   :  { %173 = vst.msk [vmem:[%s250_s3 + $0x8] sm:$0xff] %vm171_vm15, %v170_v38 }

// kernel: meta_byol_forward.2
= control target key start
LH: loop header
LB: loop body
LE: loop exit
PB: predicated region body
PF: predicated region fallthrough
CT: control target
= control target key end

     0   :  { %vm597_vm0 = vcmask 1043456   ;;  %s5196_s2 = inlined_call_operand.vmem [shape: f32[768,128], index: 2, kind: input, shape index: {}]   ;;  %s5197_s3 = inlined_call_operand.vmem [shape: f32[1,128], index: 3, kind: input, shape index: {}]   ;;  %s5198_s0 = inlined_call_operand.vmem [shape: f32[12,768], index: 0, kind: input, shape index: {}]   ;;  %s5199_s1 = inlined_call_operand.vmem [shape: f32[12,768], index: 1, kind: input, shape index: {}]   ;;  %s5200_s6 = inlined_call_operand.vmem [shape: f32[128,256], index: 6, kind: input, shape index: {}]   ;;  %s5201_s24 = inlined_call_operand.vmem [shape: f32[12,128], index: 24, kind: output, shape index: {0}]   ;;  %s5202_s25 = inlined_call_operand.vmem [shape: f32[12,128], index: 25, kind: output, shape index: {1}]   ;;  %s5203_s11 = inlined_call_operand.vmem [shape: f32[1,128], index: 11, kind: input, shape index: {}]   ;;  %s5204_s7 = inlined_call_operand.vmem [shape: f32[1,256], index: 7, kind: input, shape index: {}]   ;;  %s5205_s10 = inlined_call_operand.vmem [shape: f32[256,128], index: 10, kind: input, shape index: {}]   ;;  %s5206_s8 = inlined_call_operand.vmem [shape: f32[1,256], index: 8, kind: input, shape index: {}]   ;;  %s5207_s9 = inlined_call_operand.vmem [shape: f32[1,256], index: 9, kind: input, shape index: {}]   ;;  %s5208_s12 = inlined_call_operand.vmem [shape: f32[128,256], index: 12, kind: input, shape index: {}]   ;;  %s5209_s16 = inlined_call_operand.vmem [shape: f32[256,128], index: 16, kind: input, shape index: {}]   ;;  %s5210_s13 = inlined_call_operand.vmem [shape: f32[1,256], index: 13, kind: input, shape index: {}]   ;;  %s5211_s4 = inlined_call_operand.vmem [shape: f32[768,128], index: 4, kind: input, shape index: {}]   ;;  %s5212_s17 = inlined_call_operand.vmem [shape: f32[1,128], index: 17, kind: input, shape index: {}]   ;;  %s5213_s14 = inlined_call_operand.vmem [shape: f32[1,256], index: 14, kind: input, shape index: {}]   ;;  %s5214_s15 = inlined_call_operand.vmem [shape: f32[1,256], index: 15, kind: input, shape index: {}]   ;;  %s5215_s5 = inlined_call_operand.vmem [shape: f32[1,128], index: 5, kind: input, shape index: {}]   ;;  %s5216_s18 = inlined_call_operand.vmem [shape: f32[128,256], index: 18, kind: input, shape index: {}]   ;;  %s5217_s23 = inlined_call_operand.vmem [shape: f32[1,128], index: 23, kind: input, shape index: {}]   ;;  %s5218_s19 = inlined_call_operand.vmem [shape: f32[1,256], index: 19, kind: input, shape index: {}]   ;;  %s5219_s22 = inlined_call_operand.vmem [shape: f32[256,128], index: 22, kind: input, shape index: {}]   ;;  %s5220_s20 = inlined_call_operand.vmem [shape: f32[1,256], index: 20, kind: input, shape index: {}]   ;;  %s5221_s21 = inlined_call_operand.vmem [shape: f32[1,256], index: 21, kind: input, shape index: {}]   ;;  %s5222_s26 = inlined_call_operand.vmem [shape: f32[4,1], index: 26, kind: output, shape index: {2}]  }
   0x1   :  { %5290 = sst [smem:[#allocation49_spill]] %s5196_s2 }
   0x2   :  { %5291 = sst [smem:[#allocation50_spill]] %s5197_s3 }
   0x3   :  { %5292 = sst [smem:[#allocation51_spill]] %s5198_s0 }
   0x4   :  { %5293 = sst [smem:[#allocation52_spill]] %s5199_s1 }
   0x5   :  { %5294 = sst [smem:[#allocation53_spill]] %s5200_s6 }
   0x6   :  { %5295 = sst [smem:[#allocation54_spill]] %s5201_s24 }
   0x7   :  { %5296 = sst [smem:[#allocation55_spill]] %s5202_s25 }
   0x8   :  { %5297 = sst [smem:[#allocation56_spill]] %s5203_s11 }
   0x9   :  { %5298 = sst [smem:[#allocation57_spill]] %s5204_s7 }
   0xa   :  { %5299 = sst [smem:[#allocation58_spill]] %s5205_s10 }
   0xb   :  { %5300 = sst [smem:[#allocation59_spill]] %s5206_s8 }
   0xc   :  { %s5301_s11 = sld [smem:[#allocation49_spill]] }
   0xd   :  { %s5310_s0 = sld [smem:[#allocation51_spill]] }
   0xe   :  { %s5311_s25 = sld [smem:[#allocation52_spill]] }
   0xf   :  { %s5319_s28 = sld [smem:[#allocation53_spill]] }
  0x10   :  { %s5321_s3 = sld [smem:[#allocation50_spill]] }
  0x11   :  { %s5322_s29 = sld [smem:[#allocation54_spill]] }
  0x12   :  { %v2248_v0 = vld [vmem:[%s5301_s11 + $0x78] sm:$0xff]  ;;  %v2258_v2 = vld [vmem:[%s5301_s11 + $0x70] sm:$0xff]  ;;  %v2282_v6 = vld [vmem:[%s5301_s11 + $0x68] sm:$0xff]  ;;  %s5323_s24 = sld [smem:[#allocation55_spill]] }
  0x13   :  { %v2253_v1 = vld [vmem:[%s5301_s11 + $0x178] sm:$0xff]  ;;  %204 = vmatpush.msra.mxu0 %v2248_v0  ;;  %v2270_v4 = vld [vmem:[%s5301_s11 + $0x170] sm:$0xff]  ;;  %v2292_v8 = vld [vmem:[%s5301_s11 + $0x168] sm:$0xff]  ;;  %s5327_s2 = sld [smem:[#allocation59_spill]] }
  0x14   :  { %250 = vmatpush.msra.mxu2 %v2253_v1  ;;  %v2265_v3 = vld [vmem:[%s5301_s11 + $0xf8] sm:$0xff]  ;;  %v2287_v7 = vld [vmem:[%s5301_s11 + $0xf0] sm:$0xff]  ;;  %v2304_v10 = vld [vmem:[%s5301_s11 + $0xe8] sm:$0xff] }
  0x15   :  { %v2275_v5 = vld [vmem:[%s5301_s11 + $0x1f8] sm:$0xff]  ;;  %227 = vmatpush.msra.mxu1 %v2265_v3  ;;  %205 = vmatpush.msra.mxu0 %v2258_v2  ;;  %v2299_v9 = vld [vmem:[%s5301_s11 + $0x1f0] sm:$0xff]  ;;  %v2311_v11 = vld [vmem:[%s5301_s11 + $0x60] sm:$0xff] }
  0x16   :  { %273 = vmatpush.msra.mxu3 %v2275_v5  ;;  %251 = vmatpush.msra.mxu2 %v2270_v4  ;;  %v2316_v12 = vld [vmem:[%s5301_s11 + $0x160] sm:$0xff]  ;;  %v2321_v13 = vld [vmem:[%s5301_s11 + $0x1e8] sm:$0xff]  ;;  %v2340_v16 = vld [vmem:[%s5301_s11 + $0x58] sm:$0xff] }
  0x17   :  { %228 = vmatpush.msra.mxu1 %v2287_v7  ;;  %206 = vmatpush.msra.mxu0 %v2282_v6  ;;  %v2328_v14 = vld [vmem:[%s5301_s11 + $0xe0] sm:$0xff]  ;;  %v2345_v17 = vld [vmem:[%s5301_s11 + $0x158] sm:$0xff]  ;;  %v2364_v20 = vld [vmem:[%s5301_s11 + $0x50] sm:$0xff] }
  0x18   :  { %274 = vmatpush.msra.mxu3 %v2299_v9  ;;  %252 = vmatpush.msra.mxu2 %v2292_v8  ;;  %v2333_v15 = vld [vmem:[%s5301_s11 + $0x1e0] sm:$0xff]  ;;  %v2352_v18 = vld [vmem:[%s5301_s11 + $0xd8] sm:$0xff]  ;;  %v2369_v21 = vld [vmem:[%s5301_s11 + $0x150] sm:$0xff] }
  0x19   :  { %229 = vmatpush.msra.mxu1 %v2304_v10  ;;  %207 = vmatpush.msra.mxu0 %v2311_v11  ;;  %v2357_v19 = vld [vmem:[%s5301_s11 + $0x1d8] sm:$0xff]  ;;  %v2376_v22 = vld [vmem:[%s5301_s11 + $0xd0] sm:$0xff]  ;;  %v2388_v24 = vld [vmem:[%s5301_s11 + $0x48] sm:$0xff] }
  0x1a   :  { %275 = vmatpush.msra.mxu3 %v2321_v13  ;;  %253 = vmatpush.msra.mxu2 %v2316_v12  ;;  %v2381_v23 = vld [vmem:[%s5301_s11 + $0x1d0] sm:$0xff]  ;;  %v2393_v25 = vld [vmem:[%s5301_s11 + $0x148] sm:$0xff]  ;;  %v2412_v28 = vld [vmem:[%s5301_s11 + $0x40] sm:$0xff] }
  0x1b   :  { %230 = vmatpush.msra.mxu1 %v2328_v14  ;;  %208 = vmatpush.msra.mxu0 %v2340_v16  ;;  %v2400_v26 = vld [vmem:[%s5301_s11 + $0xc8] sm:$0xff]  ;;  %v2417_v29 = vld [vmem:[%s5301_s11 + $0x140] sm:$0xff]  ;;  %v2436_v32 = vld [vmem:[%s5301_s11 + $0x38] sm:$0xff] }
  0x1c   :  { %276 = vmatpush.msra.mxu3 %v2333_v15  ;;  %254 = vmatpush.msra.mxu2 %v2345_v17  ;;  %v2405_v27 = vld [vmem:[%s5301_s11 + $0x1c8] sm:$0xff]  ;;  %v2424_v30 = vld [vmem:[%s5301_s11 + $0xc0] sm:$0xff]  ;;  %v2441_v33 = vld [vmem:[%s5301_s11 + $0x138] sm:$0xff] }
  0x1d   :  { %231 = vmatpush.msra.mxu1 %v2352_v18  ;;  %209 = vmatpush.msra.mxu0 %v2364_v20  ;;  %v2429_v31 = vld [vmem:[%s5301_s11 + $0x1c0] sm:$0xff]  ;;  %v2448_v34 = vld [vmem:[%s5301_s11 + $0xb8] sm:$0xff]  ;;  %v2460_v36 = vld [vmem:[%s5301_s11 + $0x30] sm:$0xff] }
  0x1e   :  { %277 = vmatpush.msra.mxu3 %v2357_v19  ;;  %255 = vmatpush.msra.mxu2 %v2369_v21  ;;  %v2453_v35 = vld [vmem:[%s5301_s11 + $0x1b8] sm:$0xff]  ;;  %v2465_v37 = vld [vmem:[%s5301_s11 + $0x130] sm:$0xff]  ;;  %v2484_v40 = vld [vmem:[%s5301_s11 + $0x28] sm:$0xff] }
  0x1f   :  { %232 = vmatpush.msra.mxu1 %v2376_v22  ;;  %210 = vmatpush.msra.mxu0 %v2388_v24  ;;  %v2472_v38 = vld [vmem:[%s5301_s11 + $0xb0] sm:$0xff]  ;;  %v2489_v41 = vld [vmem:[%s5301_s11 + $0x128] sm:$0xff]  ;;  %v2508_v44 = vld [vmem:[%s5301_s11 + $0x20] sm:$0xff] }
  0x20   :  { %278 = vmatpush.msra.mxu3 %v2381_v23  ;;  %256 = vmatpush.msra.mxu2 %v2393_v25  ;;  %v2477_v39 = vld [vmem:[%s5301_s11 + $0x1b0] sm:$0xff]  ;;  %v2496_v42 = vld [vmem:[%s5301_s11 + $0xa8] sm:$0xff]  ;;  %v2513_v45 = vld [vmem:[%s5301_s11 + $0x120] sm:$0xff] }
  0x21   :  { %233 = vmatpush.msra.mxu1 %v2400_v26  ;;  %211 = vmatpush.msra.mxu0 %v2412_v28  ;;  %v2501_v43 = vld [vmem:[%s5301_s11 + $0x1a8] sm:$0xff]  ;;  %v2520_v46 = vld [vmem:[%s5301_s11 + $0xa0] sm:$0xff]  ;;  %v2532_v48 = vld [vmem:[%s5301_s11 + $0x18] sm:$0xff] }
  0x22   :  { %279 = vmatpush.msra.mxu3 %v2405_v27  ;;  %257 = vmatpush.msra.mxu2 %v2417_v29  ;;  %v2525_v47 = vld [vmem:[%s5301_s11 + $0x1a0] sm:$0xff]  ;;  %v2537_v49 = vld [vmem:[%s5301_s11 + $0x118] sm:$0xff]  ;;  %v2556_v52 = vld [vmem:[%s5301_s11 + $0x10] sm:$0xff] }
  0x23   :  { %234 = vmatpush.msra.mxu1 %v2424_v30  ;;  %212 = vmatpush.msra.mxu0 %v2436_v32  ;;  %5302 = vst [vmem:[#allocation2_spill] sm:$0xff] %v2525_v47  ;;  %v2544_v50 = vld [vmem:[%s5301_s11 + $0x98] sm:$0xff]  ;;  %v2561_v53 = vld [vmem:[%s5301_s11 + $0x110] sm:$0xff]  ;;  %v2580_v56 = vld [vmem:[%s5301_s11 + $0x8] sm:$0xff] }
  0x24   :  { %280 = vmatpush.msra.mxu3 %v2429_v31  ;;  %258 = vmatpush.msra.mxu2 %v2441_v33  ;;  %v2549_v51 = vld [vmem:[%s5301_s11 + $0x198] sm:$0xff]  ;;  %5304 = vst [vmem:[#allocation4_spill] sm:$0xff] %v2561_v53  ;;  %v2568_v54 = vld [vmem:[%s5301_s11 + $0x90] sm:$0xff]  ;;  %v2585_v57 = vld [vmem:[%s5301_s11 + $0x108] sm:$0xff] }
  0x25   :  { %235 = vmatpush.msra.mxu1 %v2448_v34  ;;  %213 = vmatpush.msra.mxu0 %v2460_v36  ;;  %5303 = vst [vmem:[#allocation3_spill] sm:$0xff] %v2549_v51  ;;  %v2573_v55 = vld [vmem:[%s5301_s11 + $0x190] sm:$0xff]  ;;  %v2592_v58 = vld [vmem:[%s5301_s11 + $0x88] sm:$0xff]  ;;  %v2604_v60 = vld [vmem:[%s5301_s11] sm:$0xff] }
  0x26   :  { %281 = vmatpush.msra.mxu3 %v2453_v35  ;;  %259 = vmatpush.msra.mxu2 %v2465_v37  ;;  %5305 = vst [vmem:[#allocation5_spill] sm:$0xff] %v2573_v55  ;;  %v2597_v59 = vld [vmem:[%s5301_s11 + $0x188] sm:$0xff]  ;;  %v2609_v61 = vld [vmem:[%s5301_s11 + $0x100] sm:$0xff]  ;;  %v2616_v62 = vld [vmem:[%s5301_s11 + $0x278] sm:$0xff] }
  0x27   :  { %236 = vmatpush.msra.mxu1 %v2472_v38  ;;  %214 = vmatpush.msra.mxu0 %v2484_v40  ;;  %5306 = vst [vmem:[#allocation6_spill] sm:$0xff] %v2585_v57  ;;  %v2623_v63 = vld [vmem:[%s5301_s11 + $0x80] sm:$0xff] }
  0x28   :  { %282 = vmatpush.msra.mxu3 %v2477_v39  ;;  %260 = vmatpush.msra.mxu2 %v2489_v41  ;;  %5307 = vst [vmem:[#allocation7_spill] sm:$0xff] %v2597_v59 }
  0x29   :  { %237 = vmatpush.msra.mxu1 %v2496_v42  ;;  %215 = vmatpush.msra.mxu0 %v2508_v44  ;;  %5308 = vst [vmem:[#allocation8_spill] sm:$0xff] %v2609_v61 }
  0x2a   :  { %283 = vmatpush.msra.mxu3 %v2501_v43  ;;  %261 = vmatpush.msra.mxu2 %v2513_v45 }
  0x2b   :  { %238 = vmatpush.msra.mxu1 %v2520_v46  ;;  %216 = vmatpush.msra.mxu0 %v2532_v48 }
  0x2c   :  { %284 = vmatpush.msra.mxu3 %v2525_v47  ;;  %262 = vmatpush.msra.mxu2 %v2537_v49  ;;  %v2759_v47 = vld [vmem:[%s5301_s11 + $0x2b8] sm:$0xff] }
  0x2d   :  { %239 = vmatpush.msra.mxu1 %v2544_v50  ;;  %217 = vmatpush.msra.mxu0 %v2556_v52 }
  0x2e   :  { %285 = vmatpush.msra.mxu3 %v2549_v51  ;;  %263 = vmatpush.msra.mxu2 %v2561_v53  ;;  %v2654_v51 = vld [vmem:[%s5301_s11 + $0x2f0] sm:$0xff]  ;;  %v2743_v53 = vld [vmem:[%s5301_s11 + $0x238] sm:$0xff] }
  0x2f   :  { %240 = vmatpush.msra.mxu1 %v2568_v54  ;;  %218 = vmatpush.msra.mxu0 %v2580_v56 }
  0x30   :  { %286 = vmatpush.msra.mxu3 %v2573_v55  ;;  %264 = vmatpush.msra.mxu2 %v2585_v57  ;;  %v2628_v55 = vld [vmem:[%s5301_s11 + $0x180] sm:$0xff]  ;;  %v2635_v57 = vld [vmem:[%s5301_s11 + $0x270] sm:$0xff] }
  0x31   :  { %241 = vmatpush.msra.mxu1 %v2592_v58  ;;  %5309 = vst [vmem:[#allocation9_spill] sm:$0xff] %v2628_v55  ;;  %219 = vmatpush.msra.mxu0 %v2604_v60 }
  0x32   :  { %287 = vmatpush.msra.mxu3 %v2597_v59  ;;  %265 = vmatpush.msra.mxu2 %v2609_v61  ;;  %v2640_v59 = vld [vmem:[%s5301_s11 + $0x2f8] sm:$0xff]  ;;  %v2649_v61 = vld [vmem:[%s5301_s11 + $0x268] sm:$0xff] }
  0x33   :  { %296 = vmatpush.msrb.mxu0 %v2616_v62  ;;  %242 = vmatpush.msra.mxu1 %v2623_v63 }
  0x34   :  { %342 = vmatpush.msrb.mxu2 %v2248_v0  ;;  %288 = vmatpush.msra.mxu3 %v2628_v55  ;;  %v2663_v0 = vld [vmem:[%s5301_s11 + $0x260] sm:$0xff]  ;;  %v2668_v55 = vld [vmem:[%s5301_s11 + $0x2e8] sm:$0xff] }
  0x35   :  { %297 = vmatpush.msrb.mxu0 %v2635_v57  ;;  %319 = vmatpush.msrb.mxu1 %v2640_v59 }
  0x36   :  { %343 = vmatpush.msrb.mxu2 %v2258_v2  ;;  %365 = vmatpush.msrb.mxu3 %v2265_v3  ;;  %v2677_v2 = vld [vmem:[%s5301_s11 + $0x258] sm:$0xff]  ;;  %v2682_v3 = vld [vmem:[%s5301_s11 + $0x2e0] sm:$0xff] }
  0x37   :  { %298 = vmatpush.msrb.mxu0 %v2649_v61  ;;  %320 = vmatpush.msrb.mxu1 %v2654_v51 }
  0x38   :  { %344 = vmatpush.msrb.mxu2 %v2282_v6  ;;  %366 = vmatpush.msrb.mxu3 %v2287_v7  ;;  %v2691_v6 = vld [vmem:[%s5301_s11 + $0x250] sm:$0xff]  ;;  %v2696_v7 = vld [vmem:[%s5301_s11 + $0x2d8] sm:$0xff] }
  0x39   :  { %299 = vmatpush.msrb.mxu0 %v2663_v0  ;;  %321 = vmatpush.msrb.mxu1 %v2668_v55 }
  0x3a   :  { %345 = vmatpush.msrb.mxu2 %v2311_v11  ;;  %367 = vmatpush.msrb.mxu3 %v2304_v10  ;;  %v2705_v10 = vld [vmem:[%s5301_s11 + $0x248] sm:$0xff]  ;;  %v2710_v11 = vld [vmem:[%s5301_s11 + $0x2d0] sm:$0xff] }
  0x3b   :  { %300 = vmatpush.msrb.mxu0 %v2677_v2  ;;  %322 = vmatpush.msrb.mxu1 %v2682_v3 }
  0x3c   :  { %346 = vmatpush.msrb.mxu2 %v2340_v16  ;;  %368 = vmatpush.msrb.mxu3 %v2328_v14  ;;  %v2719_v14 = vld [vmem:[%s5301_s11 + $0x240] sm:$0xff]  ;;  %v2724_v16 = vld [vmem:[%s5301_s11 + $0x2c8] sm:$0xff] }
  0x3d   :  { %301 = vmatpush.msrb.mxu0 %v2691_v6  ;;  %323 = vmatpush.msrb.mxu1 %v2696_v7 }
  0x3e   :  { %347 = vmatpush.msrb.mxu2 %v2364_v20  ;;  %369 = vmatpush.msrb.mxu3 %v2352_v18  ;;  %v80_v18 = vld [vmem:[%s5310_s0] sm:$0xff] }
  0x3f   :  { %302 = vmatpush.msrb.mxu0 %v2705_v10  ;;  %324 = vmatpush.msrb.mxu1 %v2710_v11  ;;  %v2736_v20 = vld [vmem:[%s5301_s11 + $0x2c0] sm:$0xff] }
  0x40   :  { %348 = vmatpush.msrb.mxu2 %v2388_v24  ;;  %370 = vmatpush.msrb.mxu3 %v2376_v22  ;;  %v81_v22 = vld [vmem:[%s5310_s0 + $0x8] sm:$0xff]  ;;  %v2754_v24 = vld [vmem:[%s5301_s11 + $0x230] sm:$0xff] }
  0x41   :  { %303 = vmatpush.msrb.mxu0 %v2719_v14  ;;  %325 = vmatpush.msrb.mxu1 %v2724_v16 }
  0x42   :  { %349 = vmatpush.msrb.mxu2 %v2412_v28  ;;  %371 = vmatpush.msrb.mxu3 %v2400_v26  ;;  %v82_v26 = vld [vmem:[%s5310_s0 + $0x10] sm:$0xff]  ;;  %v2770_v28 = vld [vmem:[%s5301_s11 + $0x228] sm:$0xff] }
  0x43   :  { %220 = vmatmul.f32.vlgmr.msra.gmra.mxu0 %v80_v18  ;;  %326 = vmatpush.msrb.mxu1 %v2736_v20  ;;  %v83_v18 = vld [vmem:[%s5310_s0 + $0x18] sm:$0xff] }
  0x44   :  { %304 = vmatpush.msrb.mxu0 %v2743_v53  ;;  %350 = vmatpush.msrb.mxu2 %v2436_v32  ;;  %v2777_v32 = vld [vmem:[%s5301_s11 + $0x2b0] sm:$0xff] }
  0x45   :  { %372 = vmatpush.msrb.mxu3 %v2424_v30  ;;  %243 = vmatmul.f32.vlgmr.msra.gmra.mxu1 %v81_v22  ;;  %v2784_v30 = vld [vmem:[%s5301_s11 + $0x220] sm:$0xff]  ;;  %v2793_v22 = vld [vmem:[%s5301_s11 + $0x2a8] sm:$0xff] }
  0x46   :  { %305 = vmatpush.msrb.mxu0 %v2754_v24  ;;  %327 = vmatpush.msrb.mxu1 %v2759_v47 }
  0x47   :  { %351 = vmatpush.msrb.mxu2 %v2460_v36  ;;  %373 = vmatpush.msrb.mxu3 %v2448_v34  ;;  %v86_v34 = vld [vmem:[%s5310_s0 + $0x30] sm:$0xf]  ;;  %v2805_v36 = vld [vmem:[%s5301_s11 + $0x2a0] sm:$0xff] }
  0x48   :  { %266 = vmatmul.f32.vlgmr.msra.gmra.mxu2 %v82_v26  ;;  %306 = vmatpush.msrb.mxu0 %v2770_v28  ;;  %v2822_v26 = vld [vmem:[%s5301_s11 + $0x210] sm:$0xff] }
  0x49   :  { %328 = vmatpush.msrb.mxu1 %v2777_v32  ;;  %352 = vmatpush.msrb.mxu2 %v2484_v40  ;;  %v2811_v40 = vld [vmem:[%s5301_s11 + $0x218] sm:$0xff] }
  0x4a   :  { %374 = vmatpush.msrb.mxu3 %v2472_v38  ;;  %307 = vmatpush.msrb.mxu0 %v2784_v30  ;;  %v87_v38 = vld [vmem:[%s5310_s0 + $0x38] sm:$0xf] }
  0x4b   :  { %289 = vmatmul.f32.vlgmr.msra.gmra.mxu3 %v83_v18  ;;  %329 = vmatpush.msrb.mxu1 %v2793_v22  ;;  %v2827_v18 = vld [vmem:[%s5301_s11 + $0x298] sm:$0xff] }
  0x4c   :  { %353 = vmatpush.msrb.mxu2 %v2508_v44  ;;  %375 = vmatpush.msrb.mxu3 %v2496_v42  ;;  %v88_v42 = vld [vmem:[%s5310_s0 + $0x40] sm:$0xf]  ;;  %v2838_v44 = vld [vmem:[%s5301_s11 + $0x208] sm:$0xff] }
  0x4d   :  { %223 = vmatmul.f32.gmra.mxu0 %v86_v34  ;;  %330 = vmatpush.msrb.mxu1 %v2805_v36  ;;  %v89_v34 = vld [vmem:[%s5310_s0 + $0x48] sm:$0xf] }
  0x4e   :  { %308 = vmatpush.msrb.mxu0 %v2811_v40  ;;  %354 = vmatpush.msrb.mxu2 %v2532_v48  ;;  %v2845_v48 = vld [vmem:[%s5301_s11 + $0x290] sm:$0xff] }
  0x4f   :  { %376 = vmatpush.msrb.mxu3 %v2520_v46  ;;  %246 = vmatmul.f32.gmra.mxu1 %v87_v38  ;;  %v2852_v46 = vld [vmem:[%s5301_s11 + $0x200] sm:$0xff]  ;;  %v2861_v38 = vld [vmem:[%s5301_s11 + $0x288] sm:$0xff] }
  0x50   :  { %309 = vmatpush.msrb.mxu0 %v2822_v26  ;;  %331 = vmatpush.msrb.mxu1 %v2827_v18 }
  0x51   :  { %355 = vmatpush.msrb.mxu2 %v2556_v52  ;;  %377 = vmatpush.msrb.mxu3 %v2544_v50  ;;  %v84_v50 = vld [vmem:[%s5310_s0 + $0x20] sm:$0xff] }
  0x52   :  { %269 = vmatmul.f32.gmra.mxu2 %v88_v42  ;;  %310 = vmatpush.msrb.mxu0 %v2838_v44  ;;  %v2874_v52 = vld [vmem:[%s5301_s11 + $0x280] sm:$0xff] }
  0x53   :  { %332 = vmatpush.msrb.mxu1 %v2845_v48  ;;  %356 = vmatpush.msrb.mxu2 %v2580_v56  ;;  %v101_v56 = vld [vmem:[%s5311_s25 + $0x48] sm:$0xf] }
  0x54   :  { %378 = vmatpush.msrb.mxu3 %v2568_v54  ;;  %311 = vmatpush.msrb.mxu0 %v2852_v46  ;;  %v85_v54 = vld [vmem:[%s5310_s0 + $0x28] sm:$0xff] }
  0x55   :  { %292 = vmatmul.f32.gmra.mxu3 %v89_v34  ;;  %333 = vmatpush.msrb.mxu1 %v2861_v38 }
  0x56   :  { %357 = vmatpush.msrb.mxu2 %v2604_v60  ;;  %379 = vmatpush.msrb.mxu3 %v2592_v58  ;;  %v506_v58 = vld [vmem:[%s5319_s28 + $0xb0] sm:$0xff]  ;;  %v504_v60 = vld [vmem:[%s5319_s28 + $0xa0] sm:$0xff] }
  0x57   :  { %312 = vmatmul.f32.vlgmr.msrb.gmra.mxu0 %v84_v50  ;;  %334 = vmatpush.msrb.mxu1 %v2874_v52 }
  0x58   :  { %434 = vmatpush.msra.mxu2 %v2616_v62  ;;  %388 = vmatpush.msra.mxu0 %v2253_v1  ;;  %v90_v1 = vld [vmem:[%s5310_s0 + $0x50] sm:$0xf] }
  0x59   :  { %380 = vmatpush.msrb.mxu3 %v2623_v63  ;;  %335 = vmatmul.f32.vlgmr.msrb.gmra.mxu1 %v85_v54  ;;  %v502_v62 = vld [vmem:[%s5319_s28 + $0x90] sm:$0xff]  ;;  %v503_v63 = vld [vmem:[%s5319_s28 + $0x98] sm:$0xff] }
  0x5a   :  { %389 = vmatpush.msra.mxu0 %v2270_v4  ;;  %411 = vmatpush.msra.mxu1 %v2275_v5  ;;  %v91_v4 = vld [vmem:[%s5310_s0 + $0x58] sm:$0xf]  ;;  %v92_v5 = vld [vmem:[%s5311_s25] sm:$0xff] }
  0x5b   :  { %435 = vmatpush.msra.mxu2 %v2635_v57  ;;  %457 = vmatpush.msra.mxu3 %v2640_v59  ;;  %v103_v57 = vld [vmem:[%s5311_s25 + $0x58] sm:$0xf] }
  0x5c   :  { %390 = vmatpush.msra.mxu0 %v2292_v8  ;;  %412 = vmatpush.msra.mxu1 %v2299_v9  ;;  %v93_v8 = vld [vmem:[%s5311_s25 + $0x8] sm:$0xff]  ;;  %v98_v9 = vld [vmem:[%s5311_s25 + $0x30] sm:$0xf]  ;;  %v507_v59 = vld [vmem:[%s5319_s28 + $0xb8] sm:$0xff] }
  0x5d   :  { %436 = vmatpush.msra.mxu2 %v2649_v61  ;;  %458 = vmatpush.msra.mxu3 %v2654_v51  ;;  %v102_v51 = vld [vmem:[%s5311_s25 + $0x50] sm:$0xf]  ;;  %v505_v61 = vld [vmem:[%s5319_s28 + $0xa8] sm:$0xff] }
  0x5e   :  { %391 = vmatpush.msra.mxu0 %v2316_v12  ;;  %413 = vmatpush.msra.mxu1 %v2321_v13  ;;  %v99_v12 = vld [vmem:[%s5311_s25 + $0x38] sm:$0xf]  ;;  %v5312_v13 = vld [vmem:[#allocation2_spill] sm:$0xff] }
  0x5f   :  { %437 = vmatpush.msra.mxu2 %v2663_v0  ;;  %459 = vmatpush.msra.mxu3 %v2668_v55  ;;  %v3025_v55 = vld [vmem:[%s5319_s28 + $0xc8] sm:$0xff]  ;;  %v500_v0 = vld [vmem:[%s5319_s28 + $0x80] sm:$0xff] }
  0x60   :  { %315 = vmatmul.f32.gmra.mxu0 %v90_v1  ;;  %414 = vmatpush.msra.mxu1 %v2333_v15  ;;  %v5313_v15 = vld [vmem:[#allocation4_spill] sm:$0xff] }
  0x61   :  { %392 = vmatpush.msra.mxu0 %v2345_v17  ;;  %438 = vmatpush.msra.mxu2 %v2677_v2  ;;  %v5314_v17 = vld [vmem:[#allocation3_spill] sm:$0xff] }
  0x62   :  { %460 = vmatpush.msra.mxu3 %v2682_v3  ;;  %338 = vmatmul.f32.gmra.mxu1 %v91_v4  ;;  %v501_v2 = vld [vmem:[%s5319_s28 + $0x88] sm:$0xff]  ;;  %v498_v3 = vld [vmem:[%s5319_s28 + $0x70] sm:$0xff] }
  0x63   :  { %393 = vmatpush.msra.mxu0 %v2369_v21  ;;  %415 = vmatpush.msra.mxu1 %v2357_v19  ;;  %v5315_v19 = vld [vmem:[#allocation6_spill] sm:$0xff]  ;;  %v5316_v21 = vld [vmem:[#allocation5_spill] sm:$0xff] }
  0x64   :  { %439 = vmatpush.msra.mxu2 %v2691_v6  ;;  %461 = vmatpush.msra.mxu3 %v2696_v7  ;;  %v499_v6 = vld [vmem:[%s5319_s28 + $0x78] sm:$0xff]  ;;  %v496_v7 = vld [vmem:[%s5319_s28 + $0x60] sm:$0xff] }
  0x65   :  { %394 = vmatpush.msra.mxu0 %v2393_v25  ;;  %416 = vmatpush.msra.mxu1 %v2381_v23  ;;  %v94_v23 = vld [vmem:[%s5311_s25 + $0x10] sm:$0xff]  ;;  %v96_v25 = vld [vmem:[%s5311_s25 + $0x20] sm:$0xff] }
  0x66   :  { %440 = vmatpush.msra.mxu2 %v2705_v10  ;;  %462 = vmatpush.msra.mxu3 %v2710_v11  ;;  %v497_v10 = vld [vmem:[%s5319_s28 + $0x68] sm:$0xff]  ;;  %v494_v11 = vld [vmem:[%s5319_s28 + $0x50] sm:$0xff] }
  0x67   :  { %395 = vmatpush.msra.mxu0 %v2417_v29  ;;  %417 = vmatpush.msra.mxu1 %v2405_v27  ;;  %v5317_v27 = vld [vmem:[#allocation8_spill] sm:$0xff]  ;;  %v5318_v29 = vld [vmem:[#allocation7_spill] sm:$0xff] }
  0x68   :  { %441 = vmatpush.msra.mxu2 %v2719_v14  ;;  %463 = vmatpush.msra.mxu3 %v2724_v16  ;;  %v495_v14 = vld [vmem:[%s5319_s28 + $0x58] sm:$0xff]  ;;  %v492_v16 = vld [vmem:[%s5319_s28 + $0x40] sm:$0xff] }
  0x69   :  { %358 = vmatmul.f32.vlgmr.msrb.gmra.mxu2 %v92_v5  ;;  %396 = vmatpush.msra.mxu0 %v2441_v33  ;;  %v97_v33 = vld [vmem:[%s5311_s25 + $0x28] sm:$0xff] }
  0x6a   :  { %418 = vmatpush.msra.mxu1 %v2429_v31  ;;  %442 = vmatpush.msra.mxu2 %v2743_v53  ;;  %v95_v31 = vld [vmem:[%s5311_s25 + $0x18] sm:$0xff]  ;;  %v3020_v53 = vld [vmem:[%s5319_s28 + $0xc0] sm:$0xff] }
  0x6b   :  { %464 = vmatpush.msra.mxu3 %v2736_v20  ;;  %397 = vmatpush.msra.mxu0 %v2465_v37  ;;  %v2983_v37 = vld [vmem:[%s5319_s28 + $0xf8] sm:$0xff]  ;;  %v493_v20 = vld [vmem:[%s5319_s28 + $0x48] sm:$0xff] }
  0x6c   :  { %381 = vmatmul.f32.vlgmr.msrb.gmra.mxu3 %v93_v8  ;;  %419 = vmatpush.msra.mxu1 %v2453_v35  ;;  %v2978_v35 = vld [vmem:[%s5319_s28 + $0xf0] sm:$0xff] }
  0x6d   :  { %443 = vmatpush.msra.mxu2 %v2754_v24  ;;  %465 = vmatpush.msra.mxu3 %v2759_v47  ;;  %v3007_v47 = vld [vmem:[%s5319_s28 + $0xd8] sm:$0xff]  ;;  %v490_v24 = vld [vmem:[%s5319_s28 + $0x30] sm:$0xff] }
  0x6e   :  { %398 = vmatpush.msra.mxu0 %v2489_v41  ;;  %420 = vmatpush.msra.mxu1 %v2477_v39  ;;  %v5320_v39 = vld [vmem:[#allocation9_spill] sm:$0xff]  ;;  %v2990_v41 = vld [vmem:[%s5319_s28 + $0xe0] sm:$0xff] }
  0x6f   :  { %444 = vmatpush.msra.mxu2 %v2770_v28  ;;  %466 = vmatpush.msra.mxu3 %v2777_v32  ;;  %v491_v28 = vld [vmem:[%s5319_s28 + $0x38] sm:$0xff]  ;;  %v488_v32 = vld [vmem:[%s5319_s28 + $0x20] sm:$0xff] }
  0x70   :  { %399 = vmatpush.msra.mxu0 %v2513_v45  ;;  %421 = vmatpush.msra.mxu1 %v2501_v43  ;;  %v2995_v43 = vld [vmem:[%s5319_s28 + $0xe8] sm:$0xff]  ;;  %v3002_v45 = vld [vmem:[%s5319_s28 + $0xd0] sm:$0xff] }
  0x71   :  { %445 = vmatpush.msra.mxu2 %v2784_v30  ;;  %467 = vmatpush.msra.mxu3 %v2793_v22  ;;  %v489_v30 = vld [vmem:[%s5319_s28 + $0x28] sm:$0xff]  ;;  %v486_v22 = vld [vmem:[%s5319_s28 + $0x10] sm:$0xff] }
  0x72   :  { %361 = vmatmul.f32.gmra.mxu2 %v98_v9  ;;  %400 = vmatpush.msra.mxu0 %v2537_v49  ;;  %v100_v49 = vld [vmem:[%s5311_s25 + $0x40] sm:$0xf] }
  0x73   :  { %422 = vmatpush.msra.mxu1 %v5312_v13  ;;  %446 = vmatpush.msra.mxu2 %v2811_v40  ;;  %v484_v40 = vld [vmem:[%s5319_s28] sm:$0xff] }
  0x74   :  { %468 = vmatpush.msra.mxu3 %v2805_v36  ;;  %401 = vmatpush.msra.mxu0 %v5313_v15  ;;  %v487_v36 = vld [vmem:[%s5319_s28 + $0x18] sm:$0xff] }
  0x75   :  { %384 = vmatmul.f32.gmra.mxu3 %v99_v12  ;;  %423 = vmatpush.msra.mxu1 %v5314_v17 }
  0x76   :  { %447 = vmatpush.msra.mxu2 %v2822_v26  ;;  %469 = vmatpush.msra.mxu3 %v2827_v18  ;;  %v485_v26 = vld [vmem:[%s5319_s28 + $0x8] sm:$0xff] }
  0x77   :  { %402 = vmatpush.msra.mxu0 %v5315_v19  ;;  %424 = vmatpush.msra.mxu1 %v5316_v21 }
  0x78   :  { %448 = vmatpush.msra.mxu2 %v2838_v44  ;;  %470 = vmatpush.msra.mxu3 %v2845_v48  ;;  %v2058_v44 = vld [vmem:[%s5321_s3] ss:$0 sm:$0xff]  ;;  %s5324_s3 = sld [smem:[#allocation57_spill]] }
  0x79   :  { %403 = vmatpush.msra.mxu0 %v5317_v27  ;;  %425 = vmatpush.msra.mxu1 %v5318_v29 }
  0x7a   :  { %449 = vmatpush.msra.mxu2 %v2852_v46  ;;  %471 = vmatpush.msra.mxu3 %v2861_v38 }
  0x7b   :  { %404 = vmatmul.f32.vlgmr.msra.gmra.mxu0 %v94_v23  ;;  %450 = vmatmul.f32.vlgmr.msra.gmra.mxu2 %v96_v25 }
  0x7c   :  { %426 = vmatpush.msra.mxu1 %v5320_v39  ;;  %472 = vmatpush.msra.mxu3 %v2874_v52 }
  0x7d   :  { %427 = vmatmul.f32.vlgmr.msra.gmra.mxu1 %v95_v31  ;;  %473 = vmatmul.f32.vlgmr.msra.gmra.mxu3 %v97_v33 }
  0x7e   :  { %557 = vmatpush.msrb.mxu0 %v2978_v35  ;;  %577 = vmatpush.msrb.mxu1 %v2983_v37 }
  0x80   :  { %558 = vmatpush.msrb.mxu0 %v2990_v41  ;;  %578 = vmatpush.msrb.mxu1 %v2995_v43 }
  0x82   :  { %559 = vmatpush.msrb.mxu0 %v3002_v45  ;;  %579 = vmatpush.msrb.mxu1 %v3007_v47 }
  0x83   :  { %407 = vmatmul.f32.gmra.mxu0 %v100_v49  ;;  %453 = vmatmul.f32.gmra.mxu2 %v102_v51 }
  0x84   :  { %560 = vmatpush.msrb.mxu0 %v3020_v53  ;;  %580 = vmatpush.msrb.mxu1 %v3025_v55 }
  0x85   :  { %430 = vmatmul.f32.gmra.mxu1 %v101_v56  ;;  %476 = vmatmul.f32.gmra.mxu3 %v103_v57 }
  0x86   :  { %561 = vmatpush.msrb.mxu0 %v506_v58  ;;  %581 = vmatpush.msrb.mxu1 %v507_v59 }
  0x88   :  { %562 = vmatpush.msrb.mxu0 %v504_v60  ;;  %582 = vmatpush.msrb.mxu1 %v505_v61 }
  0x8a   :  { %563 = vmatpush.msrb.mxu0 %v502_v62  ;;  %583 = vmatpush.msrb.mxu1 %v503_v63 }
  0x8c   :  { %564 = vmatpush.msrb.mxu0 %v500_v0  ;;  %584 = vmatpush.msrb.mxu1 %v501_v2 }
  0x8e   :  { %565 = vmatpush.msrb.mxu0 %v498_v3  ;;  %585 = vmatpush.msrb.mxu1 %v499_v6 }
  0x90   :  { %566 = vmatpush.msrb.mxu0 %v496_v7  ;;  %586 = vmatpush.msrb.mxu1 %v497_v10 }
  0x92   :  { %567 = vmatpush.msrb.mxu0 %v494_v11  ;;  %587 = vmatpush.msrb.mxu1 %v495_v14 }
  0x94   :  { %568 = vmatpush.msrb.mxu0 %v492_v16  ;;  %588 = vmatpush.msrb.mxu1 %v493_v20 }
  0x96   :  { %569 = vmatpush.msrb.mxu0 %v490_v24  ;;  %589 = vmatpush.msrb.mxu1 %v491_v28 }
  0x98   :  { %570 = vmatpush.msrb.mxu0 %v488_v32  ;;  %590 = vmatpush.msrb.mxu1 %v489_v30 }
  0x9a   :  { %571 = vmatpush.msrb.mxu0 %v486_v22  ;;  %591 = vmatpush.msrb.mxu1 %v487_v36 }
  0x9c   :  { %572 = vmatpush.msrb.mxu0 %v484_v40  ;;  %592 = vmatpush.msrb.mxu1 %v485_v26 }
  0x9e   :  { %724 = vmatpush.msra.mxu0 %v2978_v35  ;;  %744 = vmatpush.msra.mxu1 %v2983_v37 }
  0xa0   :  { %725 = vmatpush.msra.mxu0 %v2990_v41  ;;  %745 = vmatpush.msra.mxu1 %v2995_v43 }
  0xa2   :  { %726 = vmatpush.msra.mxu0 %v3002_v45  ;;  %746 = vmatpush.msra.mxu1 %v3007_v47 }
  0xa4   :  { %727 = vmatpush.msra.mxu0 %v3020_v53  ;;  %747 = vmatpush.msra.mxu1 %v3025_v55 }
  0xa6   :  { %728 = vmatpush.msra.mxu0 %v506_v58  ;;  %748 = vmatpush.msra.mxu1 %v507_v59 }
  0xa8   :  { %729 = vmatpush.msra.mxu0 %v504_v60  ;;  %749 = vmatpush.msra.mxu1 %v505_v61 }
  0xaa   :  { %730 = vmatpush.msra.mxu0 %v502_v62  ;;  %750 = vmatpush.msra.mxu1 %v503_v63 }
  0xac   :  { %731 = vmatpush.msra.mxu0 %v500_v0  ;;  %751 = vmatpush.msra.mxu1 %v501_v2 }
  0xae   :  { %732 = vmatpush.msra.mxu0 %v498_v3  ;;  %752 = vmatpush.msra.mxu1 %v499_v6  ;;  %v2109_v6 = vmov 4.0  }
  0xaf   :  { %2063 = vrcp.f32 %v2109_v6 }
  0xb0   :  { %733 = vmatpush.msra.mxu0 %v496_v7  ;;  %753 = vmatpush.msra.mxu1 %v497_v10  ;;  %v3135_v10 = vld [vmem:[%s5324_s3] sm:$0x3] }
  0xb2   :  { %734 = vmatpush.msra.mxu0 %v494_v11  ;;  %754 = vmatpush.msra.mxu1 %v495_v14  ;;  %v553_v11 = vperm.slane %v3135_v10, 0 }
  0xb4   :  { %735 = vmatpush.msra.mxu0 %v492_v16  ;;  %755 = vmatpush.msra.mxu1 %v493_v20  ;;  %v554_v16 = vperm.slane %v3135_v10, 1 }
  0xb5   :  { %v2064_v7 = vpop.eup %2063 }
  0xb6   :  { %736 = vmatpush.msra.mxu0 %v490_v24  ;;  %756 = vmatpush.msra.mxu1 %v491_v28  ;;  %v613_v14 = vmul.f32 4.0, %v2064_v7  ;;  %vm617_vm1 = vweird.f32 %v2064_v7 }
  0xb8   :  { %737 = vmatpush.msra.mxu0 %v488_v32  ;;  %757 = vmatpush.msra.mxu1 %v489_v30  ;;  %v614_v32 = vsub.f32 1.0, %v613_v14 }
  0xba   :  { %738 = vmatpush.msra.mxu0 %v486_v22  ;;  %758 = vmatpush.msra.mxu1 %v487_v36 }
  0xbc   :  { %739 = vmatpush.msra.mxu0 %v484_v40  ;;  %759 = vmatpush.msra.mxu1 %v485_v26 }
  0xc0   :  { %v221_v18 = vpop.f32.mrf.mxu0 }
  0xc1   :  { %v222_v48 = vadd.f32 %v2058_v44, %v221_v18  ;;  %v615_v18 = vmul.f32 %v2064_v7, %v614_v32 }
  0xc2   :  { %v244_v42 = vpop.f32.mrf.mxu1 }
  0xc3   :  { %v245_v34 = vadd.f32 %v244_v42, %v222_v48 }
  0xca   :  { %v224_v46 = vpop.f32.mrf.mxu0 }
  0xcb   :  { %v267_v38 = vpop.f32.mrf.mxu2  ;;  %v225_v1 = vadd.f32 %v2058_v44, %v224_v46 }
  0xcc   :  { %v247_v50 = vpop.f32.mrf.mxu1  ;;  %v268_v52 = vadd.f32 %v267_v38, %v245_v34 }
  0xcd   :  { %v248_v5 = vadd.f32 %v247_v50, %v225_v1 }
  0xce   :  { %v290_v54 = vpop.f32.mrf.mxu3 }
  0xcf   :  { %v291_v4 = vadd.f32 %v290_v54, %v268_v52  ;;  %v616_v54 = vadd.f32 %v2064_v7, %v615_v18 }
  0xd4   :  { %v313_v8 = vpop.f32.mrf.mxu0 }
  0xd5   :  { %v314_v9 = vadd.f32 %v313_v8, %v291_v4  ;;  %v270_v12 = vpop.f32.mrf.mxu2 }
  0xd6   :  { %v336_v13 = vpop.f32.mrf.mxu1  ;;  %v271_v17 = vadd.f32 %v270_v12, %v248_v5 }
  0xd7   :  { %v337_v15 = vadd.f32 %v336_v13, %v314_v9  ;;  %v3181_v13 = vsel %vm617_vm1, %v2064_v7, %v616_v54 }
  0xd8   :  { %v293_v19 = vpop.f32.mrf.mxu3  ;;  %5326 = vst [vmem:[#allocation2_spill] sm:$0xff] %v3181_v13 }
  0xd9   :  { %573 = vmatmul.f32.vlgmr.msrb.gmra.mxu0 %v337_v15  ;;  %593 = vmatmul.f32.vlgmr.msrb.gmra.mxu1 %v337_v15  ;;  %480 = vst [vmem:[%s5322_s29] sm:$0xff] %v337_v15  ;;  %v294_v21 = vadd.f32 %v293_v19, %v271_v17 }
  0xdd   :  { %v316_v23 = vpop.f32.mrf.mxu0 }
  0xde   :  { %v317_v25 = vadd.f32 %v316_v23, %v294_v21 }
  0xdf   :  { %v339_v27 = vpop.f32.mrf.mxu1 }
  0xe0   :  { %v340_v29 = vadd.f32 %v339_v27, %v317_v25 }
  0xe2   :  { %481 = vst [vmem:[%s5322_s29 + $0x8] sm:$0xf] %v340_v29  ;;  %s5325_s29 = sld [smem:[#allocation58_spill]] }
  0xe8   :  { %v3148_v48 = vld [vmem:[%s5325_s29 + $0x78] sm:$0xff]  ;;  %v3160_v50 = vld [vmem:[%s5325_s29 + $0x70] sm:$0xff]  ;;  %v3172_v5 = vld [vmem:[%s5325_s29 + $0x68] sm:$0xff] }
  0xe9   :  { %v3153_v46 = vld [vmem:[%s5325_s29 + $0xf8] sm:$0xff]  ;;  %684 = vmatpush.msrb.mxu2 %v3148_v48  ;;  %v3165_v52 = vld [vmem:[%s5325_s29 + $0xf0] sm:$0xff]  ;;  %v3177_v8 = vld [vmem:[%s5325_s29 + $0xe8] sm:$0xff] }
  0xea   :  { %704 = vmatpush.msrb.mxu3 %v3153_v46  ;;  %v3186_v15 = vld [vmem:[%s5325_s29 + $0x60] sm:$0xff]  ;;  %v3198_v23 = vld [vmem:[%s5325_s29 + $0x58] sm:$0xff] }
  0xeb   :  { %685 = vmatpush.msrb.mxu2 %v3160_v50  ;;  %v3191_v17 = vld [vmem:[%s5325_s29 + $0xe0] sm:$0xff]  ;;  %v3203_v25 = vld [vmem:[%s5325_s29 + $0xd8] sm:$0xff] }
  0xec   :  { %v359_v31 = vpop.f32.mrf.mxu2  ;;  %705 = vmatpush.msrb.mxu3 %v3165_v52  ;;  %v3294_v14 = vld [vmem:[%s5325_s29 + $0x20] sm:$0xff]  ;;  %v3306_v32 = vld [vmem:[%s5325_s29 + $0x18] sm:$0xff] }
  0xed   :  { %v360_v35 = vadd.f32 %v2058_v44, %v359_v31  ;;  %686 = vmatpush.msrb.mxu2 %v3172_v5  ;;  %v3212_v31 = vld [vmem:[%s5325_s29 + $0x50] sm:$0xff] }
  0xee   :  { %706 = vmatpush.msrb.mxu3 %v3177_v8 }
  0xef   :  { %v382_v33 = vpop.f32.mrf.mxu3  ;;  %687 = vmatpush.msrb.mxu2 %v3186_v15 }
  0xf0   :  { %v383_v39 = vadd.f32 %v382_v33, %v360_v35  ;;  %707 = vmatpush.msrb.mxu3 %v3191_v17  ;;  %v3217_v33 = vld [vmem:[%s5325_s29 + $0xd0] sm:$0xff] }
  0xf1   :  { %688 = vmatpush.msrb.mxu2 %v3198_v23 }
  0xf2   :  { %708 = vmatpush.msrb.mxu3 %v3203_v25 }
  0xf3   :  { %689 = vmatpush.msrb.mxu2 %v3212_v31 }
  0xf4   :  { %709 = vmatpush.msrb.mxu3 %v3217_v33 }
  0xf5   :  { %v362_v37 = vpop.f32.mrf.mxu2 }
  0xf6   :  { %v363_v49 = vadd.f32 %v2058_v44, %v362_v37 }
  0xf8   :  { %v385_v41 = vpop.f32.mrf.mxu3  ;;  %v405_v43 = vpop.f32.mrf.mxu0 }
  0xf9   :  { %v406_v45 = vadd.f32 %v405_v43, %v383_v39  ;;  %v386_v55 = vadd.f32 %v385_v41, %v363_v49  ;;  %v3228_v39 = vld [vmem:[%s5325_s29 + $0x48] sm:$0xff]  ;;  %v3249_v49 = vld [vmem:[%s5325_s29 + $0xc0] sm:$0xff] }
  0xfa   :  { %v428_v47 = vpop.f32.mrf.mxu1  ;;  %v3233_v41 = vld [vmem:[%s5325_s29 + $0xc8] sm:$0xff]  ;;  %690 = vmatpush.msrb.mxu2 %v3228_v39 }
  0xfb   :  { %v429_v51 = vadd.f32 %v428_v47, %v406_v45  ;;  %710 = vmatpush.msrb.mxu3 %v3233_v41  ;;  %v3244_v47 = vld [vmem:[%s5325_s29 + $0x40] sm:$0xff] }
  0xfc   :  { %691 = vmatpush.msrb.mxu2 %v3244_v47 }
  0xfd   :  { %711 = vmatpush.msrb.mxu3 %v3249_v49 }
  0xfe   :  { %v451_v53 = vpop.f32.mrf.mxu2 }
  0xff   :  { %v452_v56 = vadd.f32 %v451_v53, %v429_v51 }
 0x100   :  { %v408_v57 = vpop.f32.mrf.mxu0  ;;  %v474_v58 = vpop.f32.mrf.mxu3 }
 0x101   :  { %v409_v59 = vadd.f32 %v408_v57, %v386_v55  ;;  %v475_v60 = vadd.f32 %v474_v58, %v452_v56  ;;  %v3258_v57 = vld [vmem:[%s5325_s29 + $0x38] sm:$0xff] }
 0x102   :  { %v431_v61 = vpop.f32.mrf.mxu1  ;;  %v3263_v58 = vld [vmem:[%s5325_s29 + $0xb8] sm:$0xff]  ;;  %692 = vmatpush.msrb.mxu2 %v3258_v57 }
 0x103   :  { %740 = vmatmul.f32.vlgmr.msra.gmra.mxu0 %v475_v60  ;;  %760 = vmatmul.f32.vlgmr.msra.gmra.mxu1 %v475_v60  ;;  %482 = vst [vmem:[%s5323_s24] sm:$0xff] %v475_v60  ;;  %v432_v62 = vadd.f32 %v431_v61, %v409_v59  ;;  %v3270_v61 = vld [vmem:[%s5325_s29 + $0x30] sm:$0xff] }
 0x104   :  { %712 = vmatpush.msrb.mxu3 %v3263_v58  ;;  %693 = vmatpush.msrb.mxu2 %v3270_v61 }
 0x106   :  { %v454_v63 = vpop.f32.mrf.mxu2 }
 0x107   :  { %v455_v0 = vadd.f32 %v454_v63, %v432_v62  ;;  %v3275_v62 = vld [vmem:[%s5325_s29 + $0xb0] sm:$0xff] }
 0x108   :  { %v477_v2 = vpop.f32.mrf.mxu3  ;;  %713 = vmatpush.msrb.mxu3 %v3275_v62 }
 0x109   :  { %v478_v3 = vadd.f32 %v477_v2, %v455_v0  ;;  %v3282_v2 = vld [vmem:[%s5325_s29 + $0x28] sm:$0xff] }
 0x10a   :  { %694 = vmatpush.msrb.mxu2 %v3282_v2 }
 0x10b   :  { %483 = vst [vmem:[%s5323_s24 + $0x8] sm:$0xf] %v478_v3  ;;  %v3287_v3 = vld [vmem:[%s5325_s29 + $0xa8] sm:$0xff] }
 0x10c   :  { %714 = vmatpush.msrb.mxu3 %v3287_v3  ;;  %695 = vmatpush.msrb.mxu2 %v3294_v14 }
 0x10e   :  { %696 = vmatpush.msrb.mxu2 %v3306_v32 }
 0x156   :  { %v574_v20 = vpop.f32.mrf.mxu0  ;;  %v594_v24 = vpop.f32.mrf.mxu1 }
 0x157   :  { %v575_v28 = vadd.f32 %v574_v20, %v553_v11  ;;  %v595_v30 = vadd.f32 %v594_v24, %v554_v16  ;;  %v3299_v20 = vld [vmem:[%s5325_s29 + $0xa0] sm:$0xff] }
 0x158   :  { %715 = vmatpush.msrb.mxu3 %v3299_v20 }
 0x159   :  { %v598_v22 = vsel %vm597_vm0, %v575_v28, 0.0  ;;  %v605_v36 = vsel %vm597_vm0, %v595_v30, 0.0 }
 0x15a   :  { %v599_v40 = vrot.slane %v598_v22, 4  ;;  %v606_v26 = vrot.slane %v605_v36, 4 }
 0x15c   :  { %v600_v42 = vadd.f32 %v599_v40, %v598_v22  ;;  %v607_v44 = vadd.f32 %v606_v26, %v605_v36  ;;  %v3318_v40 = vld [vmem:[%s5325_s29 + $0x10] sm:$0xff] }
 0x15d   :  { %v3323_v26 = vld [vmem:[%s5325_s29 + $0x90] sm:$0xff]  ;;  %697 = vmatpush.msrb.mxu2 %v3318_v40 }
 0x15e   :  { %v601_v34 = vrot.slane %v600_v42, 2  ;;  %v608_v38 = vrot.slane %v607_v44, 2 }
 0x160   :  { %v602_v1 = vadd.f32 %v601_v34, %v600_v42  ;;  %v609_v4 = vadd.f32 %v608_v38, %v607_v44  ;;  %v3332_v44 = vld [vmem:[%s5325_s29 + $0x8] sm:$0xff] }
 0x161   :  { %v3337_v34 = vld [vmem:[%s5325_s29 + $0x88] sm:$0xff]  ;;  %698 = vmatpush.msrb.mxu2 %v3332_v44 }
 0x162   :  { %v603_v9 = vrot.slane %v602_v1, 1  ;;  %v610_v12 = vrot.slane %v609_v4, 1 }
 0x164   :  { %v604_v19 = vadd.f32 %v603_v9, %v602_v1  ;;  %v611_v21 = vadd.f32 %v610_v12, %v609_v4  ;;  %v3346_v1 = vld [vmem:[%s5325_s29] sm:$0xff] }
 0x165   :  { %v3351_v4 = vld [vmem:[%s5325_s29 + $0x80] sm:$0xff]  ;;  %699 = vmatpush.msrb.mxu2 %v3346_v1 }
 0x166   :  { %v619_v27 = vmul.f32 %v3181_v13, %v604_v19  ;;  %v620_v29 = vmul.f32 %v3181_v13, %v611_v21 }
 0x167   :  { %830 = vmatpush.msra.mxu2 %v3148_v48 }
 0x168   :  { %v3219_v35 = vsub.f32 %v575_v28, %v619_v27  ;;  %v3221_v37 = vsub.f32 %v595_v30, %v620_v29  ;;  %v3311_v30 = vld [vmem:[%s5325_s29 + $0x98] sm:$0xff]  ;;  %s5328_s29 = sld [smem:[#allocation56_spill]] }
 0x169   :  { %716 = vmatpush.msrb.mxu3 %v3311_v30  ;;  %831 = vmatpush.msra.mxu2 %v3160_v50 }
 0x16a   :  { %v623_v43 = vmul.f32 %v3219_v35, %v3219_v35  ;;  %v624_v45 = vmul.f32 %v3221_v37, %v3221_v37 }
 0x16b   :  { %717 = vmatpush.msrb.mxu3 %v3323_v26  ;;  %832 = vmatpush.msra.mxu2 %v3172_v5 }
 0x16c   :  { %v625_v51 = vsel %vm597_vm0, %v623_v43, 0.0  ;;  %v632_v53 = vsel %vm597_vm0, %v624_v45, 0.0 }
 0x16d   :  { %v626_v55 = vrot.slane %v625_v51, 4  ;;  %v633_v56 = vrot.slane %v632_v53, 4  ;;  %718 = vmatpush.msrb.mxu3 %v3337_v34  ;;  %833 = vmatpush.msra.mxu2 %v3186_v15 }
 0x16f   :  { %v627_v59 = vadd.f32 %v626_v55, %v625_v51  ;;  %v634_v60 = vadd.f32 %v633_v56, %v632_v53  ;;  %719 = vmatpush.msrb.mxu3 %v3351_v4  ;;  %834 = vmatpush.msra.mxu2 %v3198_v23  ;;  %v3386_v23 = vld [vmem:[%s5327_s2] sm:$0x3] }
 0x171   :  { %v628_v63 = vrot.slane %v627_v59, 2  ;;  %v635_v0 = vrot.slane %v634_v60, 2  ;;  %850 = vmatpush.msra.mxu3 %v3153_v46  ;;  %835 = vmatpush.msra.mxu2 %v3212_v31 }
 0x173   :  { %v629_v6 = vadd.f32 %v628_v63, %v627_v59  ;;  %v636_v7 = vadd.f32 %v635_v0, %v634_v60  ;;  %851 = vmatpush.msra.mxu3 %v3165_v52  ;;  %836 = vmatpush.msra.mxu2 %v3228_v39  ;;  %v666_v59 = vperm.slane %v3386_v23, 0 }
 0x175   :  { %v630_v24 = vrot.slane %v629_v6, 1  ;;  %v637_v28 = vrot.slane %v636_v7, 1  ;;  %852 = vmatpush.msra.mxu3 %v3177_v8  ;;  %837 = vmatpush.msra.mxu2 %v3244_v47 }
 0x177   :  { %v631_v22 = vadd.f32 %v630_v24, %v629_v6  ;;  %v638_v36 = vadd.f32 %v637_v28, %v636_v7  ;;  %853 = vmatpush.msra.mxu3 %v3191_v17  ;;  %838 = vmatpush.msra.mxu2 %v3258_v57 }
 0x179   :  { %v639_v18 = vmul.f32 %v631_v22, %v3181_v13  ;;  %v640_v42 = vmul.f32 %v638_v36, %v3181_v13  ;;  %854 = vmatpush.msra.mxu3 %v3203_v25  ;;  %839 = vmatpush.msra.mxu2 %v3270_v61 }
 0x17b   :  { %v641_v38 = vadd.f32 1e-05, %v639_v18  ;;  %v3341_v54 = vadd.f32 1e-05, %v640_v42  ;;  %855 = vmatpush.msra.mxu3 %v3217_v33  ;;  %840 = vmatpush.msra.mxu2 %v3282_v2 }
 0x17d   :  { %2065 = vrsqrt.f32 %v641_v38  ;;  %856 = vmatpush.msra.mxu3 %v3233_v41  ;;  %vm649_vm4 = vweird.f32 %v641_v38  ;;  %v3393_v41 = vld [vmem:[%s5207_s9] sm:$0x3]  ;;  %vm659_vm6 = vweird.f32 %v3341_v54  ;;  %841 = vmatpush.msra.mxu2 %v3294_v14 }
 0x17e   :  { %2067 = vrsqrt.f32 %v3341_v54  ;;  %v673_v24 = vperm.slane %v3393_v41, 0  ;;  %v674_v22 = vperm.slane %v3393_v41, 1  ;;  %v873_v41 = vld [vmem:[%s5208_s12 + $0x18] sm:$0xff] }
 0x17f   :  { %857 = vmatpush.msra.mxu3 %v3249_v49  ;;  %v667_v49 = vperm.slane %v3386_v23, 1  ;;  %842 = vmatpush.msra.mxu2 %v3306_v32  ;;  %v872_v23 = vld [vmem:[%s5208_s12 + $0x10] sm:$0xff] }
 0x180   :  { %v741_v9 = vpop.f32.mrf.mxu0  ;;  %v761_v12 = vpop.f32.mrf.mxu1 }
 0x181   :  { %v3362_v19 = vadd.f32 %v741_v9, %v553_v11  ;;  %v3366_v21 = vadd.f32 %v761_v12, %v554_v16  ;;  %858 = vmatpush.msra.mxu3 %v3263_v58  ;;  %843 = vmatpush.msra.mxu2 %v3318_v40  ;;  %v3444_v40 = vld [vmem:[%s5208_s12 + $0xf0] sm:$0xff] }
 0x182   :  { %943 = vmatpush.msrb.mxu0 %v3444_v40 }
 0x183   :  { %v2066_v48 = vpop.eup %2065  ;;  %v764_v46 = vsel %vm597_vm0, %v3362_v19, 0.0  ;;  %v771_v50 = vsel %vm597_vm0, %v3366_v21, 0.0  ;;  %859 = vmatpush.msra.mxu3 %v3275_v62  ;;  %844 = vmatpush.msra.mxu2 %v3332_v44  ;;  %v3449_v44 = vld [vmem:[%s5208_s12 + $0xf8] sm:$0xff] }
 0x184   :  { %v2068_v11 = vpop.eup %2067  ;;  %v644_v52 = vmul.f32 %v2066_v48, %v641_v38  ;;  %v765_v10 = vrot.slane %v764_v46, 4  ;;  %v772_v16 = vrot.slane %v771_v50, 4  ;;  %vm650_vm2 = vweird.f32 %v2066_v48  ;;  %963 = vmatpush.msrb.mxu1 %v3449_v44 }
 0x185   :  { %v654_v27 = vmul.f32 %v2068_v11, %v3341_v54  ;;  %vm660_vm3 = vweird.f32 %v2068_v11  ;;  %vm651_vm5 = vmor %vm649_vm4, %vm650_vm2  ;;  %860 = vmatpush.msra.mxu3 %v3287_v3  ;;  %845 = vmatpush.msra.mxu2 %v3346_v1 }
 0x186   :  { %v645_v5 = vmul.f32 %v2066_v48, %v644_v52  ;;  %v766_v8 = vadd.f32 %v765_v10, %v764_v46  ;;  %v773_v29 = vadd.f32 %v772_v16, %v771_v50  ;;  %vm661_vm7 = vmor %vm659_vm6, %vm660_vm3  ;;  %v3463_v52 = vld [vmem:[%s5208_s12 + $0xe8] sm:$0xff]  ;;  %v3468_v10 = vld [vmem:[%s5208_s12 + $0xd0] sm:$0xff] }
 0x187   :  { %v655_v43 = vmul.f32 %v2068_v11, %v654_v27  ;;  %861 = vmatpush.msra.mxu3 %v3299_v20  ;;  %v3473_v16 = vld [vmem:[%s5208_s12 + $0xd8] sm:$0xff]  ;;  %964 = vmatpush.msrb.mxu1 %v3463_v52 }
 0x188   :  { %v646_v15 = vmul.f32 0.5, %v645_v5  ;;  %v767_v17 = vrot.slane %v766_v8, 2  ;;  %v774_v45 = vrot.slane %v773_v29, 2 }
 0x189   :  { %v656_v51 = vmul.f32 0.5, %v655_v43  ;;  %862 = vmatpush.msra.mxu3 %v3311_v30  ;;  %965 = vmatpush.msrb.mxu1 %v3473_v16  ;;  %v3492_v43 = vld [vmem:[%s5208_s12 + $0xb0] sm:$0xff] }
 0x18a   :  { %v647_v25 = vsub.f32 1.5, %v646_v15  ;;  %v768_v53 = vadd.f32 %v767_v17, %v766_v8  ;;  %v775_v55 = vadd.f32 %v774_v45, %v773_v29  ;;  %v3480_v8 = vld [vmem:[%s5208_s12 + $0xc0] sm:$0xff]  ;;  %v3485_v29 = vld [vmem:[%s5208_s12 + $0xc8] sm:$0xff]  ;;  %v3497_v15 = vld [vmem:[%s5208_s12 + $0xb8] sm:$0xff] }
 0x18b   :  { %v657_v31 = vsub.f32 1.5, %v656_v51  ;;  %863 = vmatpush.msra.mxu3 %v3323_v26  ;;  %966 = vmatpush.msrb.mxu1 %v3485_v29  ;;  %v3504_v17 = vld [vmem:[%s5208_s12 + $0xa0] sm:$0xff]  ;;  %v3509_v45 = vld [vmem:[%s5208_s12 + $0xa8] sm:$0xff]  ;;  %v3516_v51 = vld [vmem:[%s5208_s12 + $0x90] sm:$0xff] }
 0x18c   :  { %v648_v33 = vmul.f32 %v2066_v48, %v647_v25  ;;  %v769_v39 = vrot.slane %v768_v53, 1  ;;  %v776_v56 = vrot.slane %v775_v55, 1  ;;  %v3521_v25 = vld [vmem:[%s5208_s12 + $0x98] sm:$0xff] }
 0x18d   :  { %v658_v60 = vmul.f32 %v2068_v11, %v657_v31  ;;  %864 = vmatpush.msra.mxu3 %v3337_v34  ;;  %v3454_v34 = vld [vmem:[%s5208_s12 + $0xe0] sm:$0xff]  ;;  %967 = vmatpush.msrb.mxu1 %v3497_v15 }
 0x18e   :  { %v652_v47 = vsel %vm651_vm5, %v2066_v48, %v648_v33  ;;  %v770_v63 = vadd.f32 %v769_v39, %v768_v53  ;;  %v777_v0 = vadd.f32 %v776_v56, %v775_v55  ;;  %944 = vmatpush.msrb.mxu0 %v3454_v34  ;;  %v3528_v33 = vld [vmem:[%s5208_s12 + $0x80] sm:$0xff]  ;;  %v3533_v39 = vld [vmem:[%s5208_s12 + $0x88] sm:$0xff] }
 0x18f   :  { %v663_v6 = vmul.f32 %v652_v47, %v3219_v35  ;;  %v662_v7 = vsel %vm661_vm7, %v2068_v11, %v658_v60  ;;  %865 = vmatpush.msra.mxu3 %v3351_v4  ;;  %968 = vmatpush.msrb.mxu1 %v3509_v45  ;;  %v3540_v47 = vld [vmem:[%s5208_s12 + $0x70] sm:$0xff] }
 0x190   :  { %v664_v57 = vmul.f32 %v662_v7, %v3221_v37  ;;  %v778_v58 = vmul.f32 %v770_v63, %v3181_v13  ;;  %v779_v28 = vmul.f32 %v777_v0, %v3181_v13  ;;  %945 = vmatpush.msrb.mxu0 %v3468_v10  ;;  %v3545_v63 = vld [vmem:[%s5208_s12 + $0x78] sm:$0xff]  ;;  %v3552_v7 = vld [vmem:[%s5208_s12 + $0x60] sm:$0xff] }
 0x191   :  { %v670_v36 = vmul.f32 %v666_v59, %v663_v6  ;;  %969 = vmatpush.msrb.mxu1 %v3521_v25 }
 0x192   :  { %v671_v35 = vmul.f32 %v667_v49, %v664_v57  ;;  %v3416_v61 = vsub.f32 %v3362_v19, %v778_v58  ;;  %v3419_v37 = vsub.f32 %v3366_v21, %v779_v28  ;;  %946 = vmatpush.msrb.mxu0 %v3480_v8  ;;  %v3557_v57 = vld [vmem:[%s5208_s12 + $0x68] sm:$0xff] }
 0x193   :  { %v677_v62 = vadd.f32 %v673_v24, %v670_v36  ;;  %970 = vmatpush.msrb.mxu1 %v3533_v39  ;;  %v3564_v36 = vld [vmem:[%s5208_s12 + $0x50] sm:$0xff] }
 0x194   :  { %v782_v2 = vmul.f32 %v3416_v61, %v3416_v61  ;;  %v783_v3 = vmul.f32 %v3419_v37, %v3419_v37  ;;  %v678_v18 = vadd.f32 %v674_v22, %v671_v35  ;;  %947 = vmatpush.msrb.mxu0 %v3492_v43  ;;  %v3569_v35 = vld [vmem:[%s5208_s12 + $0x58] sm:$0xff] }
 0x195   :  { %v679_v42 = vmax.f32 %v677_v62, 0.0  ;;  %971 = vmatpush.msrb.mxu1 %v3545_v63 }
 0x196   :  { %v784_v38 = vsel %vm597_vm0, %v782_v2, 0.0  ;;  %v791_v14 = vsel %vm597_vm0, %v783_v3, 0.0  ;;  %v680_v54 = vmax.f32 %v678_v18, 0.0  ;;  %948 = vmatpush.msrb.mxu0 %v3504_v17  ;;  %v878_v3 = vld [vmem:[%s5208_s12 + $0x40] sm:$0xff]  ;;  %v879_v18 = vld [vmem:[%s5208_s12 + $0x48] sm:$0xff] }
 0x197   :  { %v785_v20 = vrot.slane %v784_v38, 4  ;;  %v792_v9 = vrot.slane %v791_v14, 4  ;;  %700 = vmatmul.f32.vlgmr.msrb.gmra.mxu2 %v679_v42  ;;  %972 = vmatpush.msrb.mxu1 %v3557_v57 }
 0x198   :  { %720 = vmatmul.f32.vlgmr.msrb.gmra.mxu3 %v680_v54  ;;  %949 = vmatpush.msrb.mxu0 %v3516_v51  ;;  %v877_v54 = vld [vmem:[%s5208_s12 + $0x38] sm:$0xff] }
 0x199   :  { %v786_v12 = vadd.f32 %v785_v20, %v784_v38  ;;  %v793_v19 = vadd.f32 %v792_v9, %v791_v14  ;;  %973 = vmatpush.msrb.mxu1 %v3569_v35  ;;  %v876_v14 = vld [vmem:[%s5208_s12 + $0x30] sm:$0xff] }
 0x19a   :  { %950 = vmatpush.msrb.mxu0 %v3528_v33 }
 0x19b   :  { %v787_v32 = vrot.slane %v786_v12, 2  ;;  %v794_v30 = vrot.slane %v793_v19, 2  ;;  %974 = vmatpush.msrb.mxu1 %v879_v18 }
 0x19c   :  { %951 = vmatpush.msrb.mxu0 %v3540_v47 }
 0x19d   :  { %v788_v21 = vadd.f32 %v787_v32, %v786_v12  ;;  %v795_v48 = vadd.f32 %v794_v30, %v793_v19  ;;  %975 = vmatpush.msrb.mxu1 %v877_v54 }
 0x19e   :  { %952 = vmatpush.msrb.mxu0 %v3552_v7 }
 0x19f   :  { %v789_v46 = vrot.slane %v788_v21, 1  ;;  %v796_v50 = vrot.slane %v795_v48, 1 }
 0x1a0   :  { %953 = vmatpush.msrb.mxu0 %v3564_v36 }
 0x1a1   :  { %v790_v26 = vadd.f32 %v789_v46, %v788_v21  ;;  %v797_v11 = vadd.f32 %v796_v50, %v795_v48 }
 0x1a2   :  { %954 = vmatpush.msrb.mxu0 %v878_v3 }
 0x1a3   :  { %v798_v1 = vmul.f32 %v790_v26, %v3181_v13  ;;  %v799_v4 = vmul.f32 %v797_v11, %v3181_v13 }
 0x1a4   :  { %955 = vmatpush.msrb.mxu0 %v876_v14 }
 0x1a5   :  { %v800_v27 = vadd.f32 1e-05, %v798_v1  ;;  %v801_v5 = vadd.f32 1e-05, %v799_v4  ;;  %v3643_v4 = vld [vmem:[%s5209_s16 + $0x78] sm:$0xff] }
 0x1a6   :  { %1062 = vmatpush.msrb.mxu2 %v3643_v4 }
 0x1a7   :  { %2069 = vrsqrt.f32 %v800_v27  ;;  %vm808_vm10 = vweird.f32 %v800_v27  ;;  %vm818_vm12 = vweird.f32 %v801_v5 }
 0x1a8   :  { %2071 = vrsqrt.f32 %v801_v5 }
 0x1ad   :  { %v2070_v53 = vpop.eup %2069 }
 0x1ae   :  { %v2072_v55 = vpop.eup %2071  ;;  %v803_v31 = vmul.f32 %v2070_v53, %v800_v27  ;;  %vm809_vm8 = vweird.f32 %v2070_v53  ;;  %v3666_v27 = vld [vmem:[%s5209_s16 + $0xf0] sm:$0xff] }
 0x1af   :  { %v813_v56 = vmul.f32 %v2072_v55, %v801_v5  ;;  %vm819_vm9 = vweird.f32 %v2072_v55  ;;  %vm810_vm11 = vmor %vm808_vm10, %vm809_vm8  ;;  %v3673_v5 = vld [vmem:[%s5209_s16 + $0x60] sm:$0xff] }
 0x1b0   :  { %v804_v60 = vmul.f32 %v2070_v53, %v803_v31  ;;  %vm820_vm13 = vmor %vm818_vm12, %vm819_vm9 }
 0x1b1   :  { %v814_v0 = vmul.f32 %v2072_v55, %v813_v56  ;;  %v3745_v56 = vld [vmem:[%s5209_s16 + $0xc0] sm:$0xff] }
 0x1b2   :  { %v805_v6 = vmul.f32 0.5, %v804_v60 }
 0x1b3   :  { %v815_v58 = vmul.f32 0.5, %v814_v0  ;;  %v3757_v0 = vld [vmem:[%s5209_s16 + $0xb8] sm:$0xff] }
 0x1b4   :  { %v806_v28 = vsub.f32 1.5, %v805_v6 }
 0x1b5   :  { %v816_v62 = vsub.f32 1.5, %v815_v58  ;;  %v3773_v58 = vld [vmem:[%s5209_s16 + $0xb0] sm:$0xff] }
 0x1b6   :  { %v807_v2 = vmul.f32 %v2070_v53, %v806_v28 }
 0x1b7   :  { %v817_v42 = vmul.f32 %v2072_v55, %v816_v62 }
 0x1b8   :  { %v811_v38 = vsel %vm810_vm11, %v2070_v53, %v807_v2  ;;  %v3726_v53 = vld [vmem:[%s5209_s16 + $0x40] sm:$0xff] }
 0x1b9   :  { %v822_v20 = vmul.f32 %v811_v38, %v3416_v61  ;;  %v821_v9 = vsel %vm820_vm13, %v2072_v55, %v817_v42  ;;  %v3731_v55 = vld [vmem:[%s5209_s16 + $0xc8] sm:$0xff]  ;;  %v3782_v2 = vld [vmem:[%s5209_s16 + $0x20] sm:$0xff]  ;;  %v3794_v38 = vld [vmem:[%s5209_s16 + $0x18] sm:$0xff] }
 0x1ba   :  { %v823_v12 = vmul.f32 %v821_v9, %v3419_v37  ;;  %v874_v37 = vld [vmem:[%s5208_s12 + $0x20] sm:$0xff]  ;;  %v3806_v9 = vld [vmem:[%s5209_s16 + $0x10] sm:$0xff] }
 0x1bb   :  { %v824_v19 = vmul.f32 %v822_v20, %v666_v59  ;;  %v875_v59 = vld [vmem:[%s5208_s12 + $0x28] sm:$0xff]  ;;  %956 = vmatpush.msrb.mxu0 %v874_v37 }
 0x1bc   :  { %v825_v32 = vmul.f32 %v823_v12, %v667_v49  ;;  %976 = vmatpush.msrb.mxu1 %v875_v59  ;;  %v870_v49 = vld [vmem:[%s5208_s12] sm:$0xff]  ;;  %v3811_v12 = vld [vmem:[%s5209_s16 + $0x98] sm:$0xff] }
 0x1bd   :  { %v826_v30 = vadd.f32 %v824_v19, %v673_v24  ;;  %v871_v24 = vld [vmem:[%s5208_s12 + $0x8] sm:$0xff]  ;;  %957 = vmatpush.msrb.mxu0 %v872_v23 }
 0x1be   :  { %v827_v21 = vadd.f32 %v825_v32, %v674_v22  ;;  %977 = vmatpush.msrb.mxu1 %v873_v41  ;;  %v2059_v22 = vld [vmem:[%s5328_s29] ss:$0 sm:$0xff] }
 0x1bf   :  { %v828_v61 = vmax.f32 %v826_v30, 0.0  ;;  %958 = vmatpush.msrb.mxu0 %v870_v49  ;;  %v3818_v30 = vld [vmem:[%s5209_s16 + $0x8] sm:$0xff] }
 0x1c0   :  { %v829_v48 = vmax.f32 %v827_v21, 0.0  ;;  %978 = vmatpush.msrb.mxu1 %v871_v24  ;;  %v3823_v21 = vld [vmem:[%s5209_s16 + $0x90] sm:$0xff] }
 0x1c1   :  { %846 = vmatmul.f32.vlgmr.msra.gmra.mxu2 %v828_v61  ;;  %1102 = vmatpush.msra.mxu0 %v3444_v40 }
 0x1c2   :  { %866 = vmatmul.f32.vlgmr.msra.gmra.mxu3 %v829_v48  ;;  %1122 = vmatpush.msra.mxu1 %v3449_v44 }
 0x1c3   :  { %1103 = vmatpush.msra.mxu0 %v3454_v34 }
 0x1c4   :  { %1123 = vmatpush.msra.mxu1 %v3463_v52  ;;  %v3649_v52 = vld [vmem:[%s5209_s16 + $0x70] sm:$0xff] }
 0x1c5   :  { %1104 = vmatpush.msra.mxu0 %v3468_v10  ;;  %v3654_v10 = vld [vmem:[%s5209_s16 + $0xf8] sm:$0xff]  ;;  %1063 = vmatpush.msrb.mxu2 %v3649_v52 }
 0x1c6   :  { %1124 = vmatpush.msra.mxu1 %v3473_v16  ;;  %1082 = vmatpush.msrb.mxu3 %v3654_v10  ;;  %v3661_v16 = vld [vmem:[%s5209_s16 + $0x68] sm:$0xff] }
 0x1c7   :  { %1105 = vmatpush.msra.mxu0 %v3480_v8  ;;  %1064 = vmatpush.msrb.mxu2 %v3661_v16  ;;  %v3678_v8 = vld [vmem:[%s5209_s16 + $0xe8] sm:$0xff] }
 0x1c8   :  { %1125 = vmatpush.msra.mxu1 %v3485_v29  ;;  %1083 = vmatpush.msrb.mxu3 %v3666_v27  ;;  %v3685_v29 = vld [vmem:[%s5209_s16 + $0x58] sm:$0xff] }
 0x1c9   :  { %1106 = vmatpush.msra.mxu0 %v3492_v43  ;;  %1065 = vmatpush.msrb.mxu2 %v3673_v5  ;;  %v3690_v43 = vld [vmem:[%s5209_s16 + $0xe0] sm:$0xff] }
 0x1ca   :  { %1126 = vmatpush.msra.mxu1 %v3497_v15  ;;  %1084 = vmatpush.msrb.mxu3 %v3678_v8  ;;  %v3697_v15 = vld [vmem:[%s5209_s16 + $0x50] sm:$0xff] }
 0x1cb   :  { %1107 = vmatpush.msra.mxu0 %v3504_v17  ;;  %1066 = vmatpush.msrb.mxu2 %v3685_v29  ;;  %v3702_v17 = vld [vmem:[%s5209_s16 + $0xd8] sm:$0xff] }
 0x1cc   :  { %1127 = vmatpush.msra.mxu1 %v3509_v45  ;;  %1085 = vmatpush.msrb.mxu3 %v3690_v43  ;;  %v3709_v45 = vld [vmem:[%s5210_s13] sm:$0x3] }
 0x1cd   :  { %1108 = vmatpush.msra.mxu0 %v3516_v51  ;;  %1067 = vmatpush.msrb.mxu2 %v3697_v15  ;;  %v3714_v51 = vld [vmem:[%s5209_s16 + $0x48] sm:$0xff]  ;;  %v939_v31 = vperm.slane %v3709_v45, 0 }
 0x1ce   :  { %1128 = vmatpush.msra.mxu1 %v3521_v25  ;;  %1086 = vmatpush.msrb.mxu3 %v3702_v17  ;;  %v3719_v25 = vld [vmem:[%s5209_s16 + $0xd0] sm:$0xff] }
 0x1cf   :  { %1109 = vmatpush.msra.mxu0 %v3528_v33  ;;  %1068 = vmatpush.msrb.mxu2 %v3714_v51  ;;  %v940_v33 = vperm.slane %v3709_v45, 1 }
 0x1d0   :  { %1129 = vmatpush.msra.mxu1 %v3533_v39  ;;  %1087 = vmatpush.msrb.mxu3 %v3719_v25  ;;  %v3740_v39 = vld [vmem:[%s5209_s16 + $0x38] sm:$0xff] }
 0x1d1   :  { %1110 = vmatpush.msra.mxu0 %v3540_v47  ;;  %1069 = vmatpush.msrb.mxu2 %v3726_v53 }
 0x1d2   :  { %1130 = vmatpush.msra.mxu1 %v3545_v63  ;;  %1088 = vmatpush.msrb.mxu3 %v3731_v55  ;;  %v3752_v63 = vld [vmem:[%s5209_s16 + $0x30] sm:$0xff] }
 0x1d3   :  { %1111 = vmatpush.msra.mxu0 %v3552_v7  ;;  %1070 = vmatpush.msrb.mxu2 %v3740_v39 }
 0x1d4   :  { %1131 = vmatpush.msra.mxu1 %v3557_v57  ;;  %1089 = vmatpush.msrb.mxu3 %v3745_v56  ;;  %v3768_v57 = vld [vmem:[%s5209_s16 + $0x28] sm:$0xff] }
 0x1d5   :  { %1112 = vmatpush.msra.mxu0 %v3564_v36  ;;  %1071 = vmatpush.msrb.mxu2 %v3752_v63 }
 0x1d6   :  { %1132 = vmatpush.msra.mxu1 %v3569_v35  ;;  %1090 = vmatpush.msrb.mxu3 %v3757_v0 }
 0x1d7   :  { %1113 = vmatpush.msra.mxu0 %v878_v3  ;;  %1072 = vmatpush.msrb.mxu2 %v3768_v57  ;;  %v3787_v3 = vld [vmem:[%s5209_s16 + $0xa8] sm:$0xff] }
 0x1d8   :  { %1133 = vmatpush.msra.mxu1 %v879_v18  ;;  %1091 = vmatpush.msrb.mxu3 %v3773_v58 }
 0x1d9   :  { %1114 = vmatpush.msra.mxu0 %v876_v14  ;;  %1073 = vmatpush.msrb.mxu2 %v3782_v2  ;;  %v3799_v14 = vld [vmem:[%s5209_s16 + $0xa0] sm:$0xff] }
 0x1da   :  { %1134 = vmatpush.msra.mxu1 %v877_v54  ;;  %1092 = vmatpush.msrb.mxu3 %v3787_v3 }
 0x1db   :  { %1115 = vmatpush.msra.mxu0 %v874_v37  ;;  %1074 = vmatpush.msrb.mxu2 %v3794_v38  ;;  %v3830_v37 = vld [vmem:[%s5209_s16] sm:$0xff] }
 0x1dc   :  { %1135 = vmatpush.msra.mxu1 %v875_v59  ;;  %1093 = vmatpush.msrb.mxu3 %v3799_v14  ;;  %v3835_v59 = vld [vmem:[%s5209_s16 + $0x88] sm:$0xff] }
 0x1dd   :  { %1116 = vmatpush.msra.mxu0 %v872_v23  ;;  %1075 = vmatpush.msrb.mxu2 %v3806_v9 }
 0x1de   :  { %1136 = vmatpush.msra.mxu1 %v873_v41  ;;  %1094 = vmatpush.msrb.mxu3 %v3811_v12 }
 0x1df   :  { %1117 = vmatpush.msra.mxu0 %v870_v49  ;;  %1076 = vmatpush.msrb.mxu2 %v3818_v30  ;;  %v3843_v49 = vld [vmem:[%s5209_s16 + $0x80] sm:$0xff] }
 0x1e0   :  { %1137 = vmatpush.msra.mxu1 %v871_v24  ;;  %1095 = vmatpush.msrb.mxu3 %v3823_v21 }
 0x1e1   :  { %1077 = vmatpush.msrb.mxu2 %v3830_v37 }
 0x1e2   :  { %1096 = vmatpush.msrb.mxu3 %v3835_v59 }
 0x1e3   :  { %1208 = vmatpush.msra.mxu2 %v3643_v4 }
 0x1e4   :  { %1097 = vmatpush.msrb.mxu3 %v3843_v49 }
 0x1e5   :  { %1209 = vmatpush.msra.mxu2 %v3649_v52 }
 0x1e6   :  { %1228 = vmatpush.msra.mxu3 %v3654_v10 }
 0x1e7   :  { %1210 = vmatpush.msra.mxu2 %v3661_v16 }
 0x1e8   :  { %1229 = vmatpush.msra.mxu3 %v3666_v27 }
 0x1e9   :  { %1211 = vmatpush.msra.mxu2 %v3673_v5 }
 0x1ea   :  { %1230 = vmatpush.msra.mxu3 %v3678_v8 }
 0x1eb   :  { %1212 = vmatpush.msra.mxu2 %v3685_v29 }
 0x1ec   :  { %1231 = vmatpush.msra.mxu3 %v3690_v43  ;;  %v3877_v43 = vld [vmem:[%s5211_s4 + $0x78] sm:$0xff] }
 0x1ed   :  { %1213 = vmatpush.msra.mxu2 %v3697_v15 }
 0x1ee   :  { %1232 = vmatpush.msra.mxu3 %v3702_v17 }
 0x1ef   :  { %1214 = vmatpush.msra.mxu2 %v3714_v51  ;;  %v3885_v51 = vld [vmem:[%s5211_s4 + $0x70] sm:$0xff] }
 0x1f0   :  { %1233 = vmatpush.msra.mxu3 %v3719_v25  ;;  %v3890_v25 = vld [vmem:[%s5211_s4 + $0xf8] sm:$0xff] }
 0x1f1   :  { %1215 = vmatpush.msra.mxu2 %v3726_v53 }
 0x1f2   :  { %1234 = vmatpush.msra.mxu3 %v3731_v55 }
 0x1f3   :  { %1216 = vmatpush.msra.mxu2 %v3740_v39  ;;  %v3901_v39 = vld [vmem:[%s5211_s4 + $0x68] sm:$0xff] }
 0x1f4   :  { %1235 = vmatpush.msra.mxu3 %v3745_v56  ;;  %v3906_v56 = vld [vmem:[%s5211_s4 + $0xf0] sm:$0xff] }
 0x1f5   :  { %1217 = vmatpush.msra.mxu2 %v3752_v63  ;;  %v3919_v63 = vld [vmem:[%s5211_s4 + $0x60] sm:$0xff] }
 0x1f6   :  { %1236 = vmatpush.msra.mxu3 %v3757_v0  ;;  %v3924_v0 = vld [vmem:[%s5211_s4 + $0xe8] sm:$0xff] }
 0x1f7   :  { %1218 = vmatpush.msra.mxu2 %v3768_v57  ;;  %v3949_v57 = vld [vmem:[%s5211_s4 + $0x50] sm:$0xff] }
 0x1f8   :  { %1237 = vmatpush.msra.mxu3 %v3773_v58  ;;  %v3954_v58 = vld [vmem:[%s5211_s4 + $0xd8] sm:$0xff] }
 0x1f9   :  { %1219 = vmatpush.msra.mxu2 %v3782_v2  ;;  %v3971_v2 = vld [vmem:[%s5211_s4 + $0x48] sm:$0xff] }
 0x1fa   :  { %1238 = vmatpush.msra.mxu3 %v3787_v3  ;;  %v3976_v3 = vld [vmem:[%s5211_s4 + $0xd0] sm:$0xff] }
 0x1fb   :  { %1220 = vmatpush.msra.mxu2 %v3794_v38 }
 0x1fc   :  { %1239 = vmatpush.msra.mxu3 %v3799_v14 }
 0x1fd   :  { %1221 = vmatpush.msra.mxu2 %v3806_v9 }
 0x1fe   :  { %1240 = vmatpush.msra.mxu3 %v3811_v12  ;;  %v4010_v12 = vld [vmem:[%s5211_s4 + $0x38] sm:$0xff] }
 0x1ff   :  { %1222 = vmatpush.msra.mxu2 %v3818_v30 }
 0x200   :  { %1241 = vmatpush.msra.mxu3 %v3823_v21 }
 0x201   :  { %1223 = vmatpush.msra.mxu2 %v3830_v37  ;;  %v4029_v37 = vld [vmem:[%s5211_s4 + $0xb8] sm:$0xff] }
 0x202   :  { %1242 = vmatpush.msra.mxu3 %v3835_v59 }
 0x204   :  { %1243 = vmatpush.msra.mxu3 %v3843_v49 }
 0x21a   :  { %v701_v46 = vpop.f32.mrf.mxu2 }
 0x21b   :  { %v702_v50 = vadd.f32 %v2059_v22, %v701_v46  ;;  %v721_v26 = vpop.f32.mrf.mxu3 }
 0x21d   :  { %v722_v11 = vadd.f32 %v721_v26, %v702_v50 }
 0x21f   :  { %959 = vmatmul.f32.vlgmr.msrb.gmra.mxu0 %v722_v11  ;;  %979 = vmatmul.f32.vlgmr.msrb.gmra.mxu1 %v722_v11 }
 0x220   :  { %1348 = vmatpush.msrb.mxu0 %v3877_v43  ;;  %1368 = vmatpush.msrb.mxu1 %v3890_v25 }
 0x222   :  { %1349 = vmatpush.msrb.mxu0 %v3885_v51  ;;  %1369 = vmatpush.msrb.mxu1 %v3906_v56 }
 0x224   :  { %1350 = vmatpush.msrb.mxu0 %v3901_v39  ;;  %1370 = vmatpush.msrb.mxu1 %v3924_v0 }
 0x226   :  { %1351 = vmatpush.msrb.mxu0 %v3919_v63 }
 0x244   :  { %v847_v40 = vpop.f32.mrf.mxu2 }
 0x245   :  { %v848_v44 = vadd.f32 %v2059_v22, %v847_v40  ;;  %v867_v34 = vpop.f32.mrf.mxu3 }
 0x247   :  { %v868_v1 = vadd.f32 %v867_v34, %v848_v44 }
 0x249   :  { %1118 = vmatmul.f32.vlgmr.msra.gmra.mxu0 %v868_v1  ;;  %1138 = vmatmul.f32.vlgmr.msra.gmra.mxu1 %v868_v1 }
 0x29c   :  { %v960_v60 = vpop.f32.mrf.mxu0  ;;  %v980_v47 = vpop.f32.mrf.mxu1 }
 0x29d   :  { %v961_v6 = vadd.f32 %v960_v60, %v939_v31  ;;  %v981_v7 = vadd.f32 %v980_v47, %v940_v33 }
 0x29f   :  { %v983_v28 = vsel %vm597_vm0, %v961_v6, 0.0  ;;  %v990_v36 = vsel %vm597_vm0, %v981_v7, 0.0 }
 0x2a0   :  { %v984_v35 = vrot.slane %v983_v28, 4  ;;  %v991_v62 = vrot.slane %v990_v36, 4 }
 0x2a2   :  { %v985_v18 = vadd.f32 %v984_v35, %v983_v28  ;;  %v992_v42 = vadd.f32 %v991_v62, %v990_v36 }
 0x2a4   :  { %v986_v54 = vrot.slane %v985_v18, 2  ;;  %v993_v20 = vrot.slane %v992_v42, 2 }
 0x2a6   :  { %v987_v19 = vadd.f32 %v986_v54, %v985_v18  ;;  %v994_v32 = vadd.f32 %v993_v20, %v992_v42  ;;  %v3991_v18 = vld [vmem:[%s5211_s4 + $0x40] sm:$0xff]  ;;  %v3996_v42 = vld [vmem:[%s5211_s4 + $0xc8] sm:$0xff] }
 0x2a8   :  { %v988_v61 = vrot.slane %v987_v19, 1  ;;  %v995_v48 = vrot.slane %v994_v32, 1 }
 0x2aa   :  { %v989_v23 = vadd.f32 %v988_v61, %v987_v19  ;;  %v996_v41 = vadd.f32 %v995_v48, %v994_v32  ;;  %v4015_v19 = vld [vmem:[%s5211_s4 + $0xc0] sm:$0xff]  ;;  %v4024_v48 = vld [vmem:[%s5211_s4 + $0x30] sm:$0xff] }
 0x2ac   :  { %v997_v24 = vmul.f32 %v989_v23, %v3181_v13  ;;  %v998_v22 = vmul.f32 %v996_v41, %v3181_v13 }
 0x2ae   :  { %v3850_v46 = vsub.f32 %v961_v6, %v997_v24  ;;  %v3852_v50 = vsub.f32 %v981_v7, %v998_v22  ;;  %v3934_v6 = vld [vmem:[%s5211_s4 + $0x58] sm:$0xff]  ;;  %v3939_v7 = vld [vmem:[%s5211_s4 + $0xe0] sm:$0xff]  ;;  %v4036_v24 = vld [vmem:[%s5211_s4 + $0x28] sm:$0xff] }
 0x2af   :  { %1352 = vmatpush.msrb.mxu0 %v3934_v6  ;;  %1371 = vmatpush.msrb.mxu1 %v3939_v7  ;;  %5329 = vst [vmem:[#allocation4_spill] sm:$0xff] %v4036_v24  ;;  %v4041_v22 = vld [vmem:[%s5211_s4 + $0xb0] sm:$0xff] }
 0x2b0   :  { %v1001_v26 = vmul.f32 %v3850_v46, %v3850_v46  ;;  %v1002_v11 = vmul.f32 %v3852_v50, %v3852_v50 }
 0x2b1   :  { %1353 = vmatpush.msrb.mxu0 %v3949_v57  ;;  %1372 = vmatpush.msrb.mxu1 %v3954_v58 }
 0x2b2   :  { %v1003_v40 = vsel %vm597_vm0, %v1001_v26, 0.0  ;;  %v1010_v44 = vsel %vm597_vm0, %v1002_v11, 0.0  ;;  %v4046_v26 = vld [vmem:[%s5213_s14] sm:$0x3] }
 0x2b3   :  { %v1004_v34 = vrot.slane %v1003_v40, 4  ;;  %v1011_v1 = vrot.slane %v1010_v44, 4  ;;  %1354 = vmatpush.msrb.mxu0 %v3971_v2  ;;  %1373 = vmatpush.msrb.mxu1 %v3976_v3 }
 0x2b5   :  { %v1005_v4 = vadd.f32 %v1004_v34, %v1003_v40  ;;  %v1012_v52 = vadd.f32 %v1011_v1, %v1010_v44  ;;  %1355 = vmatpush.msrb.mxu0 %v3991_v18  ;;  %1374 = vmatpush.msrb.mxu1 %v3996_v42  ;;  %v4055_v1 = vld [vmem:[%s5211_s4 + $0x20] sm:$0xff] }
 0x2b6   :  { %5330 = vst [vmem:[#allocation3_spill] sm:$0xff] %v4055_v1 }
 0x2b7   :  { %v1006_v10 = vrot.slane %v1005_v4, 2  ;;  %v1013_v16 = vrot.slane %v1012_v52, 2  ;;  %1356 = vmatpush.msrb.mxu0 %v4010_v12  ;;  %1375 = vmatpush.msrb.mxu1 %v4015_v19 }
 0x2b9   :  { %v1007_v27 = vadd.f32 %v1006_v10, %v1005_v4  ;;  %v1014_v5 = vadd.f32 %v1013_v16, %v1012_v52  ;;  %1357 = vmatpush.msrb.mxu0 %v4024_v48  ;;  %1376 = vmatpush.msrb.mxu1 %v4029_v37  ;;  %v4060_v4 = vld [vmem:[%s5211_s4 + $0xa8] sm:$0xff] }
 0x2ba   :  { %5331 = vst [vmem:[#allocation6_spill] sm:$0xff] %v4060_v4 }
 0x2bb   :  { %v1008_v8 = vrot.slane %v1007_v27, 1  ;;  %v1015_v29 = vrot.slane %v1014_v5, 1  ;;  %1358 = vmatpush.msrb.mxu0 %v4036_v24  ;;  %1377 = vmatpush.msrb.mxu1 %v4041_v22 }
 0x2bd   :  { %v1009_v15 = vadd.f32 %v1008_v8, %v1007_v27  ;;  %v1016_v17 = vadd.f32 %v1015_v29, %v1014_v5  ;;  %v4067_v27 = vld [vmem:[%s5214_s15] sm:$0x3]  ;;  %v5241_v5 = vperm.slane %v4046_v26, 0  ;;  %1359 = vmatpush.msrb.mxu0 %v4055_v1  ;;  %1378 = vmatpush.msrb.mxu1 %v4060_v4  ;;  %v4077_v29 = vld [vmem:[%s5211_s4 + $0x18] sm:$0xff]  ;;  %v4487_v1 = vld [vmem:[%s5211_s4 + $0x190] sm:$0xff] }
 0x2be   :  { %5332 = vst [vmem:[#allocation5_spill] sm:$0xff] %v4077_v29  ;;  %v4493_v4 = vld [vmem:[%s5211_s4 + $0x210] sm:$0xff] }
 0x2bf   :  { %v1017_v53 = vmul.f32 %v1009_v15, %v3181_v13  ;;  %v1018_v55 = vmul.f32 %v1016_v17, %v3181_v13  ;;  %v4082_v15 = vld [vmem:[%s5211_s4 + $0xa0] sm:$0xff]  ;;  %1360 = vmatpush.msrb.mxu0 %v4077_v29  ;;  %v4477_v29 = vld [vmem:[%s5211_s4 + $0x110] sm:$0xff]  ;;  %5369 = vst [vmem:[#allocation43_spill] sm:$0xff] %v4487_v1 }
 0x2c0   :  { %5333 = vst [vmem:[#allocation8_spill] sm:$0xff] %v4082_v15  ;;  %1379 = vmatpush.msrb.mxu1 %v4082_v15  ;;  %v2097_v15 = vld [vmem:[%s5310_s0] sm:$0xff] }
 0x2c1   :  { %v3910_v60 = vadd.f32 1e-05, %v1017_v53  ;;  %v3912_v47 = vadd.f32 1e-05, %v1018_v55  ;;  %v5240_v53 = vperm.slane %v4046_v26, 1  ;;  %5368 = vst [vmem:[#allocation42_spill] sm:$0xff] %v4477_v29 }
 0x2c2   :  { %5370 = vst [vmem:[#allocation44_spill] sm:$0xff] %v4493_v4 }
 0x2c3   :  { %2073 = vrsqrt.f32 %v3910_v60  ;;  %vm1027_vm1 = vweird.f32 %v3910_v60  ;;  %vm1037_vm3 = vweird.f32 %v3912_v47 }
 0x2c4   :  { %2075 = vrsqrt.f32 %v3912_v47 }
 0x2c6   :  { %v1119_v28 = vpop.f32.mrf.mxu0  ;;  %v1139_v36 = vpop.f32.mrf.mxu1 }
 0x2c7   :  { %v3960_v35 = vadd.f32 %v1119_v28, %v939_v31  ;;  %v3964_v62 = vadd.f32 %v1139_v36, %v940_v33  ;;  %v5239_v36 = vperm.slane %v4067_v27, 0 }
 0x2c9   :  { %v3980_v45 = vpop.eup %2073  ;;  %v1142_v31 = vsel %vm597_vm0, %v3960_v35, 0.0  ;;  %v1149_v33 = vsel %vm597_vm0, %v3964_v62, 0.0 }
 0x2ca   :  { %v3998_v38 = vpop.eup %2075  ;;  %v1022_v14 = vmul.f32 %v3980_v45, %v3910_v60  ;;  %v1143_v54 = vrot.slane %v1142_v31, 4  ;;  %v1150_v20 = vrot.slane %v1149_v33, 4  ;;  %vm1028_vm14 = vweird.f32 %v3980_v45 }
 0x2cb   :  { %v1032_v9 = vmul.f32 %v3998_v38, %v3912_v47  ;;  %vm1038_vm15 = vweird.f32 %v3998_v38  ;;  %vm1029_vm2 = vmor %vm1027_vm1, %vm1028_vm14 }
 0x2cc   :  { %v1023_v32 = vmul.f32 %v3980_v45, %v1022_v14  ;;  %v1144_v30 = vadd.f32 %v1143_v54, %v1142_v31  ;;  %v1151_v21 = vadd.f32 %v1150_v20, %v1149_v33  ;;  %vm1039_vm4 = vmor %vm1037_vm3, %vm1038_vm15  ;;  %v4101_v31 = vld [vmem:[%s5211_s4 + $0x98] sm:$0xff]  ;;  %v5238_v14 = vperm.slane %v4067_v27, 1  ;;  %v4114_v20 = vld [vmem:[%s5211_s4 + $0x8] sm:$0xff] }
 0x2cd   :  { %v1033_v61 = vmul.f32 %v3998_v38, %v1032_v9  ;;  %5335 = vst [vmem:[#allocation9_spill] sm:$0xff] %v4101_v31  ;;  %1380 = vmatpush.msrb.mxu1 %v4101_v31 }
 0x2ce   :  { %v1024_v59 = vmul.f32 0.5, %v1023_v32  ;;  %v1145_v23 = vrot.slane %v1144_v30, 2  ;;  %v1152_v41 = vrot.slane %v1151_v21, 2  ;;  %5336 = vst [vmem:[#allocation10_spill] sm:$0xff] %v4114_v20 }
 0x2cf   :  { %v1034_v49 = vmul.f32 0.5, %v1033_v61  ;;  %v4136_v61 = vld [vmem:[%s5211_s4] sm:$0xff] }
 0x2d0   :  { %v1025_v11 = vsub.f32 1.5, %v1024_v59  ;;  %v1146_v40 = vadd.f32 %v1145_v23, %v1144_v30  ;;  %v1153_v44 = vadd.f32 %v1152_v41, %v1151_v21  ;;  %5338 = vst [vmem:[#allocation12_spill] sm:$0xff] %v4136_v61  ;;  %v4152_v41 = vld [vmem:[%s5211_s4 + $0x278] sm:$0xff] }
 0x2d1   :  { %v1035_v34 = vsub.f32 1.5, %v1034_v49  ;;  %5340 = vst [vmem:[#allocation14_spill] sm:$0xff] %v4152_v41 }
 0x2d2   :  { %v1026_v52 = vmul.f32 %v3980_v45, %v1025_v11  ;;  %v1147_v10 = vrot.slane %v1146_v40, 1  ;;  %v1154_v16 = vrot.slane %v1153_v44, 1  ;;  %v4157_v11 = vld [vmem:[%s5211_s4 + $0x178] sm:$0xff] }
 0x2d3   :  { %v1036_v8 = vmul.f32 %v3998_v38, %v1035_v34 }
 0x2d4   :  { %v1030_v17 = vsel %vm1029_vm2, %v3980_v45, %v1026_v52  ;;  %v1148_v55 = vadd.f32 %v1147_v10, %v1146_v40  ;;  %v1155_v60 = vadd.f32 %v1154_v16, %v1153_v44  ;;  %v4096_v45 = vld [vmem:[%s5211_s4 + $0x10] sm:$0xff]  ;;  %v4164_v40 = vld [vmem:[%s5211_s4 + $0x80] sm:$0xff]  ;;  %v4171_v10 = vld [vmem:[%s5211_s4 + $0x1f8] sm:$0xff] }
 0x2d5   :  { %v1041_v47 = vmul.f32 %v1030_v17, %v3850_v46  ;;  %v1040_v28 = vsel %vm1039_vm4, %v3998_v38, %v1036_v8  ;;  %5334 = vst [vmem:[#allocation7_spill] sm:$0xff] %v4096_v45  ;;  %1361 = vmatpush.msrb.mxu0 %v4096_v45  ;;  %v4177_v16 = vld [vmem:[%s5211_s4 + $0x270] sm:$0xff]  ;;  %v4464_v45 = vld [vmem:[%s5211_s4 + $0x198] sm:$0xff] }
 0x2d6   :  { %v1042_v46 = vmul.f32 %v1040_v28, %v3852_v50  ;;  %v1156_v33 = vmul.f32 %v1148_v55, %v3181_v13  ;;  %v1157_v38 = vmul.f32 %v1155_v60, %v3181_v13  ;;  %v4119_v50 = vld [vmem:[%s5211_s4 + $0x90] sm:$0xff]  ;;  %5341 = vst [vmem:[#allocation15_spill] sm:$0xff] %v4164_v40  ;;  %v4188_v60 = vld [vmem:[%s5211_s4 + $0x2f8] sm:$0xff]  ;;  %v4199_v28 = vld [vmem:[%s5211_s4 + $0x268] sm:$0xff] }
 0x2d7   :  { %v1048_v54 = vmul.f32 %v5241_v5, %v1041_v47  ;;  %5337 = vst [vmem:[#allocation11_spill] sm:$0xff] %v4119_v50  ;;  %1362 = vmatpush.msrb.mxu0 %v4114_v20  ;;  %1381 = vmatpush.msrb.mxu1 %v4119_v50  ;;  %v4182_v55 = vld [vmem:[%s5211_s4 + $0x170] sm:$0xff]  ;;  %v4456_v20 = vld [vmem:[%s5211_s4 + $0x218] sm:$0xff] }
 0x2d8   :  { %v1049_v9 = vmul.f32 %v5240_v53, %v1042_v46  ;;  %v4124_v32 = vsub.f32 %v3960_v35, %v1156_v33  ;;  %v4127_v30 = vsub.f32 %v3964_v62, %v1157_v38  ;;  %v4141_v35 = vld [vmem:[%s5211_s4 + $0x88] sm:$0xff]  ;;  %5342 = vst [vmem:[#allocation16_spill] sm:$0xff] %v4177_v16  ;;  %v4194_v47 = vld [vmem:[%s5211_s4 + $0x1f0] sm:$0xff]  ;;  %v4283_v53 = vld [vmem:[%s5211_s4 + $0x2d8] sm:$0xff] }
 0x2d9   :  { %v1055_v21 = vadd.f32 %v5239_v36, %v1048_v54  ;;  %5339 = vst [vmem:[#allocation13_spill] sm:$0xff] %v4141_v35  ;;  %1363 = vmatpush.msrb.mxu0 %v4136_v61  ;;  %1382 = vmatpush.msrb.mxu1 %v4141_v35  ;;  %v4205_v38 = vld [vmem:[%s5211_s4 + $0x168] sm:$0xff]  ;;  %v4211_v54 = vld [vmem:[%s5211_s4 + $0x2f0] sm:$0xff] }
 0x2da   :  { %v1160_v62 = vmul.f32 %v4124_v32, %v4124_v32  ;;  %v1161_v59 = vmul.f32 %v4127_v30, %v4127_v30  ;;  %v1056_v23 = vadd.f32 %v5238_v14, %v1049_v9  ;;  %5343 = vst [vmem:[#allocation17_spill] sm:$0xff] %v4188_v60  ;;  %v4217_v9 = vld [vmem:[%s5211_s4 + $0x1e8] sm:$0xff]  ;;  %v4259_v14 = vld [vmem:[%s5211_s4 + $0x2e0] sm:$0xff]  ;;  %v4277_v36 = vld [vmem:[%s5211_s4 + $0x150] sm:$0xff]  ;;  %1364 = vmatmul.f32.vlgmr.msrb.gmra.mxu0 %v2097_v15 }
 0x2db   :  { %v1057_v49 = vmax.f32 %v1055_v21, 0.0  ;;  %1428 = vmatpush.msra.mxu0 %v4152_v41  ;;  %1383 = vmatpush.msrb.mxu1 %v4164_v40  ;;  %5344 = vst [vmem:[#allocation18_spill] sm:$0xff] %v4199_v28  ;;  %v4223_v21 = vld [vmem:[%s5211_s4 + $0x260] sm:$0xff]  ;;  %v4289_v5 = vld [vmem:[%s5211_s4 + $0x1d0] sm:$0xff]  ;;  %v4435_v61 = vld [vmem:[%s5211_s4 + $0x2a8] sm:$0xff] }
 0x2dc   :  { %v1162_v44 = vsel %vm597_vm0, %v1160_v62, 0.0  ;;  %v1169_v34 = vsel %vm597_vm0, %v1161_v59, 0.0  ;;  %v1058_v52 = vmax.f32 %v1056_v23, 0.0  ;;  %5345 = vst [vmem:[#allocation19_spill] sm:$0xff] %v4211_v54  ;;  %v4229_v23 = vld [vmem:[%s5211_s4 + $0x160] sm:$0xff]  ;;  %v4411_v40 = vld [vmem:[%s5211_s4 + $0x2b0] sm:$0xff] }
 0x2dd   :  { %v1163_v8 = vrot.slane %v1162_v44, 4  ;;  %v1170_v17 = vrot.slane %v1169_v34, 4  ;;  %1078 = vmatmul.f32.vlgmr.msrb.gmra.mxu2 %v1057_v49  ;;  %1429 = vmatpush.msra.mxu0 %v4177_v16  ;;  %5346 = vst [vmem:[#allocation20_spill] sm:$0xff] %v4223_v21  ;;  %v4235_v49 = vld [vmem:[%s5211_s4 + $0x2e8] sm:$0xff]  ;;  %v4393_v16 = vld [vmem:[%s5211_s4 + $0x1b0] sm:$0xff]  ;;  %v4423_v41 = vld [vmem:[%s5211_s4 + $0x220] sm:$0xff] }
 0x2de   :  { %1098 = vmatmul.f32.vlgmr.msrb.gmra.mxu3 %v1058_v52  ;;  %1388 = vmatpush.msrb.mxu2 %v4157_v11  ;;  %5347 = vst [vmem:[#allocation21_spill] sm:$0xff] %v4235_v49  ;;  %v4499_v15 = vld [vmem:[%s5211_s4 + $0x108] sm:$0xff] }
 0x2df   :  { %v1164_v46 = vadd.f32 %v1163_v8, %v1162_v44  ;;  %v1171_v33 = vadd.f32 %v1170_v17, %v1169_v34  ;;  %1408 = vmatpush.msrb.mxu3 %v4171_v10  ;;  %1448 = vmatpush.msra.mxu1 %v4188_v60  ;;  %v4241_v44 = vld [vmem:[%s5211_s4 + $0x1e0] sm:$0xff]  ;;  %v4247_v34 = vld [vmem:[%s5211_s4 + $0x258] sm:$0xff]  ;;  %5349 = vst [vmem:[#allocation23_spill] sm:$0xff] %v4259_v14  ;;  %v4405_v60 = vld [vmem:[%s5211_s4 + $0x128] sm:$0xff] }
 0x2e0   :  { %1389 = vmatpush.msrb.mxu2 %v4182_v55  ;;  %1430 = vmatpush.msra.mxu0 %v4199_v28  ;;  %5348 = vst [vmem:[#allocation22_spill] sm:$0xff] %v4247_v34  ;;  %v4253_v17 = vld [vmem:[%s5211_s4 + $0x158] sm:$0xff]  ;;  %v4301_v28 = vld [vmem:[%s5211_s4 + $0x148] sm:$0xff] }
 0x2e1   :  { %v1165_v62 = vrot.slane %v1164_v46, 2  ;;  %v1172_v59 = vrot.slane %v1171_v33, 2  ;;  %1409 = vmatpush.msrb.mxu3 %v4194_v47  ;;  %1449 = vmatpush.msra.mxu1 %v4211_v54  ;;  %5351 = vst [vmem:[#allocation25_spill] sm:$0xff] %v4283_v53  ;;  %v4355_v54 = vld [vmem:[%s5211_s4 + $0x138] sm:$0xff] }
 0x2e2   :  { %1390 = vmatpush.msrb.mxu2 %v4205_v38  ;;  %1431 = vmatpush.msra.mxu0 %v4223_v21  ;;  %v4295_v21 = vld [vmem:[%s5211_s4 + $0x248] sm:$0xff]  ;;  %5361 = vst [vmem:[#allocation35_spill] sm:$0xff] %v4411_v40 }
 0x2e3   :  { %v1166_v52 = vadd.f32 %v1165_v62, %v1164_v46  ;;  %v1173_v8 = vadd.f32 %v1172_v59, %v1171_v33  ;;  %1410 = vmatpush.msrb.mxu3 %v4217_v9  ;;  %v4265_v46 = vld [vmem:[%s5211_s4 + $0x1d8] sm:$0xff]  ;;  %1450 = vmatpush.msra.mxu1 %v4235_v49  ;;  %v4271_v33 = vld [vmem:[%s5211_s4 + $0x250] sm:$0xff]  ;;  %5352 = vst [vmem:[#allocation26_spill] sm:$0xff] %v4295_v21 }
 0x2e4   :  { %1391 = vmatpush.msrb.mxu2 %v4229_v23  ;;  %5350 = vst [vmem:[#allocation24_spill] sm:$0xff] %v4271_v33  ;;  %1432 = vmatpush.msra.mxu0 %v4247_v34 }
 0x2e5   :  { %v1167_v62 = vrot.slane %v1166_v52, 1  ;;  %v1174_v59 = vrot.slane %v1173_v8, 1  ;;  %1411 = vmatpush.msrb.mxu3 %v4241_v44  ;;  %1451 = vmatpush.msra.mxu1 %v4259_v14  ;;  %v4307_v14 = vld [vmem:[%s5211_s4 + $0x2d0] sm:$0xff]  ;;  %5362 = vst [vmem:[#allocation36_spill] sm:$0xff] %v4423_v41 }
 0x2e6   :  { %1392 = vmatpush.msrb.mxu2 %v4253_v17  ;;  %1433 = vmatpush.msra.mxu0 %v4271_v33  ;;  %5353 = vst [vmem:[#allocation27_spill] sm:$0xff] %v4307_v14  ;;  %v4327_v33 = vld [vmem:[%s5211_s4 + $0x140] sm:$0xff] }
 0x2e7   :  { %v1168_v34 = vadd.f32 %v1167_v62, %v1166_v52  ;;  %v1175_v49 = vadd.f32 %v1174_v59, %v1173_v8  ;;  %1412 = vmatpush.msrb.mxu3 %v4265_v46  ;;  %v4313_v52 = vld [vmem:[%s5211_s4 + $0x1c8] sm:$0xff]  ;;  %1452 = vmatpush.msra.mxu1 %v4283_v53  ;;  %v4319_v8 = vld [vmem:[%s5211_s4 + $0x240] sm:$0xff]  ;;  %5363 = vst [vmem:[#allocation37_spill] sm:$0xff] %v4435_v61 }
 0x2e8   :  { %1393 = vmatpush.msrb.mxu2 %v4277_v36  ;;  %5354 = vst [vmem:[#allocation28_spill] sm:$0xff] %v4319_v8  ;;  %1434 = vmatpush.msra.mxu0 %v4295_v21  ;;  %v4333_v53 = vld [vmem:[%s5211_s4 + $0x2c8] sm:$0xff] }
 0x2e9   :  { %v1176_v62 = vmul.f32 %v1168_v34, %v3181_v13  ;;  %v1177_v59 = vmul.f32 %v1175_v49, %v3181_v13  ;;  %1413 = vmatpush.msrb.mxu3 %v4289_v5  ;;  %5355 = vst [vmem:[#allocation29_spill] sm:$0xff] %v4333_v53  ;;  %v4339_v49 = vld [vmem:[%s5211_s4 + $0x1c0] sm:$0xff]  ;;  %1453 = vmatpush.msra.mxu1 %v4307_v14  ;;  %v4345_v34 = vld [vmem:[%s5211_s4 + $0x238] sm:$0xff] }
 0x2ea   :  { %1394 = vmatpush.msrb.mxu2 %v4301_v28  ;;  %5356 = vst [vmem:[#allocation30_spill] sm:$0xff] %v4345_v34  ;;  %1435 = vmatpush.msra.mxu0 %v4319_v8  ;;  %v4361_v14 = vld [vmem:[%s5211_s4 + $0x2c0] sm:$0xff]  ;;  %v4380_v8 = vld [vmem:[%s5211_s4 + $0x130] sm:$0xff] }
 0x2eb   :  { %v4347_v13 = vadd.f32 1e-05, %v1176_v62  ;;  %v4349_v21 = vadd.f32 1e-05, %v1177_v59  ;;  %1414 = vmatpush.msrb.mxu3 %v4313_v52  ;;  %5357 = vst [vmem:[#allocation31_spill] sm:$0xff] %v4361_v14  ;;  %v4367_v62 = vld [vmem:[%s5211_s4 + $0x1b8] sm:$0xff]  ;;  %1454 = vmatpush.msra.mxu1 %v4333_v53 }
 0x2ec   :  { %1395 = vmatpush.msrb.mxu2 %v4327_v33  ;;  %v4373_v59 = vld [vmem:[%s5211_s4 + $0x230] sm:$0xff]  ;;  %1436 = vmatpush.msra.mxu0 %v4345_v34  ;;  %v4386_v53 = vld [vmem:[%s5211_s4 + $0x2b8] sm:$0xff]  ;;  %v4399_v34 = vld [vmem:[%s5211_s4 + $0x228] sm:$0xff]  ;;  %5365 = vst [vmem:[#allocation39_spill] sm:$0xff] %v4456_v20 }
 0x2ed   :  { %5358 = vst [vmem:[#allocation32_spill] sm:$0xff] %v4373_v59  ;;  %2077 = vrsqrt.f32 %v4347_v13  ;;  %1415 = vmatpush.msrb.mxu3 %v4339_v49  ;;  %1455 = vmatpush.msra.mxu1 %v4361_v14  ;;  %v4417_v14 = vld [vmem:[%s5211_s4 + $0x1a8] sm:$0xff]  ;;  %vm1186_vm7 = vweird.f32 %v4347_v13  ;;  %vm1196_vm9 = vweird.f32 %v4349_v21 }
 0x2ee   :  { %5359 = vst [vmem:[#allocation33_spill] sm:$0xff] %v4386_v53  ;;  %2079 = vrsqrt.f32 %v4349_v21  ;;  %1396 = vmatpush.msrb.mxu2 %v4355_v54  ;;  %1437 = vmatpush.msra.mxu0 %v4373_v59  ;;  %v4429_v59 = vld [vmem:[%s5211_s4 + $0x120] sm:$0xff] }
 0x2ef   :  { %5360 = vst [vmem:[#allocation34_spill] sm:$0xff] %v4399_v34  ;;  %1416 = vmatpush.msrb.mxu3 %v4367_v62  ;;  %1456 = vmatpush.msra.mxu1 %v4386_v53  ;;  %v4441_v53 = vld [vmem:[%s5211_s4 + $0x1a0] sm:$0xff] }
 0x2f0   :  { %1397 = vmatpush.msrb.mxu2 %v4380_v8  ;;  %1438 = vmatpush.msra.mxu0 %v4399_v34  ;;  %5364 = vst [vmem:[#allocation38_spill] sm:$0xff] %v4441_v53  ;;  %v4450_v34 = vld [vmem:[%s5211_s4 + $0x118] sm:$0xff] }
 0x2f1   :  { %1417 = vmatpush.msrb.mxu3 %v4393_v16  ;;  %1457 = vmatpush.msra.mxu1 %v4411_v40  ;;  %5366 = vst [vmem:[#allocation40_spill] sm:$0xff] %v4464_v45 }
 0x2f2   :  { %1398 = vmatpush.msrb.mxu2 %v4405_v60  ;;  %1439 = vmatpush.msra.mxu0 %v4423_v41  ;;  %v4470_v41 = vld [vmem:[%s5211_s4 + $0x2a0] sm:$0xff]  ;;  %5371 = vst [vmem:[#allocation45_spill] sm:$0xff] %v4499_v15 }
 0x2f3   :  { %v4444_v35 = vpop.eup %2077  ;;  %1418 = vmatpush.msrb.mxu3 %v4417_v14  ;;  %1458 = vmatpush.msra.mxu1 %v4435_v61  ;;  %5367 = vst [vmem:[#allocation41_spill] sm:$0xff] %v4470_v41 }
 0x2f4   :  { %v2080_v50 = vpop.eup %2079  ;;  %v1181_v40 = vmul.f32 %v4444_v35, %v4347_v13  ;;  %1399 = vmatpush.msrb.mxu2 %v4429_v59  ;;  %1440 = vmatpush.msra.mxu0 %v4456_v20  ;;  %vm1187_vm5 = vweird.f32 %v4444_v35  ;;  %v2099_v13 = vld [vmem:[%s5310_s0 + $0x20] sm:$0xff] }
 0x2f5   :  { %v1191_v31 = vmul.f32 %v2080_v50, %v4349_v21  ;;  %1419 = vmatpush.msrb.mxu3 %v4441_v53  ;;  %1459 = vmatpush.msra.mxu1 %v4470_v41  ;;  %v4519_v41 = vld [vmem:[%s5211_s4 + $0x208] sm:$0xff]  ;;  %vm1197_vm6 = vweird.f32 %v2080_v50  ;;  %vm1188_vm8 = vmor %vm1186_vm7, %vm1187_vm5 }
 0x2f6   :  { %v1182_v61 = vmul.f32 %v4444_v35, %v1181_v40  ;;  %1400 = vmatpush.msrb.mxu2 %v4450_v34  ;;  %v4505_v40 = vld [vmem:[%s5211_s4 + $0x298] sm:$0xff]  ;;  %5372 = vst [vmem:[#allocation46_spill] sm:$0xff] %v4519_v41  ;;  %1441 = vmatpush.msra.mxu0 %v4493_v4  ;;  %v4544_v4 = vld [vmem:[%s5211_s4 + $0x200] sm:$0xff]  ;;  %vm1198_vm10 = vmor %vm1196_vm9, %vm1197_vm6 }
 0x2f7   :  { %v1192_v24 = vmul.f32 %v2080_v50, %v1191_v31  ;;  %1420 = vmatpush.msrb.mxu3 %v4464_v45  ;;  %v4511_v31 = vld [vmem:[%s5211_s4 + $0x188] sm:$0xff]  ;;  %1460 = vmatpush.msra.mxu1 %v4505_v40  ;;  %5373 = vst [vmem:[#allocation47_spill] sm:$0xff] %v4544_v4 }
 0x2f8   :  { %v1183_v20 = vmul.f32 0.5, %v1182_v61  ;;  %1401 = vmatpush.msrb.mxu2 %v4477_v29  ;;  %v2098_v45 = vld [vmem:[%s5310_s0 + $0x8] sm:$0xff]  ;;  %v4525_v61 = vld [vmem:[%s5211_s4 + $0x100] sm:$0xff]  ;;  %v4531_v29 = vld [vmem:[%s5211_s4 + $0x290] sm:$0xff]  ;;  %1442 = vmatpush.msra.mxu0 %v4519_v41 }
 0x2f9   :  { %1384 = vmatmul.f32.vlgmr.msrb.gmra.mxu1 %v2098_v45  ;;  %v1193_v53 = vmul.f32 0.5, %v1192_v24  ;;  %1421 = vmatpush.msrb.mxu3 %v4487_v1  ;;  %v4538_v24 = vld [vmem:[%s5211_s4 + $0x180] sm:$0xff] }
 0x2fa   :  { %v1184_v45 = vsub.f32 1.5, %v1183_v20  ;;  %1402 = vmatpush.msrb.mxu2 %v4499_v15  ;;  %v4551_v20 = vld [vmem:[%s5211_s4 + $0x288] sm:$0xff]  ;;  %1461 = vmatpush.msra.mxu1 %v4531_v29  ;;  %v4563_v41 = vld [vmem:[%s5211_s4 + $0x280] sm:$0xff] }
 0x2fb   :  { %v1194_v1 = vsub.f32 1.5, %v1193_v53  ;;  %1422 = vmatpush.msrb.mxu3 %v4511_v31  ;;  %5374 = vst [vmem:[#allocation48_spill] sm:$0xff] %v4551_v20  ;;  %1443 = vmatpush.msra.mxu0 %v4544_v4 }
 0x2fc   :  { %v1185_v15 = vmul.f32 %v4444_v35, %v1184_v45  ;;  %1403 = vmatpush.msrb.mxu2 %v4525_v61  ;;  %1462 = vmatpush.msra.mxu1 %v4551_v20  ;;  %v2100_v20 = vld [vmem:[%s5310_s0 + $0x28] sm:$0xff] }
 0x2fd   :  { %v1195_v53 = vmul.f32 %v2080_v50, %v1194_v1  ;;  %1423 = vmatpush.msrb.mxu3 %v4538_v24  ;;  %1444 = vmatmul.f32.vlgmr.msra.gmra.mxu0 %v2099_v13  ;;  %v5376_v13 = vperm.slane %v4046_v26, 1 }
 0x2fe   :  { %v1189_v45 = vsel %vm1188_vm8, %v4444_v35, %v1185_v15  ;;  %1508 = vmatpush.msrb.mxu0 %v4157_v11  ;;  %1463 = vmatpush.msra.mxu1 %v4563_v41  ;;  %v5375_v35 = vperm.slane %v4046_v26, 0  ;;  %v5378_v11 = vperm.slane %v4067_v27, 1  ;;  %v5395_v26 = vld [vmem:[#allocation14_spill] sm:$0xff] }
 0x2ff   :  { %v1200_v1 = vmul.f32 %v1189_v45, %v4124_v32  ;;  %v1199_v21 = vsel %vm1198_vm10, %v2080_v50, %v1195_v53  ;;  %v5377_v50 = vperm.slane %v4067_v27, 0  ;;  %v5397_v27 = vld [vmem:[#allocation17_spill] sm:$0xff] }
 0x300   :  { %v1201_v4 = vmul.f32 %v1199_v21, %v4127_v30  ;;  %1509 = vmatpush.msrb.mxu0 %v4182_v55  ;;  %1528 = vmatpush.msrb.mxu1 %v4171_v10  ;;  %v5399_v10 = vld [vmem:[#allocation19_spill] sm:$0xff]  ;;  %v5401_v55 = vld [vmem:[#allocation21_spill] sm:$0xff] }
 0x301   :  { %v1202_v15 = vmul.f32 %v1200_v1, %v5375_v35  ;;  %1464 = vmatmul.f32.vlgmr.msra.gmra.mxu1 %v2100_v20  ;;  %v5422_v1 = vld [vmem:[#allocation46_spill] sm:$0xff]  ;;  %v5424_v35 = vld [vmem:[#allocation47_spill] sm:$0xff] }
 0x302   :  { %v1203_v32 = vmul.f32 %v1201_v4, %v5376_v13  ;;  %1510 = vmatpush.msrb.mxu0 %v4205_v38  ;;  %1529 = vmatpush.msrb.mxu1 %v4194_v47  ;;  %v5396_v4 = vld [vmem:[#allocation15_spill] sm:$0xff]  ;;  %v5405_v38 = vld [vmem:[#allocation25_spill] sm:$0xff]  ;;  %v5423_v21 = vld [vmem:[#allocation48_spill] sm:$0xff] }
 0x303   :  { %v1204_v30 = vadd.f32 %v1202_v15, %v5377_v50  ;;  %v5403_v47 = vld [vmem:[#allocation23_spill] sm:$0xff]  ;;  %v2107_v15 = vld [vmem:[%s5311_s25 + $0x20] sm:$0xff]  ;;  %v4713_v13 = vld [vmem:[%s5216_s18 + $0xf8] sm:$0xff] }
 0x304   :  { %v1205_v53 = vadd.f32 %v1203_v32, %v5378_v11  ;;  %1511 = vmatpush.msrb.mxu0 %v4229_v23  ;;  %1530 = vmatpush.msrb.mxu1 %v4217_v9  ;;  %v5407_v9 = vld [vmem:[#allocation27_spill] sm:$0xff]  ;;  %v5408_v23 = vld [vmem:[#allocation26_spill] sm:$0xff]  ;;  %v4730_v50 = vld [vmem:[%s5216_s18 + $0xd0] sm:$0xff] }
 0x305   :  { %v1206_v45 = vmax.f32 %v1204_v30, 0.0  ;;  %v4718_v32 = vld [vmem:[%s5216_s18 + $0xe0] sm:$0xff]  ;;  %v4735_v30 = vld [vmem:[%s5216_s18 + $0xd8] sm:$0xff] }
 0x306   :  { %v1207_v20 = vmax.f32 %v1205_v53, 0.0  ;;  %1512 = vmatpush.msrb.mxu0 %v4253_v17  ;;  %1531 = vmatpush.msrb.mxu1 %v4241_v44  ;;  %v5409_v44 = vld [vmem:[#allocation29_spill] sm:$0xff]  ;;  %v5410_v17 = vld [vmem:[#allocation28_spill] sm:$0xff]  ;;  %v4742_v11 = vld [vmem:[%s5216_s18 + $0xc0] sm:$0xff] }
 0x307   :  { %1224 = vmatmul.f32.vlgmr.msra.gmra.mxu2 %v1206_v45  ;;  %v4747_v53 = vld [vmem:[%s5216_s18 + $0xc8] sm:$0xff]  ;;  %v4754_v45 = vld [vmem:[%s5216_s18 + $0xb0] sm:$0xff] }
 0x308   :  { %1244 = vmatmul.f32.vlgmr.msra.gmra.mxu3 %v1207_v20  ;;  %1468 = vmatpush.msra.mxu2 %v3877_v43  ;;  %v2101_v43 = vld [vmem:[%s5310_s0 + $0x10] sm:$0xff]  ;;  %v4759_v20 = vld [vmem:[%s5216_s18 + $0xb8] sm:$0xff] }
 0x309   :  { %1488 = vmatpush.msra.mxu3 %v3890_v25  ;;  %1513 = vmatpush.msrb.mxu0 %v4277_v36  ;;  %v5379_v25 = vld [vmem:[#allocation38_spill] sm:$0xff]  ;;  %v5398_v36 = vld [vmem:[#allocation16_spill] sm:$0xff] }
 0x30a   :  { %1469 = vmatpush.msra.mxu2 %v3885_v51  ;;  %1532 = vmatpush.msrb.mxu1 %v4265_v46  ;;  %v2102_v51 = vld [vmem:[%s5310_s0 + $0x18] sm:$0xff]  ;;  %v5411_v46 = vld [vmem:[#allocation31_spill] sm:$0xff] }
 0x30b   :  { %1489 = vmatpush.msra.mxu3 %v3906_v56  ;;  %1514 = vmatpush.msrb.mxu0 %v4301_v28  ;;  %v5381_v56 = vld [vmem:[#allocation42_spill] sm:$0xff] }
 0x30c   :  { %1470 = vmatpush.msra.mxu2 %v3901_v39  ;;  %1533 = vmatpush.msrb.mxu1 %v4289_v5  ;;  %v5380_v39 = vld [vmem:[#allocation4_spill] sm:$0xff]  ;;  %v2105_v5 = vld [vmem:[%s5311_s25] sm:$0xff] }
 0x30d   :  { %1490 = vmatpush.msra.mxu3 %v3924_v0  ;;  %1515 = vmatpush.msrb.mxu0 %v4327_v33  ;;  %v5383_v0 = vld [vmem:[#allocation40_spill] sm:$0xff]  ;;  %v5404_v28 = vld [vmem:[#allocation22_spill] sm:$0xff] }
 0x30e   :  { %1471 = vmatpush.msra.mxu2 %v3919_v63  ;;  %1534 = vmatpush.msrb.mxu1 %v4313_v52  ;;  %v5382_v63 = vld [vmem:[#allocation6_spill] sm:$0xff]  ;;  %v5413_v52 = vld [vmem:[#allocation33_spill] sm:$0xff] }
 0x30f   :  { %1404 = vmatmul.f32.vlgmr.msrb.gmra.mxu2 %v2101_v43  ;;  %1491 = vmatpush.msra.mxu3 %v3939_v7  ;;  %v5385_v7 = vld [vmem:[#allocation45_spill] sm:$0xff]  ;;  %v5412_v33 = vld [vmem:[#allocation30_spill] sm:$0xff] }
 0x310   :  { %1472 = vmatpush.msra.mxu2 %v3934_v6  ;;  %1424 = vmatmul.f32.vlgmr.msrb.gmra.mxu3 %v2102_v51  ;;  %v5384_v6 = vld [vmem:[#allocation3_spill] sm:$0xff]  ;;  %v4766_v43 = vld [vmem:[%s5216_s18 + $0xa0] sm:$0xff] }
 0x311   :  { %1492 = vmatpush.msra.mxu3 %v3954_v58  ;;  %1516 = vmatpush.msrb.mxu0 %v4355_v54  ;;  %v5387_v58 = vld [vmem:[#allocation43_spill] sm:$0xff]  ;;  %v5406_v54 = vld [vmem:[#allocation24_spill] sm:$0xff] }
 0x312   :  { %1473 = vmatpush.msra.mxu2 %v3949_v57  ;;  %1535 = vmatpush.msrb.mxu1 %v4339_v49  ;;  %v5386_v57 = vld [vmem:[#allocation8_spill] sm:$0xff]  ;;  %v5415_v49 = vld [vmem:[#allocation35_spill] sm:$0xff] }
 0x313   :  { %1493 = vmatpush.msra.mxu3 %v3976_v3  ;;  %1517 = vmatpush.msrb.mxu0 %v4380_v8  ;;  %v5389_v3 = vld [vmem:[#allocation9_spill] sm:$0xff]  ;;  %v5414_v8 = vld [vmem:[#allocation32_spill] sm:$0xff]  ;;  %v4771_v51 = vld [vmem:[%s5216_s18 + $0xa8] sm:$0xff] }
 0x314   :  { %1474 = vmatpush.msra.mxu2 %v3971_v2  ;;  %1536 = vmatpush.msrb.mxu1 %v4367_v62  ;;  %v5388_v2 = vld [vmem:[#allocation5_spill] sm:$0xff] }
 0x315   :  { %1494 = vmatpush.msra.mxu3 %v3996_v42  ;;  %1518 = vmatpush.msrb.mxu0 %v4405_v60  ;;  %v2103_v42 = vld [vmem:[%s5311_s25 + $0x10] sm:$0xff]  ;;  %v5417_v62 = vld [vmem:[#allocation37_spill] sm:$0xff] }
 0x316   :  { %1475 = vmatpush.msra.mxu2 %v3991_v18  ;;  %1537 = vmatpush.msrb.mxu1 %v4393_v16  ;;  %v5390_v18 = vld [vmem:[#allocation7_spill] sm:$0xff]  ;;  %v5400_v16 = vld [vmem:[#allocation18_spill] sm:$0xff]  ;;  %v5402_v60 = vld [vmem:[#allocation20_spill] sm:$0xff] }
 0x317   :  { %1495 = vmatpush.msra.mxu3 %v4015_v19  ;;  %1519 = vmatpush.msrb.mxu0 %v4429_v59  ;;  %v5392_v19 = vld [vmem:[#allocation10_spill] sm:$0xff]  ;;  %v5418_v59 = vld [vmem:[#allocation36_spill] sm:$0xff] }
 0x318   :  { %1476 = vmatpush.msra.mxu2 %v4010_v12  ;;  %1538 = vmatpush.msrb.mxu1 %v4417_v14  ;;  %v5391_v12 = vld [vmem:[#allocation11_spill] sm:$0xff] }
 0x319   :  { %1496 = vmatpush.msra.mxu3 %v4029_v37  ;;  %1520 = vmatpush.msrb.mxu0 %v4450_v34  ;;  %v5393_v37 = vld [vmem:[#allocation13_spill] sm:$0xff]  ;;  %v2106_v14 = vld [vmem:[%s5311_s25 + $0x8] sm:$0xff]  ;;  %v5416_v34 = vld [vmem:[#allocation34_spill] sm:$0xff] }
 0x31a   :  { %1477 = vmatpush.msra.mxu2 %v4024_v48  ;;  %1539 = vmatpush.msrb.mxu1 %v5379_v25  ;;  %v2104_v48 = vld [vmem:[%s5311_s25 + $0x18] sm:$0xff]  ;;  %v4778_v25 = vld [vmem:[%s5216_s18 + $0x90] sm:$0xff] }
 0x31b   :  { %1497 = vmatpush.msra.mxu3 %v4041_v22  ;;  %1521 = vmatpush.msrb.mxu0 %v5381_v56  ;;  %v5394_v22 = vld [vmem:[#allocation12_spill] sm:$0xff]  ;;  %v4792_v56 = vld [vmem:[%s5212_s17] ss:$0 sm:$0xff] }
 0x31c   :  { %1478 = vmatpush.msra.mxu2 %v5380_v39  ;;  %1540 = vmatpush.msrb.mxu1 %v5383_v0  ;;  %v4783_v39 = vld [vmem:[%s5216_s18 + $0x98] sm:$0xff] }
 0x31d   :  { %1498 = vmatpush.msra.mxu3 %v5382_v63  ;;  %1522 = vmatpush.msrb.mxu0 %v5385_v7 }
 0x31e   :  { %1479 = vmatpush.msra.mxu2 %v5384_v6  ;;  %1541 = vmatpush.msrb.mxu1 %v5387_v58 }
 0x31f   :  { %1499 = vmatpush.msra.mxu3 %v5386_v57  ;;  %1523 = vmatpush.msrb.mxu0 %v4525_v61  ;;  %v5420_v61 = vld [vmem:[#allocation39_spill] sm:$0xff] }
 0x320   :  { %1480 = vmatpush.msra.mxu2 %v5388_v2  ;;  %1542 = vmatpush.msrb.mxu1 %v4511_v31  ;;  %v5419_v31 = vld [vmem:[#allocation41_spill] sm:$0xff]  ;;  %v1604_v2 = vld [vmem:[%s5216_s18 + $0x80] sm:$0xff] }
 0x321   :  { %1500 = vmatpush.msra.mxu3 %v5389_v3  ;;  %1524 = vmatmul.f32.vlgmr.msrb.gmra.mxu0 %v2103_v42  ;;  %v1605_v3 = vld [vmem:[%s5216_s18 + $0x88] sm:$0xff]  ;;  %v1603_v42 = vld [vmem:[%s5216_s18 + $0x78] sm:$0xff] }
 0x322   :  { %1481 = vmatpush.msra.mxu2 %v5390_v18  ;;  %1543 = vmatpush.msrb.mxu1 %v4538_v24  ;;  %v5421_v24 = vld [vmem:[#allocation44_spill] sm:$0xff] }
 0x323   :  { %1501 = vmatpush.msra.mxu3 %v5391_v12  ;;  %1544 = vmatmul.f32.vlgmr.msrb.gmra.mxu1 %v2104_v48  ;;  %v1602_v18 = vld [vmem:[%s5216_s18 + $0x70] sm:$0xff]  ;;  %v1600_v12 = vld [vmem:[%s5216_s18 + $0x60] sm:$0xff] }
 0x324   :  { %1482 = vmatpush.msra.mxu2 %v5392_v19  ;;  %1681 = vmatpush.msra.mxu1 %v4713_v13  ;;  %v1601_v19 = vld [vmem:[%s5216_s18 + $0x68] sm:$0xff]  ;;  %v1598_v48 = vld [vmem:[%s5216_s18 + $0x50] sm:$0xff] }
 0x325   :  { %1502 = vmatpush.msra.mxu3 %v5393_v37  ;;  %v1599_v37 = vld [vmem:[%s5216_s18 + $0x58] sm:$0xff] }
 0x326   :  { %1483 = vmatpush.msra.mxu2 %v5394_v22  ;;  %v1596_v22 = vld [vmem:[%s5216_s18 + $0x40] sm:$0xff] }
 0x327   :  { %1503 = vmatpush.msra.mxu3 %v5396_v4  ;;  %1484 = vmatmul.f32.vlgmr.msra.gmra.mxu2 %v2105_v5  ;;  %v1594_v4 = vld [vmem:[%s5216_s18 + $0x30] sm:$0xff]  ;;  %v1592_v5 = vld [vmem:[%s5216_s18 + $0x20] sm:$0xff] }
 0x328   :  { %1548 = vmatpush.msrb.mxu2 %v5395_v26  ;;  %1504 = vmatmul.f32.vlgmr.msra.gmra.mxu3 %v2106_v14  ;;  %v1597_v26 = vld [vmem:[%s5216_s18 + $0x48] sm:$0xff]  ;;  %v1590_v14 = vld [vmem:[%s5216_s18 + $0x10] sm:$0xff] }
 0x329   :  { %1568 = vmatpush.msrb.mxu3 %v5397_v27  ;;  %v1595_v27 = vld [vmem:[%s5216_s18 + $0x38] sm:$0xff] }
 0x32a   :  { %1549 = vmatpush.msrb.mxu2 %v5398_v36  ;;  %v1593_v36 = vld [vmem:[%s5216_s18 + $0x28] sm:$0xff] }
 0x32b   :  { %1569 = vmatpush.msrb.mxu3 %v5399_v10  ;;  %v1591_v10 = vld [vmem:[%s5216_s18 + $0x18] sm:$0xff] }
 0x32c   :  { %1550 = vmatpush.msrb.mxu2 %v5400_v16  ;;  %v1588_v16 = vld [vmem:[%s5216_s18] sm:$0xff] }
 0x32d   :  { %1570 = vmatpush.msrb.mxu3 %v5401_v55  ;;  %v1589_v55 = vld [vmem:[%s5216_s18 + $0x8] sm:$0xff] }
 0x32e   :  { %1551 = vmatpush.msrb.mxu2 %v5402_v60  ;;  %v2061_v60 = vld [vmem:[%s5215_s5] ss:$0 sm:$0xff] }
 0x32f   :  { %1571 = vmatpush.msrb.mxu3 %v5403_v47 }
 0x330   :  { %1552 = vmatpush.msrb.mxu2 %v5404_v28 }
 0x331   :  { %1572 = vmatpush.msrb.mxu3 %v5405_v38 }
 0x332   :  { %1553 = vmatpush.msrb.mxu2 %v5406_v54 }
 0x333   :  { %1573 = vmatpush.msrb.mxu3 %v5407_v9 }
 0x334   :  { %1554 = vmatpush.msrb.mxu2 %v5408_v23 }
 0x335   :  { %1574 = vmatpush.msrb.mxu3 %v5409_v44 }
 0x336   :  { %1555 = vmatpush.msrb.mxu2 %v5410_v17 }
 0x337   :  { %1575 = vmatpush.msrb.mxu3 %v5411_v46 }
 0x338   :  { %1556 = vmatpush.msrb.mxu2 %v5412_v33 }
 0x339   :  { %1576 = vmatpush.msrb.mxu3 %v5413_v52 }
 0x33a   :  { %1557 = vmatpush.msrb.mxu2 %v5414_v8 }
 0x33b   :  { %1577 = vmatpush.msrb.mxu3 %v5415_v49 }
 0x33c   :  { %1558 = vmatpush.msrb.mxu2 %v5416_v34 }
 0x33d   :  { %1578 = vmatpush.msrb.mxu3 %v5417_v62 }
 0x33e   :  { %1559 = vmatpush.msrb.mxu2 %v5418_v59 }
 0x33f   :  { %1579 = vmatpush.msrb.mxu3 %v5419_v31 }
 0x340   :  { %1560 = vmatpush.msrb.mxu2 %v5420_v61 }
 0x341   :  { %1580 = vmatpush.msrb.mxu3 %v4505_v40  ;;  %v2108_v40 = vld [vmem:[%s5311_s25 + $0x28] sm:$0xff] }
 0x342   :  { %1561 = vmatpush.msrb.mxu2 %v5421_v24 }
 0x343   :  { %1581 = vmatpush.msrb.mxu3 %v4531_v29  ;;  %v4708_v29 = vld [vmem:[%s5216_s18 + $0xf0] sm:$0xff] }
 0x344   :  { %1562 = vmatpush.msrb.mxu2 %v5422_v1  ;;  %1661 = vmatpush.msra.mxu0 %v4708_v29 }
 0x345   :  { %1582 = vmatpush.msrb.mxu3 %v5423_v21 }
 0x346   :  { %1563 = vmatpush.msrb.mxu2 %v5424_v35  ;;  %1662 = vmatpush.msra.mxu0 %v4718_v32 }
 0x347   :  { %1564 = vmatmul.f32.vlgmr.msrb.gmra.mxu2 %v2107_v15  ;;  %1583 = vmatpush.msrb.mxu3 %v4563_v41  ;;  %v4725_v41 = vld [vmem:[%s5216_s18 + $0xe8] sm:$0xff] }
 0x348   :  { %1584 = vmatmul.f32.vlgmr.msrb.gmra.mxu3 %v2108_v40  ;;  %1682 = vmatpush.msra.mxu1 %v4725_v41 }
 0x349   :  { %1663 = vmatpush.msra.mxu0 %v4730_v50 }
 0x34a   :  { %1683 = vmatpush.msra.mxu1 %v4735_v30 }
 0x34b   :  { %1664 = vmatpush.msra.mxu0 %v4742_v11 }
 0x34c   :  { %1684 = vmatpush.msra.mxu1 %v4747_v53 }
 0x34d   :  { %1665 = vmatpush.msra.mxu0 %v4754_v45 }
 0x34e   :  { %1685 = vmatpush.msra.mxu1 %v4759_v20 }
 0x34f   :  { %1666 = vmatpush.msra.mxu0 %v4766_v43 }
 0x350   :  { %1686 = vmatpush.msra.mxu1 %v4771_v51 }
 0x351   :  { %1667 = vmatpush.msra.mxu0 %v4778_v25 }
 0x352   :  { %1687 = vmatpush.msra.mxu1 %v4783_v39 }
 0x353   :  { %1668 = vmatpush.msra.mxu0 %v1604_v2 }
 0x354   :  { %1688 = vmatpush.msra.mxu1 %v1605_v3 }
 0x355   :  { %1669 = vmatpush.msra.mxu0 %v1602_v18 }
 0x356   :  { %1689 = vmatpush.msra.mxu1 %v1603_v42 }
 0x357   :  { %1670 = vmatpush.msra.mxu0 %v1600_v12  ;;  %v1365_v47 = vpop.f32.mrf.mxu0 }
 0x358   :  { %1690 = vmatpush.msra.mxu1 %v1601_v19  ;;  %v1366_v9 = vadd.f32 %v2061_v60, %v1365_v47  ;;  %v4965_v47 = vld [vmem:[%s5219_s22 + $0x48] sm:$0xff] }
 0x359   :  { %1671 = vmatpush.msra.mxu0 %v1598_v48 }
 0x35a   :  { %1691 = vmatpush.msra.mxu1 %v1599_v37 }
 0x35b   :  { %1672 = vmatpush.msra.mxu0 %v1596_v22 }
 0x35c   :  { %1692 = vmatpush.msra.mxu1 %v1597_v26 }
 0x35d   :  { %1673 = vmatpush.msra.mxu0 %v1594_v4 }
 0x35e   :  { %1693 = vmatpush.msra.mxu1 %v1595_v27 }
 0x35f   :  { %1674 = vmatpush.msra.mxu0 %v1592_v5 }
 0x360   :  { %v1079_v63 = vpop.f32.mrf.mxu2  ;;  %1694 = vmatpush.msra.mxu1 %v1593_v36 }
 0x361   :  { %v1080_v0 = vadd.f32 %v4792_v56, %v1079_v63  ;;  %v1099_v6 = vpop.f32.mrf.mxu3  ;;  %1675 = vmatpush.msra.mxu0 %v1590_v14 }
 0x362   :  { %1695 = vmatpush.msra.mxu1 %v1591_v10 }
 0x363   :  { %v4795_v7 = vadd.f32 %v1099_v6, %v1080_v0  ;;  %1676 = vmatpush.msra.mxu0 %v1588_v16 }
 0x364   :  { %1696 = vmatpush.msra.mxu1 %v1589_v55 }
 0x365   :  { %v1966_v57 = vmul.f32 %v4795_v7, %v4795_v7  ;;  %1820 = vmatpush.msrb.mxu0 %v4708_v29 }
 0x366   :  { %1840 = vmatpush.msrb.mxu1 %v4713_v13 }
 0x367   :  { %v1967_v58 = vsel %vm597_vm0, %v1966_v57, 0.0  ;;  %1821 = vmatpush.msrb.mxu0 %v4718_v32 }
 0x368   :  { %1968 = vadd.xlane.f32.xlu0 %v1967_v58  ;;  %1841 = vmatpush.msrb.mxu1 %v4725_v41  ;;  %v4905_v58 = vld [vmem:[%s5219_s22 + $0x70] sm:$0xff] }
 0x369   :  { %1822 = vmatpush.msrb.mxu0 %v4730_v50 }
 0x36a   :  { %1842 = vmatpush.msrb.mxu1 %v4735_v30 }
 0x36b   :  { %1823 = vmatpush.msrb.mxu0 %v4742_v11  ;;  %v4880_v11 = vld [vmem:[%s5218_s19] sm:$0x3] }
 0x36c   :  { %1843 = vmatpush.msrb.mxu1 %v4747_v53  ;;  %v1657_v53 = vperm.slane %v4880_v11, 0 }
 0x36d   :  { %1824 = vmatpush.msrb.mxu0 %v4754_v45  ;;  %v1658_v45 = vperm.slane %v4880_v11, 1 }
 0x36e   :  { %1844 = vmatpush.msrb.mxu1 %v4759_v20 }
 0x36f   :  { %1825 = vmatpush.msrb.mxu0 %v4766_v43 }
 0x370   :  { %1845 = vmatpush.msrb.mxu1 %v4771_v51 }
 0x371   :  { %1826 = vmatpush.msrb.mxu0 %v4778_v25 }
 0x372   :  { %1846 = vmatpush.msrb.mxu1 %v4783_v39  ;;  %v4891_v39 = vld [vmem:[%s5219_s22 + $0x78] sm:$0xff] }
 0x373   :  { %1827 = vmatpush.msrb.mxu0 %v1604_v2  ;;  %1780 = vmatpush.msra.mxu2 %v4891_v39  ;;  %v4910_v2 = vld [vmem:[%s5219_s22 + $0xf0] sm:$0xff] }
 0x374   :  { %1847 = vmatpush.msrb.mxu1 %v1605_v3 }
 0x375   :  { %1828 = vmatpush.msrb.mxu0 %v1602_v18  ;;  %1781 = vmatpush.msra.mxu2 %v4905_v58 }
 0x376   :  { %v1385_v23 = vpop.f32.mrf.mxu1  ;;  %1848 = vmatpush.msrb.mxu1 %v1603_v42  ;;  %v4917_v42 = vld [vmem:[%s5219_s22 + $0x68] sm:$0xff] }
 0x377   :  { %1829 = vmatpush.msrb.mxu0 %v1600_v12  ;;  %v1386_v17 = vadd.f32 %v1385_v23, %v1366_v9  ;;  %v4922_v12 = vld [vmem:[%s5219_s22 + $0xe8] sm:$0xff]  ;;  %1782 = vmatpush.msra.mxu2 %v4917_v42  ;;  %v4979_v23 = vld [vmem:[%s5219_s22 + $0x40] sm:$0xff] }
 0x378   :  { %1849 = vmatpush.msrb.mxu1 %v1601_v19 }
 0x379   :  { %1830 = vmatpush.msrb.mxu0 %v1598_v48 }
 0x37a   :  { %1850 = vmatpush.msrb.mxu1 %v1599_v37  ;;  %v1445_v34 = vpop.f32.mrf.mxu0  ;;  %v4929_v37 = vld [vmem:[%s5219_s22 + $0x60] sm:$0xff] }
 0x37b   :  { %1831 = vmatpush.msrb.mxu0 %v1596_v22  ;;  %v4934_v22 = vld [vmem:[%s5219_s22 + $0xe0] sm:$0xff]  ;;  %1783 = vmatpush.msra.mxu2 %v4929_v37 }
 0x37c   :  { %1851 = vmatpush.msrb.mxu1 %v1597_v26 }
 0x37d   :  { %1832 = vmatpush.msrb.mxu0 %v1594_v4 }
 0x37e   :  { %1852 = vmatpush.msrb.mxu1 %v1595_v27  ;;  %v1465_v59 = vpop.f32.mrf.mxu1  ;;  %v4941_v27 = vld [vmem:[%s5219_s22 + $0x58] sm:$0xff] }
 0x37f   :  { %1833 = vmatpush.msrb.mxu0 %v1592_v5  ;;  %v4946_v5 = vld [vmem:[%s5219_s22 + $0xd8] sm:$0xff]  ;;  %1784 = vmatpush.msra.mxu2 %v4941_v27 }
 0x380   :  { %1853 = vmatpush.msrb.mxu1 %v1593_v36 }
 0x381   :  { %1834 = vmatpush.msrb.mxu0 %v1590_v14 }
 0x382   :  { %1854 = vmatpush.msrb.mxu1 %v1591_v10  ;;  %v4953_v10 = vld [vmem:[%s5219_s22 + $0x50] sm:$0xff] }
 0x383   :  { %1835 = vmatpush.msrb.mxu0 %v1588_v16  ;;  %v4958_v16 = vld [vmem:[%s5219_s22 + $0xd0] sm:$0xff]  ;;  %1785 = vmatpush.msra.mxu2 %v4953_v10 }
 0x384   :  { %1855 = vmatpush.msrb.mxu1 %v1589_v55 }
 0x385   :  { %1786 = vmatpush.msra.mxu2 %v4965_v47 }
 0x387   :  { %1787 = vmatpush.msra.mxu2 %v4979_v23 }
 0x38a   :  { %v1225_v28 = vpop.f32.mrf.mxu2 }
 0x38b   :  { %v1226_v38 = vadd.f32 %v4792_v56, %v1225_v28  ;;  %v1245_v54 = vpop.f32.mrf.mxu3  ;;  %v4896_v56 = vld [vmem:[%s5219_s22 + $0xf8] sm:$0xff]  ;;  %v4970_v28 = vld [vmem:[%s5219_s22 + $0xc8] sm:$0xff] }
 0x38c   :  { %1800 = vmatpush.msra.mxu3 %v4896_v56 }
 0x38d   :  { %v4872_v44 = vadd.f32 %v1245_v54, %v1226_v38  ;;  %v5425_v38 = vld [vmem:[#allocation2_spill] sm:$0xff] }
 0x38e   :  { %1801 = vmatpush.msra.mxu3 %v4910_v2 }
 0x38f   :  { %v1998_v46 = vmul.f32 %v4872_v44, %v4872_v44 }
 0x390   :  { %1802 = vmatpush.msra.mxu3 %v4922_v12 }
 0x391   :  { %v1999_v33 = vsel %vm597_vm0, %v1998_v46, 0.0 }
 0x392   :  { %v1405_v52 = vpop.f32.mrf.mxu2  ;;  %2000 = vadd.xlane.f32.xlu1 %v1999_v33  ;;  %1803 = vmatpush.msra.mxu3 %v4934_v22 }
 0x393   :  { %v1406_v8 = vadd.f32 %v1405_v52, %v1386_v17  ;;  %v1425_v49 = vpop.f32.mrf.mxu3  ;;  %v4984_v17 = vld [vmem:[%s5219_s22 + $0xc0] sm:$0xff]  ;;  %v4995_v52 = vld [vmem:[%s5219_s22 + $0x38] sm:$0xff] }
 0x394   :  { %1804 = vmatpush.msra.mxu3 %v4946_v5  ;;  %1788 = vmatpush.msra.mxu2 %v4995_v52 }
 0x395   :  { %v1426_v62 = vadd.f32 %v1425_v49, %v1406_v8  ;;  %v5000_v8 = vld [vmem:[%s5219_s22 + $0xb8] sm:$0xff] }
 0x396   :  { %1805 = vmatpush.msra.mxu3 %v4958_v16 }
 0x397   :  { %v1446_v31 = vadd.f32 %v1445_v34, %v1426_v62  ;;  %v5011_v62 = vld [vmem:[%s5219_s22 + $0x30] sm:$0xff] }
 0x398   :  { %1806 = vmatpush.msra.mxu3 %v4970_v28  ;;  %1789 = vmatpush.msra.mxu2 %v5011_v62 }
 0x399   :  { %v1466_v61 = vadd.f32 %v1465_v59, %v1446_v31  ;;  %v5016_v59 = vld [vmem:[%s5219_s22 + $0xb0] sm:$0xff] }
 0x39a   :  { %1807 = vmatpush.msra.mxu3 %v4984_v17 }
 0x39b   :  { %1677 = vmatmul.f32.vlgmr.msra.gmra.mxu0 %v1466_v61  ;;  %1697 = vmatmul.f32.vlgmr.msra.gmra.mxu1 %v1466_v61 }
 0x39c   :  { %1808 = vmatpush.msra.mxu3 %v5000_v8 }
 0x39e   :  { %v1525_v15 = vpop.f32.mrf.mxu0  ;;  %1809 = vmatpush.msra.mxu3 %v5016_v59 }
 0x3a0   :  { %v1545_v29 = vpop.f32.mrf.mxu1 }
 0x3aa   :  { %v1485_v24 = vpop.f32.mrf.mxu2 }
 0x3ab   :  { %v1486_v1 = vadd.f32 %v2061_v60, %v1485_v24  ;;  %v1505_v21 = vpop.f32.mrf.mxu3 }
 0x3ad   :  { %v1506_v35 = vadd.f32 %v1505_v21, %v1486_v1  ;;  %v5025_v21 = vld [vmem:[%s5219_s22 + $0x28] sm:$0xff] }
 0x3ae   :  { %1790 = vmatpush.msra.mxu2 %v5025_v21 }
 0x3af   :  { %v1526_v40 = vadd.f32 %v1525_v15, %v1506_v35  ;;  %v5030_v35 = vld [vmem:[%s5219_s22 + $0xa8] sm:$0xff] }
 0x3b0   :  { %1810 = vmatpush.msra.mxu3 %v5030_v35 }
 0x3b1   :  { %v1546_v13 = vadd.f32 %v1545_v29, %v1526_v40  ;;  %v5037_v29 = vld [vmem:[%s5219_s22 + $0x20] sm:$0xff] }
 0x3b2   :  { %1791 = vmatpush.msra.mxu2 %v5037_v29 }
 0x3ca   :  { %v1565_v32 = vpop.f32.mrf.mxu2 }
 0x3cb   :  { %v1566_v41 = vadd.f32 %v1565_v32, %v1546_v13  ;;  %v1585_v50 = vpop.f32.mrf.mxu3  ;;  %v5042_v13 = vld [vmem:[%s5219_s22 + $0xa0] sm:$0xff] }
 0x3cc   :  { %1811 = vmatpush.msra.mxu3 %v5042_v13 }
 0x3cd   :  { %v1586_v30 = vadd.f32 %v1585_v50, %v1566_v41  ;;  %v5049_v50 = vld [vmem:[%s5219_s22 + $0x18] sm:$0xff] }
 0x3ce   :  { %1792 = vmatpush.msra.mxu2 %v5049_v50 }
 0x3cf   :  { %1836 = vmatmul.f32.vlgmr.msrb.gmra.mxu0 %v1586_v30  ;;  %1856 = vmatmul.f32.vlgmr.msrb.gmra.mxu1 %v1586_v30  ;;  %v5054_v30 = vld [vmem:[%s5219_s22 + $0x98] sm:$0xff] }
 0x3d0   :  { %1812 = vmatpush.msra.mxu3 %v5054_v30 }
 0x418   :  { %v1678_v20 = vpop.f32.mrf.mxu0  ;;  %v1698_v43 = vpop.f32.mrf.mxu1 }
 0x419   :  { %v1679_v51 = vadd.f32 %v1678_v20, %v1657_v53  ;;  %v1699_v25 = vadd.f32 %v1698_v43, %v1658_v45 }
 0x41b   :  { %v1701_v63 = vsel %vm597_vm0, %v1679_v51, 0.0  ;;  %v1708_v0 = vsel %vm597_vm0, %v1699_v25, 0.0 }
 0x41c   :  { %v1702_v6 = vrot.slane %v1701_v63, 4  ;;  %v1709_v57 = vrot.slane %v1708_v0, 4 }
 0x41e   :  { %v1703_v3 = vadd.f32 %v1702_v6, %v1701_v63  ;;  %v1710_v18 = vadd.f32 %v1709_v57, %v1708_v0  ;;  %v5073_v6 = vld [vmem:[%s5219_s22 + $0x8] sm:$0xff] }
 0x41f   :  { %v5078_v57 = vld [vmem:[%s5219_s22 + $0x88] sm:$0xff] }
 0x420   :  { %v1704_v19 = vrot.slane %v1703_v3, 2  ;;  %v1711_v48 = vrot.slane %v1710_v18, 2 }
 0x422   :  { %v1705_v26 = vadd.f32 %v1704_v19, %v1703_v3  ;;  %v1712_v4 = vadd.f32 %v1711_v48, %v1710_v18  ;;  %v5085_v19 = vld [vmem:[%s5219_s22] sm:$0xff] }
 0x423   :  { %v5090_v48 = vld [vmem:[%s5219_s22 + $0x80] sm:$0xff] }
 0x424   :  { %v1706_v36 = vrot.slane %v1705_v26, 1  ;;  %v1713_v14 = vrot.slane %v1712_v4, 1 }
 0x426   :  { %v1707_v55 = vadd.f32 %v1706_v36, %v1705_v26  ;;  %v1714_v60 = vadd.f32 %v1713_v14, %v1712_v4 }
 0x428   :  { %v1715_v54 = vmul.f32 %v1707_v55, %v5425_v38  ;;  %v1716_v9 = vmul.f32 %v1714_v60, %v5425_v38 }
 0x42a   :  { %v4988_v46 = vsub.f32 %v1679_v51, %v1715_v54  ;;  %v4990_v33 = vsub.f32 %v1699_v25, %v1716_v9  ;;  %v5061_v51 = vld [vmem:[%s5219_s22 + $0x10] sm:$0xff]  ;;  %v5127_v54 = vld [vmem:[%s5221_s21] sm:$0x3] }
 0x42b   :  { %v5066_v25 = vld [vmem:[%s5219_s22 + $0x90] sm:$0xff]  ;;  %1793 = vmatpush.msra.mxu2 %v5061_v51 }
 0x42c   :  { %v1719_v49 = vmul.f32 %v4988_v46, %v4988_v46  ;;  %v1720_v34 = vmul.f32 %v4990_v33, %v4990_v33  ;;  %1813 = vmatpush.msra.mxu3 %v5066_v25 }
 0x42d   :  { %1794 = vmatpush.msra.mxu2 %v5073_v6 }
 0x42e   :  { %v1721_v31 = vsel %vm597_vm0, %v1719_v49, 0.0  ;;  %v1728_v61 = vsel %vm597_vm0, %v1720_v34, 0.0  ;;  %1814 = vmatpush.msra.mxu3 %v5078_v57  ;;  %v1769_v49 = vperm.slane %v5127_v54, 0 }
 0x42f   :  { %v1722_v24 = vrot.slane %v1721_v31, 4  ;;  %v1729_v1 = vrot.slane %v1728_v61, 4  ;;  %1795 = vmatpush.msra.mxu2 %v5085_v19 }
 0x430   :  { %1815 = vmatpush.msra.mxu3 %v5090_v48 }
 0x431   :  { %v1723_v15 = vadd.f32 %v1722_v24, %v1721_v31  ;;  %v1730_v40 = vadd.f32 %v1729_v1, %v1728_v61  ;;  %1926 = vmatpush.msrb.mxu2 %v4891_v39  ;;  %v1770_v24 = vperm.slane %v5127_v54, 1 }
 0x432   :  { %1946 = vmatpush.msrb.mxu3 %v4896_v56 }
 0x433   :  { %v1724_v32 = vrot.slane %v1723_v15, 2  ;;  %v1731_v41 = vrot.slane %v1730_v40, 2  ;;  %1927 = vmatpush.msrb.mxu2 %v4905_v58 }
 0x434   :  { %1947 = vmatpush.msrb.mxu3 %v4910_v2 }
 0x435   :  { %v1725_v20 = vadd.f32 %v1724_v32, %v1723_v15  ;;  %v1732_v43 = vadd.f32 %v1731_v41, %v1730_v40  ;;  %1928 = vmatpush.msrb.mxu2 %v4917_v42 }
 0x436   :  { %1948 = vmatpush.msrb.mxu3 %v4922_v12 }
 0x437   :  { %v1726_v63 = vrot.slane %v1725_v20, 1  ;;  %v1733_v0 = vrot.slane %v1732_v43, 1  ;;  %1929 = vmatpush.msrb.mxu2 %v4929_v37  ;;  %v5115_v37 = vld [vmem:[%s5220_s20] sm:$0x3] }
 0x438   :  { %1949 = vmatpush.msrb.mxu3 %v4934_v22 }
 0x439   :  { %v1727_v3 = vadd.f32 %v1726_v63, %v1725_v20  ;;  %v1734_v18 = vadd.f32 %v1733_v0, %v1732_v43  ;;  %1930 = vmatpush.msrb.mxu2 %v4941_v27 }
 0x43a   :  { %1950 = vmatpush.msrb.mxu3 %v4946_v5 }
 0x43b   :  { %v1735_v26 = vmul.f32 %v1727_v3, %v5425_v38  ;;  %v1736_v4 = vmul.f32 %v1734_v18, %v5425_v38  ;;  %1931 = vmatpush.msrb.mxu2 %v4953_v10 }
 0x43c   :  { %1951 = vmatpush.msrb.mxu3 %v4958_v16 }
 0x43d   :  { %v1737_v36 = vadd.f32 1e-05, %v1735_v26  ;;  %v1738_v14 = vadd.f32 1e-05, %v1736_v4  ;;  %1932 = vmatpush.msrb.mxu2 %v4965_v47  ;;  %v1762_v47 = vperm.slane %v5115_v37, 0 }
 0x43e   :  { %1952 = vmatpush.msrb.mxu3 %v4970_v28 }
 0x43f   :  { %2081 = vrsqrt.f32 %v1737_v36  ;;  %1933 = vmatpush.msrb.mxu2 %v4979_v23  ;;  %vm1745_vm13 = vweird.f32 %v1737_v36  ;;  %vm1755_vm15 = vweird.f32 %v1738_v14 }
 0x440   :  { %2083 = vrsqrt.f32 %v1738_v14  ;;  %1953 = vmatpush.msrb.mxu3 %v4984_v17 }
 0x441   :  { %1934 = vmatpush.msrb.mxu2 %v4995_v52 }
 0x442   :  { %1954 = vmatpush.msrb.mxu3 %v5000_v8  ;;  %v1763_v8 = vperm.slane %v5115_v37, 1 }
 0x443   :  { %1935 = vmatpush.msrb.mxu2 %v5011_v62 }
 0x444   :  { %1955 = vmatpush.msrb.mxu3 %v5016_v59 }
 0x445   :  { %v2082_v39 = vpop.eup %2081  ;;  %1936 = vmatpush.msrb.mxu2 %v5025_v21 }
 0x446   :  { %v2084_v56 = vpop.eup %2083  ;;  %v1740_v58 = vmul.f32 %v2082_v39, %v1737_v36  ;;  %vm1746_vm11 = vweird.f32 %v2082_v39  ;;  %1956 = vmatpush.msrb.mxu3 %v5030_v35 }
 0x447   :  { %v1750_v2 = vmul.f32 %v2084_v56, %v1738_v14  ;;  %vm1756_vm12 = vweird.f32 %v2084_v56  ;;  %vm1747_vm14 = vmor %vm1745_vm13, %vm1746_vm11  ;;  %1937 = vmatpush.msrb.mxu2 %v5037_v29 }
 0x448   :  { %v1741_v42 = vmul.f32 %v2082_v39, %v1740_v58  ;;  %vm1757_vm1 = vmor %vm1755_vm15, %vm1756_vm12  ;;  %1957 = vmatpush.msrb.mxu3 %v5042_v13 }
 0x449   :  { %v1751_v12 = vmul.f32 %v2084_v56, %v1750_v2  ;;  %1938 = vmatpush.msrb.mxu2 %v5049_v50 }
 0x44a   :  { %v1742_v22 = vmul.f32 0.5, %v1741_v42  ;;  %1958 = vmatpush.msrb.mxu3 %v5054_v30 }
 0x44b   :  { %v1752_v27 = vmul.f32 0.5, %v1751_v12  ;;  %1939 = vmatpush.msrb.mxu2 %v5061_v51 }
 0x44c   :  { %v1837_v5 = vpop.f32.mrf.mxu0  ;;  %v1857_v10 = vpop.f32.mrf.mxu1  ;;  %v1743_v16 = vsub.f32 1.5, %v1742_v22  ;;  %1959 = vmatpush.msrb.mxu3 %v5066_v25 }
 0x44d   :  { %v1838_v55 = vadd.f32 %v1837_v5, %v1657_v53  ;;  %v1858_v60 = vadd.f32 %v1857_v10, %v1658_v45  ;;  %v1753_v28 = vsub.f32 1.5, %v1752_v27  ;;  %1940 = vmatpush.msrb.mxu2 %v5073_v6 }
 0x44e   :  { %v1744_v9 = vmul.f32 %v2082_v39, %v1743_v16  ;;  %1960 = vmatpush.msrb.mxu3 %v5078_v57 }
 0x44f   :  { %v1860_v53 = vsel %vm597_vm0, %v1838_v55, 0.0  ;;  %v1867_v11 = vsel %vm597_vm0, %v1858_v60, 0.0  ;;  %v1754_v45 = vmul.f32 %v2084_v56, %v1753_v28  ;;  %1941 = vmatpush.msrb.mxu2 %v5085_v19 }
 0x450   :  { %v1861_v23 = vrot.slane %v1860_v53, 4  ;;  %v1868_v17 = vrot.slane %v1867_v11, 4  ;;  %v1748_v52 = vsel %vm1747_vm14, %v2082_v39, %v1744_v9  ;;  %1961 = vmatpush.msrb.mxu3 %v5090_v48 }
 0x451   :  { %v1759_v34 = vmul.f32 %v1748_v52, %v4988_v46  ;;  %v1758_v62 = vsel %vm1757_vm1, %v2084_v56, %v1754_v45 }
 0x452   :  { %v1862_v59 = vadd.f32 %v1861_v23, %v1860_v53  ;;  %v1869_v31 = vadd.f32 %v1868_v17, %v1867_v11  ;;  %v1760_v61 = vmul.f32 %v1758_v62, %v4990_v33 }
 0x453   :  { %v1766_v1 = vmul.f32 %v1762_v47, %v1759_v34 }
 0x454   :  { %v1863_v21 = vrot.slane %v1862_v59, 2  ;;  %v1870_v35 = vrot.slane %v1869_v31, 2  ;;  %v1767_v46 = vmul.f32 %v1763_v8, %v1760_v61 }
 0x455   :  { %v1773_v33 = vadd.f32 %v1769_v49, %v1766_v1 }
 0x456   :  { %v1864_v15 = vadd.f32 %v1863_v21, %v1862_v59  ;;  %v1871_v40 = vadd.f32 %v1870_v35, %v1869_v31  ;;  %v1774_v29 = vadd.f32 %v1770_v24, %v1767_v46 }
 0x457   :  { %v1775_v41 = vmax.f32 %v1773_v33, 0.0 }
 0x458   :  { %v1865_v13 = vrot.slane %v1864_v15, 1  ;;  %v1872_v32 = vrot.slane %v1871_v40, 1  ;;  %v1776_v50 = vmax.f32 %v1774_v29, 0.0 }
 0x459   :  { %1796 = vmatmul.f32.vlgmr.msra.gmra.mxu2 %v1775_v41 }
 0x45a   :  { %v1866_v30 = vadd.f32 %v1865_v13, %v1864_v15  ;;  %v1873_v20 = vadd.f32 %v1872_v32, %v1871_v40  ;;  %1816 = vmatmul.f32.vlgmr.msra.gmra.mxu3 %v1776_v50  ;;  %v2062_v15 = vld [vmem:[%s5217_s23] ss:$0 sm:$0xff]  ;;  %v2001_v50 = vpop.xlane.xlu1 %2000 }
 0x45c   :  { %v1874_v43 = vmul.f32 %v1866_v30, %v5425_v38  ;;  %v1875_v51 = vmul.f32 %v1873_v20, %v5425_v38  ;;  %v1969_v30 = vpop.xlane.xlu0 %1968 }
 0x45d   :  { %v1970_v20 = vmax.f32 %v1969_v30, 1e-24 }
 0x45e   :  { %v1876_v25 = vsub.f32 %v1838_v55, %v1874_v43  ;;  %v1877_v63 = vsub.f32 %v1858_v60, %v1875_v51 }
 0x45f   :  { %vm1977_vm9 = vweird.f32 %v1970_v20 }
 0x460   :  { %v1878_v0 = vmul.f32 %v1876_v25, %v1876_v25  ;;  %v1879_v3 = vmul.f32 %v1877_v63, %v1877_v63 }
 0x462   :  { %v1880_v6 = vsel %vm597_vm0, %v1878_v0, 0.0  ;;  %v1887_v57 = vsel %vm597_vm0, %v1879_v3, 0.0 }
 0x463   :  { %v1881_v18 = vrot.slane %v1880_v6, 4  ;;  %v1888_v26 = vrot.slane %v1887_v57, 4 }
 0x465   :  { %v1882_v4 = vadd.f32 %v1881_v18, %v1880_v6  ;;  %v1889_v36 = vadd.f32 %v1888_v26, %v1887_v57 }
 0x467   :  { %v1883_v14 = vrot.slane %v1882_v4, 2  ;;  %v1890_v19 = vrot.slane %v1889_v36, 2 }
 0x469   :  { %v1884_v39 = vadd.f32 %v1883_v14, %v1882_v4  ;;  %v1891_v56 = vadd.f32 %v1890_v19, %v1889_v36 }
 0x46b   :  { %v1885_v58 = vrot.slane %v1884_v39, 1  ;;  %v1892_v2 = vrot.slane %v1891_v56, 1 }
 0x46d   :  { %v1886_v42 = vadd.f32 %v1885_v58, %v1884_v39  ;;  %v1893_v48 = vadd.f32 %v1892_v2, %v1891_v56 }
 0x46f   :  { %v1894_v12 = vmul.f32 %v1886_v42, %v5425_v38  ;;  %v1895_v22 = vmul.f32 %v1893_v48, %v5425_v38 }
 0x471   :  { %v1896_v27 = vadd.f32 1e-05, %v1894_v12  ;;  %v1897_v5 = vadd.f32 1e-05, %v1895_v22 }
 0x473   :  { %2085 = vrsqrt.f32 %v1896_v27  ;;  %vm1904_vm4 = vweird.f32 %v1896_v27  ;;  %vm1914_vm6 = vweird.f32 %v1897_v5 }
 0x474   :  { %2087 = vrsqrt.f32 %v1897_v5 }
 0x475   :  { %2089 = vrsqrt.f32 %v1970_v20 }
 0x479   :  { %v2086_v10 = vpop.eup %2085 }
 0x47a   :  { %v2088_v16 = vpop.eup %2087  ;;  %v1899_v55 = vmul.f32 %v2086_v10, %v1896_v27  ;;  %vm1905_vm2 = vweird.f32 %v2086_v10 }
 0x47b   :  { %v1909_v60 = vmul.f32 %v2088_v16, %v1897_v5  ;;  %vm1915_vm3 = vweird.f32 %v2088_v16  ;;  %vm1906_vm5 = vmor %vm1904_vm4, %vm1905_vm2 }
 0x47c   :  { %v1900_v28 = vmul.f32 %v2086_v10, %v1899_v55  ;;  %vm1916_vm7 = vmor %vm1914_vm6, %vm1915_vm3 }
 0x47d   :  { %v1910_v9 = vmul.f32 %v2088_v16, %v1909_v60 }
 0x47e   :  { %v1901_v53 = vmul.f32 0.5, %v1900_v28 }
 0x47f   :  { %v1911_v11 = vmul.f32 0.5, %v1910_v9 }
 0x480   :  { %v1902_v45 = vsub.f32 1.5, %v1901_v53 }
 0x481   :  { %v1912_v23 = vsub.f32 1.5, %v1911_v11 }
 0x482   :  { %v1903_v17 = vmul.f32 %v2086_v10, %v1902_v45 }
 0x483   :  { %v1913_v38 = vmul.f32 %v2088_v16, %v1912_v23 }
 0x484   :  { %v1907_v52 = vsel %vm1906_vm5, %v2086_v10, %v1903_v17  ;;  %vm2043_vm5 = vcmask 3072  }
 0x485   :  { %v1918_v34 = vmul.f32 %v1907_v52, %v1876_v25  ;;  %v1917_v62 = vsel %vm1916_vm7, %v2088_v16, %v1913_v38  ;;  %v2002_v25 = vmax.f32 %v2001_v50, 1e-24 }
 0x486   :  { %v1919_v59 = vmul.f32 %v1917_v62, %v1877_v63  ;;  %v2090_v63 = vpop.eup %2089 }
 0x487   :  { %v1920_v31 = vmul.f32 %v1918_v34, %v1762_v47  ;;  %v1972_v0 = vmul.f32 %v2090_v63, %v1970_v20  ;;  %vm1978_vm8 = vweird.f32 %v2090_v63  ;;  %vm2009_vm3 = vweird.f32 %v2002_v25 }
 0x488   :  { %v1921_v61 = vmul.f32 %v1919_v59, %v1763_v8  ;;  %vm5182_vm10 = vmor %vm1977_vm9, %vm1978_vm8 }
 0x489   :  { %v1922_v1 = vadd.f32 %v1920_v31, %v1769_v49  ;;  %v1973_v18 = vmul.f32 %v2090_v63, %v1972_v0 }
 0x48a   :  { %v1923_v21 = vadd.f32 %v1921_v61, %v1770_v24 }
 0x48b   :  { %v1924_v35 = vmax.f32 %v1922_v1, 0.0  ;;  %v1974_v14 = vmul.f32 0.5, %v1973_v18 }
 0x48c   :  { %v1925_v46 = vmax.f32 %v1923_v21, 0.0 }
 0x48d   :  { %1942 = vmatmul.f32.vlgmr.msrb.gmra.mxu2 %v1924_v35  ;;  %v1975_v58 = vsub.f32 1.5, %v1974_v14 }
 0x48e   :  { %1962 = vmatmul.f32.vlgmr.msrb.gmra.mxu3 %v1925_v46 }
 0x48f   :  { %v1976_v22 = vmul.f32 %v2090_v63, %v1975_v58 }
 0x491   :  { %v1980_v60 = vsel %vm5182_vm10, %v2090_v63, %v1976_v22 }
 0x492   :  { %v1981_v45 = vmul.f32 %v1980_v60, %v4795_v7 }
 0x4dc   :  { %v1797_v40 = vpop.f32.mrf.mxu2 }
 0x4dd   :  { %v1798_v33 = vadd.f32 %v2062_v15, %v1797_v40  ;;  %v1817_v47 = vpop.f32.mrf.mxu3 }
 0x4df   :  { %v5176_v29 = vadd.f32 %v1817_v47, %v1798_v33 }
 0x4e1   :  { %v2014_v37 = vmul.f32 %v5176_v29, %v5176_v29 }
 0x4e3   :  { %v2015_v8 = vsel %vm597_vm0, %v2014_v37, 0.0 }
 0x4e4   :  { %2016 = vadd.xlane.f32.xlu1 %v2015_v8 }
 0x510   :  { %v1943_v54 = vpop.f32.mrf.mxu2 }
 0x511   :  { %v1944_v49 = vadd.f32 %v2062_v15, %v1943_v54  ;;  %v1963_v24 = vpop.f32.mrf.mxu3 }
 0x513   :  { %v1964_v13 = vadd.f32 %v1963_v24, %v1944_v49 }
 0x515   :  { %v1982_v32 = vmul.f32 %v1964_v13, %v1964_v13 }
 0x517   :  { %v1983_v41 = vsel %vm597_vm0, %v1982_v32, 0.0 }
 0x518   :  { %1984 = vadd.xlane.f32.xlu0 %v1983_v41 }
 0x557   :  { %v2017_v43 = vpop.xlane.xlu1 %2016 }
 0x558   :  { %v2018_v51 = vmax.f32 %v2017_v43, 1e-24 }
 0x55a   :  { %2091 = vrsqrt.f32 %v2018_v51  ;;  %vm2025_vm1 = vweird.f32 %v2018_v51 }
 0x55b   :  { %2093 = vrsqrt.f32 %v2002_v25 }
 0x560   :  { %v2092_v3 = vpop.eup %2091 }
 0x561   :  { %v2094_v57 = vpop.eup %2093  ;;  %v2020_v4 = vmul.f32 %v2092_v3, %v2018_v51  ;;  %vm2026_vm12 = vweird.f32 %v2092_v3 }
 0x562   :  { %v2004_v36 = vmul.f32 %v2094_v57, %v2002_v25  ;;  %vm2010_vm15 = vweird.f32 %v2094_v57  ;;  %vm2027_vm2 = vmor %vm2025_vm1, %vm2026_vm12 }
 0x563   :  { %v2021_v19 = vmul.f32 %v2092_v3, %v2020_v4  ;;  %vm2011_vm4 = vmor %vm2009_vm3, %vm2010_vm15 }
 0x564   :  { %v2005_v39 = vmul.f32 %v2094_v57, %v2004_v36 }
 0x565   :  { %v2022_v2 = vmul.f32 0.5, %v2021_v19 }
 0x566   :  { %v2006_v48 = vmul.f32 0.5, %v2005_v39 }
 0x567   :  { %v2023_v27 = vsub.f32 1.5, %v2022_v2 }
 0x568   :  { %v2007_v16 = vsub.f32 1.5, %v2006_v48 }
 0x569   :  { %v2024_v28 = vmul.f32 %v2092_v3, %v2023_v27 }
 0x56a   :  { %v2008_v11 = vmul.f32 %v2094_v57, %v2007_v16 }
 0x56b   :  { %v2028_v17 = vsel %vm2027_vm2, %v2092_v3, %v2024_v28 }
 0x56c   :  { %v2012_v52 = vsel %vm2011_vm4, %v2094_v57, %v2008_v11  ;;  %v2029_v62 = vmul.f32 %v2028_v17, %v5176_v29 }
 0x56d   :  { %v2013_v59 = vmul.f32 %v2012_v52, %v4872_v44 }
 0x56f   :  { %v2036_v31 = vmul.f32 %v2029_v62, %v2013_v59 }
 0x571   :  { %v2037_v61 = vsel %vm597_vm0, %v2036_v31, 0.0 }
 0x58b   :  { %v1985_v6 = vpop.xlane.xlu0 %1984 }
 0x58c   :  { %v1986_v26 = vmax.f32 %v1985_v6, 1e-24 }
 0x58e   :  { %2095 = vrsqrt.f32 %v1986_v26  ;;  %vm1993_vm13 = vweird.f32 %v1986_v26 }
 0x594   :  { %v2096_v56 = vpop.eup %2095 }
 0x595   :  { %v1988_v42 = vmul.f32 %v2096_v56, %v1986_v26  ;;  %vm1994_vm11 = vweird.f32 %v2096_v56 }
 0x596   :  { %vm1995_vm14 = vmor %vm1993_vm13, %vm1994_vm11 }
 0x597   :  { %v1989_v12 = vmul.f32 %v2096_v56, %v1988_v42 }
 0x599   :  { %v1990_v5 = vmul.f32 0.5, %v1989_v12 }
 0x59b   :  { %v1991_v55 = vsub.f32 1.5, %v1990_v5 }
 0x59d   :  { %v1992_v9 = vmul.f32 %v2096_v56, %v1991_v55 }
 0x59f   :  { %v1996_v53 = vsel %vm1995_vm14, %v2096_v56, %v1992_v9 }
 0x5a0   :  { %v1997_v23 = vmul.f32 %v1996_v53, %v1964_v13 }
 0x5a2   :  { %v2030_v38 = vmul.f32 %v1997_v23, %v1981_v45 }
 0x5a4   :  { %v2031_v34 = vsel %vm597_vm0, %v2030_v38, 0.0 }
 0x5a5   :  { %2032 = vadd.xlane.f32.xlu2 %v2031_v34 }
 0x5ad   :  { %2038 = vadd.xlane.f32.xlu2 %v2037_v61 }
 0x618   :  { %v2033_v1 = vpop.xlane.xlu2 %2032 }
 0x619   :  { %v2034_v21 = vmul.f32 2.0, %v2033_v1 }
 0x61b   :  { %v2035_v46 = vsub.f32 2.0, %v2034_v21 }
 0x620   :  { %v2039_v7 = vpop.xlane.xlu2 %2038 }
 0x621   :  { %v2040_v35 = vmul.f32 2.0, %v2039_v7 }
 0x623   :  { %v2041_v15 = vsub.f32 2.0, %v2040_v35 }
 0x625   :  { %v2042_v40 = vadd.f32 %v2041_v15, %v2035_v46 }
 0x627   :  { %2044 = vst.msk [vmem:[%s5222_s26] sm:$0xf] %vm2043_vm5, %v2042_v40 }

</bundles_post_ra>
